<compile_context>
chip_gen: v7x
topology: tpu7x:2x2x1
jax: 0.10.0
libtpu: 0.0.40
codegen_flags: <defaults>
</compile_context>

<pallas_src>
import functools

import jax
import jax.numpy as jnp
from jax import lax
from jax.experimental import pallas as pl
from jax.experimental.pallas import tpu as pltpu

N_HIDDEN = 40
N_ATTN = 40
N_FC = 20
N_CLASSES = 7
GP = 128          # gate pitch: each LSTM gate padded to its own 128-lane block
SUBLANE = 8


# ----------------------------------------------------------------------------- kernel
def _lstm_attn_kernel(
    x_ref,            # (T, Bp, F)      time-major, batch-padded input (f32)
    wih0_ref,         # (F, 4*GP)       layer-0 input weights, gate-block padded (bf16)
    whh0_ref,         # (GP, 4*GP)      layer-0 recurrent weights (bf16)
    b0_ref,           # (1, 4*GP)       b_ih0 + b_hh0 (f32)
    wih1_ref,         # (GP, 4*GP)      layer-1 input weights (bf16)
    whh1_ref,         # (GP, 4*GP)      layer-1 recurrent weights (bf16)
    b1_ref,           # (1, 4*GP)       b_ih1 + b_hh1 (f32)
    ws1_ref,          # (GP, GP)        attention W_s1 (rows>=H, cols>=A zero) (bf16)
    bs1_ref,          # (1, GP)         (f32)
    ws2_ref,          # (GP, GP)        attention W_s2, lane-replicated columns (bf16)
    bs2_ref,          # (1, GP)         (f32)
    wfc_ref,          # (GP, N_FC)      (bf16)
    bfc_ref,          # (1, N_FC)       (f32)
    wlab_ref,         # (N_FC, N_CLASSES) (bf16)
    blab_ref,         # (1, N_CLASSES)  (f32)
    out_ref,          # (Bp, N_CLASSES)
    xproj_ref,        # scratch (T, Bp, 4*GP)   precomputed x @ W_ih0 + b0 (f32)
    lstm_out_ref,     # scratch (T, Bp, GP)     layer-1 hidden states (f32)
):
    T, Bp, F = x_ref.shape
    f32 = jnp.float32
    bf16 = jnp.bfloat16

    # ---- hoisted: layer-0 input projection + bias fold, all timesteps in one matmul.
    x_slab = x_ref[...].reshape(T * Bp, F).astype(bf16)
    xp = jnp.dot(x_slab, wih0_ref[...], preferred_element_type=f32) + b0_ref[...]
    xproj_ref[...] = xp.reshape(T, Bp, 4 * GP)

    # ---- hoisted: layer-1 bias broadcast (JAX does not CSE broadcast_in_dim).
    b1_full = jnp.broadcast_to(b1_ref[...], (Bp, 4 * GP))

    def _sigmoid(z):
        # 1 EUP push (tanh) + VPU fma instead of exp + reciprocal (2 EUP pushes).
        return 0.5 * jnp.tanh(0.5 * z) + 0.5

    def gates_to_hc(g, c):
        # PyTorch gate order i, f, g, o; each gate is a 128-lane-aligned block.
        i = _sigmoid(g[:, 0 * GP:1 * GP])
        f = _sigmoid(g[:, 1 * GP:2 * GP])
        gg = jnp.tanh(g[:, 2 * GP:3 * GP])
        o = _sigmoid(g[:, 3 * GP:4 * GP])
        c_new = f * c + i * gg
        h_new = o * jnp.tanh(c_new)
        return h_new, c_new

    def step(t, carry):
        h0, c0, h1, c1 = carry
        # layer-1 recurrent matmul issued first: h1_{t-1} is ready at step entry, so
        # this MXU push overlaps the layer-0 matmul + EUP nonlinearities.
        g1_rec = jnp.dot(h1.astype(bf16), whh1_ref[...], preferred_element_type=f32)
        # layer 0: recurrent matmul only (input part precomputed).
        g0 = xproj_ref[t] + jnp.dot(
            h0.astype(bf16), whh0_ref[...], preferred_element_type=f32)
        h0n, c0n = gates_to_hc(g0, c0)
        # layer 1: input-part matmul on the fresh h0_t, added to the early recurrent part.
        g1 = g1_rec + jnp.dot(
            h0n.astype(bf16), wih1_ref[...], preferred_element_type=f32) + b1_full
        h1n, c1n = gates_to_hc(g1, c1)
        lstm_out_ref[t] = h1n
        return (h0n, c0n, h1n, c1n)

    z = jnp.zeros((Bp, GP), f32)                      # init_hidden(): zeros
    lax.fori_loop(0, T, step, (z, z, z, z), unroll=True)

    # ---- attention scoring, hoisted out of the recurrence (one batched matmul pass).
    lo = lstm_out_ref[...]                            # (T, Bp, GP), lanes >= H are zero
    lo_slab = lo.reshape(T * Bp, GP)
    s1 = jnp.tanh(
        jnp.dot(lo_slab.astype(bf16), ws1_ref[...], preferred_element_type=f32)
        + bs1_ref[...]
    )                                                 # (T*Bp, GP)
    scores = jnp.dot(s1.astype(bf16), ws2_ref[...], preferred_element_type=f32) + bs2_ref[...]
    scores = scores.reshape(T, Bp, GP)                # lane-replicated scalar score

    # softmax over time (dim=2 after permute in the PyTorch code == over T here)
    m = jnp.max(scores, axis=0, keepdims=True)
    e = jnp.exp(scores - m)
    attn = e * pl.reciprocal(jnp.sum(e, axis=0, keepdims=True), approx=True)

    # hidden_matrix = bmm(attn (B,1,T), lstm_out (B,T,H)) -> (B, H)
    ctx = jnp.sum(attn * lo, axis=0)                  # (Bp, GP)

    fc = jnp.dot(ctx.astype(bf16), wfc_ref[...], preferred_element_type=f32) + bfc_ref[...]
    logits = jnp.dot(fc.astype(bf16), wlab_ref[...], preferred_element_type=f32) + blab_ref[...]
    out_ref[...] = logits.astype(out_ref.dtype)


# ------------------------------------------------------------------- host-side packing
def _round_up(n, m):
    return (n + m - 1) // m * m


def _pad_gate_cols(w, h, gp):
    """(rows, 4*h) with i,f,g,o blocks of width h -> (rows, 4*gp), gate k at [k*gp, k*gp+h)."""
    rows = w.shape[0]
    out = jnp.zeros((rows, 4 * gp), w.dtype)
    for k in range(4):
        out = out.at[:, k * gp:k * gp + h].set(w[:, k * h:(k + 1) * h])
    return out


def _pad_rows(w, rows_to):
    return jnp.pad(w, ((0, rows_to - w.shape[0]), (0, 0)))


def _pad_cols(w, cols_to):
    return jnp.pad(w, ((0, 0), (0, cols_to - w.shape[1])))


def _prepare_params(p):
    """Gate-block padding + bf16 packing of all MXU weight operands (biases stay f32)."""
    H = N_HIDDEN
    bf16 = jnp.bfloat16
    # layer 0
    wih0 = _pad_gate_cols(p["w_ih_l0"].T, H, GP).astype(bf16)                  # (F, 4GP)
    whh0 = _pad_rows(_pad_gate_cols(p["w_hh_l0"].T, H, GP), GP).astype(bf16)   # (GP, 4GP)
    b0 = _pad_gate_cols((p["b_ih_l0"] + p["b_hh_l0"]).reshape(1, -1), H, GP)   # (1, 4GP)
    # layer 1 (input-part and recurrent-part kept separate so the recurrent push can
    # be issued early in the step)
    wih1 = _pad_rows(_pad_gate_cols(p["w_ih_l1"].T, H, GP), GP).astype(bf16)   # (GP, 4GP)
    whh1 = _pad_rows(_pad_gate_cols(p["w_hh_l1"].T, H, GP), GP).astype(bf16)   # (GP, 4GP)
    b1 = _pad_gate_cols((p["b_ih_l1"] + p["b_hh_l1"]).reshape(1, -1), H, GP)   # (1, 4GP)
    # attention
    ws1 = _pad_cols(_pad_rows(p["w_s1"].T, GP), GP).astype(bf16)               # (GP, GP)
    bs1 = _pad_cols(p["b_s1"].reshape(1, -1), GP)                              # (1, GP)
    ws2 = _pad_rows(jnp.tile(p["w_s2"].T, (1, GP)), GP).astype(bf16)           # (GP, GP)
    bs2 = jnp.full((1, GP), p["b_s2"][0], jnp.float32)                         # (1, GP)
    # heads
    wfc = _pad_rows(p["w_fc"].T, GP).astype(bf16)                              # (GP, 20)
    bfc = p["b_fc"].reshape(1, -1)
    wlab = p["w_label"].T.astype(bf16)                                         # (20, 7)
    blab = p["b_label"].reshape(1, -1)
    return (wih0, whh0, b0, wih1, whh1, b1, ws1, bs1, ws2, bs2, wfc, bfc, wlab, blab)


@functools.partial(jax.jit)
def lstm_forward(x, p):
    """x: (B, T, F) float32 (batch_first, like PyTorch) -> logits (B, 7) float32."""
    B, T, F = x.shape
    Bp = max(SUBLANE, _round_up(B, SUBLANE))          # pad batch to full sublanes
    xt = jnp.transpose(x, (1, 0, 2))                  # (T, B, F) time-major
    xt = jnp.pad(xt, ((0, 0), (0, Bp - B), (0, 0)))   # (T, Bp, F)

    args = (xt,) + _prepare_params(p)

    vmem = pl.BlockSpec(memory_space=pltpu.MemorySpace.VMEM)
    out = pl.pallas_call(
        _lstm_attn_kernel,
        out_shape=jax.ShapeDtypeStruct((Bp, N_CLASSES), jnp.float32),
        in_specs=[vmem] * len(args),
        out_specs=vmem,
        scratch_shapes=[
            pltpu.VMEM((T, Bp, 4 * GP), jnp.float32),   # precomputed x projection
            pltpu.VMEM((T, Bp, GP), jnp.float32),       # lstm layer-1 outputs
        ],
    )(*args)
    return out[:B]


# -------------------------------------------------------------------- params & reference
def init_params(key, n_features):
    """Deterministic parameter init; shapes match the PyTorch module."""
    H, A, FC, C = N_HIDDEN, N_ATTN, N_FC, N_CLASSES
    ks = jax.random.split(key, 16)

    def u(k, shape, scale):
        return jax.random.uniform(k, shape, jnp.float32, -scale, scale)

    sH = 1.0 / (H ** 0.5)
    sA = 1.0 / (A ** 0.5)
    sFC = 1.0 / (FC ** 0.5)
    return dict(
        w_ih_l0=u(ks[0], (4 * H, n_features), sH),
        w_hh_l0=u(ks[1], (4 * H, H), sH),
        b_ih_l0=u(ks[2], (4 * H,), sH),
        b_hh_l0=u(ks[3], (4 * H,), sH),
        w_ih_l1=u(ks[4], (4 * H, H), sH),
        w_hh_l1=u(ks[5], (4 * H, H), sH),
        b_ih_l1=u(ks[6], (4 * H,), sH),
        b_hh_l1=u(ks[7], (4 * H,), sH),
        w_s1=u(ks[8], (A, H), sH),
        b_s1=u(ks[9], (A,), sH),
        w_s2=u(ks[10], (1, A), sA),
        b_s2=u(ks[11], (1,), sA),
        w_fc=u(ks[12], (FC, H), sH),
        b_fc=u(ks[13], (FC,), sH),
        w_label=u(ks[14], (C, FC), sFC),
        b_label=u(ks[15], (C,), sFC),
    )


def reference(x, p):
    """Pure-JAX f32 reference mirroring the PyTorch forward (eval mode)."""
    B, T, F = x.shape
    H = N_HIDDEN

    def cell(x_t, h, c, wih, whh, bih, bhh):
        g = x_t @ wih.T + bih + h @ whh.T + bhh
        i = jax.nn.sigmoid(g[:, :H])
        f = jax.nn.sigmoid(g[:, H:2 * H])
        gg = jnp.tanh(g[:, 2 * H:3 * H])
        o = jax.nn.sigmoid(g[:, 3 * H:])
        c = f * c + i * gg
        return o * jnp.tanh(c), c

    h0 = jnp.zeros((B, H)); c0 = jnp.zeros((B, H))
    h1 = jnp.zeros((B, H)); c1 = jnp.zeros((B, H))
    outs = []
    for t in range(T):
        h0, c0 = cell(x[:, t, :], h0, c0, p["w_ih_l0"], p["w_hh_l0"], p["b_ih_l0"], p["b_hh_l0"])
        h1, c1 = cell(h0, h1, c1, p["w_ih_l1"], p["w_hh_l1"], p["b_ih_l1"], p["b_hh_l1"])
        outs.append(h1)
    lo = jnp.stack(outs, axis=1)                               # (B, T, H)

    s1 = jnp.tanh(lo @ p["w_s1"].T + p["b_s1"])                # (B, T, 40)
    s2 = s1 @ p["w_s2"].T + p["b_s2"]                          # (B, T, 1)
    attn = jax.nn.softmax(jnp.transpose(s2, (0, 2, 1)), axis=2)  # (B, 1, T)
    hm = jnp.einsum("bot,bth->boh", attn, lo).reshape(B, H)    # (B, 40)
    fc = hm @ p["w_fc"].T + p["b_fc"]
    return fc @ p["w_label"].T + p["b_label"]                  # (B, 7)


if __name__ == "__main__":
    key = jax.random.PRNGKey(0)
    B, T, F = 4, 8, 8                                          # batch, seq_len, n_features
    k_x, k_p = jax.random.split(key)
    x = jax.random.normal(k_x, (B, T, F), jnp.float32)
    params = init_params(k_p, F)

    out = lstm_forward(x, params)
    out = jax.block_until_ready(out)
    assert out.shape == (B, N_CLASSES)

    ref = reference(x, params)
    max_err = float(jnp.max(jnp.abs(out - ref)))
    # Tolerance accounts for bf16 MXU operand rounding (accumulation stays f32).
    assert max_err < 2e-2, f"kernel/reference mismatch: max abs err = {max_err}"
    print("KERNEL_OK")
</pallas_src>

<mosaic_0001>
module attributes {stable_mosaic.version = 11 : i64} {
  func.func @_lstm_attn_kernel(%arg0: memref<8x8x8xf32, #tpu.memory_space<vmem>>, %arg1: memref<8x512xbf16, #tpu.memory_space<vmem>>, %arg2: memref<128x512xbf16, #tpu.memory_space<vmem>>, %arg3: memref<1x512xf32, #tpu.memory_space<vmem>>, %arg4: memref<128x512xbf16, #tpu.memory_space<vmem>>, %arg5: memref<128x512xbf16, #tpu.memory_space<vmem>>, %arg6: memref<1x512xf32, #tpu.memory_space<vmem>>, %arg7: memref<128x128xbf16, #tpu.memory_space<vmem>>, %arg8: memref<1x128xf32, #tpu.memory_space<vmem>>, %arg9: memref<128x128xbf16, #tpu.memory_space<vmem>>, %arg10: memref<1x128xf32, #tpu.memory_space<vmem>>, %arg11: memref<128x20xbf16, #tpu.memory_space<vmem>>, %arg12: memref<1x20xf32, #tpu.memory_space<vmem>>, %arg13: memref<20x7xbf16, #tpu.memory_space<vmem>>, %arg14: memref<1x7xf32, #tpu.memory_space<vmem>>, %arg15: memref<8x7xf32, #tpu.memory_space<vmem>>, %arg16: memref<8x8x512xf32, #tpu.memory_space<vmem>>, %arg17: memref<8x8x128xf32, #tpu.memory_space<vmem>>) attributes {dimension_semantics = [], scalar_prefetch = 0 : i64, scratch_operands = 2 : i64, tpu.core_type = #tpu.core_type<tc>} {
    %c0 = arith.constant 0 : index
    %c0_0 = arith.constant 0 : index
    %c0_1 = arith.constant 0 : index
    %0 = vector.load %arg0[%c0, %c0_0, %c0_1] : memref<8x8x8xf32, #tpu.memory_space<vmem>>, vector<8x8x8xf32>
    %1 = vector.shape_cast %0 : vector<8x8x8xf32> to vector<64x8xf32>
    %2 = arith.truncf %1 : vector<64x8xf32> to vector<64x8xbf16>
    %c0_2 = arith.constant 0 : index
    %c0_3 = arith.constant 0 : index
    %3 = vector.load %arg1[%c0_2, %c0_3] : memref<8x512xbf16, #tpu.memory_space<vmem>>, vector<8x512xbf16>
    %cst = arith.constant dense<0.000000e+00> : vector<64x512xf32>
    %4 = tpu.matmul %2, %3, %cst {dimension_numbers = #tpu.dot_dimension_numbers<[1], [0], [0], [1], [0, 0, 1, 1], [], []>} : vector<64x8xbf16>, vector<8x512xbf16>, vector<64x512xf32> -> vector<64x512xf32>
    %c0_4 = arith.constant 0 : index
    %c0_5 = arith.constant 0 : index
    %5 = vector.load %arg3[%c0_4, %c0_5] : memref<1x512xf32, #tpu.memory_space<vmem>>, vector<1x512xf32>
    %6 = vector.broadcast %5 : vector<1x512xf32> to vector<64x512xf32>
    %7 = arith.addf %4, %6 : vector<64x512xf32>
    %8 = vector.shape_cast %7 : vector<64x512xf32> to vector<8x8x512xf32>
    %c0_6 = arith.constant 0 : index
    %c0_7 = arith.constant 0 : index
    %c0_8 = arith.constant 0 : index
    %9 = vector.load %arg16[%c0_6, %c0_7, %c0_8] : memref<8x8x512xf32, #tpu.memory_space<vmem>>, vector<8x8x512xf32>
    tpu.vector_store %arg16[%c0_6, %c0_7, %c0_8], %8 {strides = array<i32>} : memref<8x8x512xf32, #tpu.memory_space<vmem>>, vector<8x8x512xf32>,
    %c0_9 = arith.constant 0 : index
    %c0_10 = arith.constant 0 : index
    %10 = vector.load %arg6[%c0_9, %c0_10] : memref<1x512xf32, #tpu.memory_space<vmem>>, vector<1x512xf32>
    %11 = vector.shape_cast %10 : vector<1x512xf32> to vector<1x512xf32>
    %12 = vector.broadcast %11 : vector<1x512xf32> to vector<8x512xf32>
    %cst_11 = arith.constant 0.000000e+00 : f32
    %13 = vector.broadcast %cst_11 : f32 to vector<8x128xf32>
    %c0_i32 = arith.constant 0 : i32
    %14 = arith.truncf %13 : vector<8x128xf32> to vector<8x128xbf16>
    %c0_12 = arith.constant 0 : index
    %c0_13 = arith.constant 0 : index
    %15 = vector.load %arg5[%c0_12, %c0_13] : memref<128x512xbf16, #tpu.memory_space<vmem>>, vector<128x512xbf16>
    %cst_14 = arith.constant dense<0.000000e+00> : vector<8x512xf32>
    %16 = tpu.matmul %14, %15, %cst_14 {dimension_numbers = #tpu.dot_dimension_numbers<[1], [0], [0], [1], [0, 0, 1, 1], [], []>} : vector<8x128xbf16>, vector<128x512xbf16>, vector<8x512xf32> -> vector<8x512xf32>
    %17 = arith.index_cast %c0_i32 : i32 to index
    %c0_15 = arith.constant 0 : index
    %c0_16 = arith.constant 0 : index
    %18 = vector.load %arg16[%17, %c0_15, %c0_16] : memref<8x8x512xf32, #tpu.memory_space<vmem>>, vector<1x8x512xf32>
    %19 = vector.shape_cast %18 : vector<1x8x512xf32> to vector<8x512xf32>
    %20 = arith.truncf %13 : vector<8x128xf32> to vector<8x128xbf16>
    %c0_17 = arith.constant 0 : index
    %c0_18 = arith.constant 0 : index
    %21 = vector.load %arg2[%c0_17, %c0_18] : memref<128x512xbf16, #tpu.memory_space<vmem>>, vector<128x512xbf16>
    %cst_19 = arith.constant dense<0.000000e+00> : vector<8x512xf32>
    %22 = tpu.matmul %20, %21, %cst_19 {dimension_numbers = #tpu.dot_dimension_numbers<[1], [0], [0], [1], [0, 0, 1, 1], [], []>} : vector<8x128xbf16>, vector<128x512xbf16>, vector<8x512xf32> -> vector<8x512xf32>
    %23 = arith.addf %19, %22 : vector<8x512xf32>
    %24 = vector.extract_strided_slice %23 {offsets = [0, 0], sizes = [8, 128], strides = [1, 1]} : vector<8x512xf32> to vector<8x128xf32>
    %cst_20 = arith.constant 5.000000e-01 : f32
    %25 = vector.broadcast %cst_20 : f32 to vector<8x128xf32>
    %26 = arith.mulf %25, %24 : vector<8x128xf32>
    %27 = math.tanh %26 : vector<8x128xf32>
    %cst_21 = arith.constant 5.000000e-01 : f32
    %28 = vector.broadcast %cst_21 : f32 to vector<8x128xf32>
    %29 = arith.mulf %28, %27 : vector<8x128xf32>
    %cst_22 = arith.constant 5.000000e-01 : f32
    %30 = vector.broadcast %cst_22 : f32 to vector<8x128xf32>
    %31 = arith.addf %29, %30 : vector<8x128xf32>
    %32 = vector.extract_strided_slice %23 {offsets = [0, 128], sizes = [8, 128], strides = [1, 1]} : vector<8x512xf32> to vector<8x128xf32>
    %cst_23 = arith.constant 5.000000e-01 : f32
    %33 = vector.broadcast %cst_23 : f32 to vector<8x128xf32>
    %34 = arith.mulf %33, %32 : vector<8x128xf32>
    %35 = math.tanh %34 : vector<8x128xf32>
    %cst_24 = arith.constant 5.000000e-01 : f32
    %36 = vector.broadcast %cst_24 : f32 to vector<8x128xf32>
    %37 = arith.mulf %36, %35 : vector<8x128xf32>
    %cst_25 = arith.constant 5.000000e-01 : f32
    %38 = vector.broadcast %cst_25 : f32 to vector<8x128xf32>
    %39 = arith.addf %37, %38 : vector<8x128xf32>
    %40 = vector.extract_strided_slice %23 {offsets = [0, 256], sizes = [8, 128], strides = [1, 1]} : vector<8x512xf32> to vector<8x128xf32>
    %41 = math.tanh %40 : vector<8x128xf32>
    %42 = vector.extract_strided_slice %23 {offsets = [0, 384], sizes = [8, 128], strides = [1, 1]} : vector<8x512xf32> to vector<8x128xf32>
    %cst_26 = arith.constant 5.000000e-01 : f32
    %43 = vector.broadcast %cst_26 : f32 to vector<8x128xf32>
    %44 = arith.mulf %43, %42 : vector<8x128xf32>
    %45 = math.tanh %44 : vector<8x128xf32>
    %cst_27 = arith.constant 5.000000e-01 : f32
    %46 = vector.broadcast %cst_27 : f32 to vector<8x128xf32>
    %47 = arith.mulf %46, %45 : vector<8x128xf32>
    %cst_28 = arith.constant 5.000000e-01 : f32
    %48 = vector.broadcast %cst_28 : f32 to vector<8x128xf32>
    %49 = arith.addf %47, %48 : vector<8x128xf32>
    %50 = arith.mulf %39, %13 : vector<8x128xf32>
    %51 = arith.mulf %31, %41 : vector<8x128xf32>
    %52 = arith.addf %50, %51 : vector<8x128xf32>
    %53 = math.tanh %52 : vector<8x128xf32>
    %54 = arith.mulf %49, %53 : vector<8x128xf32>
    %55 = arith.truncf %54 : vector<8x128xf32> to vector<8x128xbf16>
    %c0_29 = arith.constant 0 : index
    %c0_30 = arith.constant 0 : index
    %56 = vector.load %arg4[%c0_29, %c0_30] : memref<128x512xbf16, #tpu.memory_space<vmem>>, vector<128x512xbf16>
    %cst_31 = arith.constant dense<0.000000e+00> : vector<8x512xf32>
    %57 = tpu.matmul %55, %56, %cst_31 {dimension_numbers = #tpu.dot_dimension_numbers<[1], [0], [0], [1], [0, 0, 1, 1], [], []>} : vector<8x128xbf16>, vector<128x512xbf16>, vector<8x512xf32> -> vector<8x512xf32>
    %58 = arith.addf %16, %57 : vector<8x512xf32>
    %59 = arith.addf %58, %12 : vector<8x512xf32>
    %60 = vector.extract_strided_slice %59 {offsets = [0, 0], sizes = [8, 128], strides = [1, 1]} : vector<8x512xf32> to vector<8x128xf32>
    %cst_32 = arith.constant 5.000000e-01 : f32
    %61 = vector.broadcast %cst_32 : f32 to vector<8x128xf32>
    %62 = arith.mulf %61, %60 : vector<8x128xf32>
    %63 = math.tanh %62 : vector<8x128xf32>
    %cst_33 = arith.constant 5.000000e-01 : f32
    %64 = vector.broadcast %cst_33 : f32 to vector<8x128xf32>
    %65 = arith.mulf %64, %63 : vector<8x128xf32>
    %cst_34 = arith.constant 5.000000e-01 : f32
    %66 = vector.broadcast %cst_34 : f32 to vector<8x128xf32>
    %67 = arith.addf %65, %66 : vector<8x128xf32>
    %68 = vector.extract_strided_slice %59 {offsets = [0, 128], sizes = [8, 128], strides = [1, 1]} : vector<8x512xf32> to vector<8x128xf32>
    %cst_35 = arith.constant 5.000000e-01 : f32
    %69 = vector.broadcast %cst_35 : f32 to vector<8x128xf32>
    %70 = arith.mulf %69, %68 : vector<8x128xf32>
    %71 = math.tanh %70 : vector<8x128xf32>
    %cst_36 = arith.constant 5.000000e-01 : f32
    %72 = vector.broadcast %cst_36 : f32 to vector<8x128xf32>
    %73 = arith.mulf %72, %71 : vector<8x128xf32>
    %cst_37 = arith.constant 5.000000e-01 : f32
    %74 = vector.broadcast %cst_37 : f32 to vector<8x128xf32>
    %75 = arith.addf %73, %74 : vector<8x128xf32>
    %76 = vector.extract_strided_slice %59 {offsets = [0, 256], sizes = [8, 128], strides = [1, 1]} : vector<8x512xf32> to vector<8x128xf32>
    %77 = math.tanh %76 : vector<8x128xf32>
    %78 = vector.extract_strided_slice %59 {offsets = [0, 384], sizes = [8, 128], strides = [1, 1]} : vector<8x512xf32> to vector<8x128xf32>
    %cst_38 = arith.constant 5.000000e-01 : f32
    %79 = vector.broadcast %cst_38 : f32 to vector<8x128xf32>
    %80 = arith.mulf %79, %78 : vector<8x128xf32>
    %81 = math.tanh %80 : vector<8x128xf32>
    %cst_39 = arith.constant 5.000000e-01 : f32
    %82 = vector.broadcast %cst_39 : f32 to vector<8x128xf32>
    %83 = arith.mulf %82, %81 : vector<8x128xf32>
    %cst_40 = arith.constant 5.000000e-01 : f32
    %84 = vector.broadcast %cst_40 : f32 to vector<8x128xf32>
    %85 = arith.addf %83, %84 : vector<8x128xf32>
    %86 = arith.mulf %75, %13 : vector<8x128xf32>
    %87 = arith.mulf %67, %77 : vector<8x128xf32>
    %88 = arith.addf %86, %87 : vector<8x128xf32>
    %89 = math.tanh %88 : vector<8x128xf32>
    %90 = arith.mulf %85, %89 : vector<8x128xf32>
    %91 = arith.index_cast %c0_i32 : i32 to index
    %c0_41 = arith.constant 0 : index
    %c0_42 = arith.constant 0 : index
    %92 = vector.load %arg17[%91, %c0_41, %c0_42] : memref<8x8x128xf32, #tpu.memory_space<vmem>>, vector<1x8x128xf32>
    %93 = vector.shape_cast %92 : vector<1x8x128xf32> to vector<8x128xf32>
    %94 = vector.shape_cast %90 : vector<8x128xf32> to vector<1x8x128xf32>
    tpu.vector_store %arg17[%91, %c0_41, %c0_42], %94 {strides = array<i32>} : memref<8x8x128xf32, #tpu.memory_space<vmem>>, vector<1x8x128xf32>,
    %c1_i32 = arith.constant 1 : i32
    %95 = arith.truncf %90 : vector<8x128xf32> to vector<8x128xbf16>
    %c0_43 = arith.constant 0 : index
    %c0_44 = arith.constant 0 : index
    %96 = vector.load %arg5[%c0_43, %c0_44] : memref<128x512xbf16, #tpu.memory_space<vmem>>, vector<128x512xbf16>
    %cst_45 = arith.constant dense<0.000000e+00> : vector<8x512xf32>
    %97 = tpu.matmul %95, %96, %cst_45 {dimension_numbers = #tpu.dot_dimension_numbers<[1], [0], [0], [1], [0, 0, 1, 1], [], []>} : vector<8x128xbf16>, vector<128x512xbf16>, vector<8x512xf32> -> vector<8x512xf32>
    %98 = arith.index_cast %c1_i32 : i32 to index
    %c0_46 = arith.constant 0 : index
    %c0_47 = arith.constant 0 : index
    %99 = vector.load %arg16[%98, %c0_46, %c0_47] : memref<8x8x512xf32, #tpu.memory_space<vmem>>, vector<1x8x512xf32>
    %100 = vector.shape_cast %99 : vector<1x8x512xf32> to vector<8x512xf32>
    %101 = arith.truncf %54 : vector<8x128xf32> to vector<8x128xbf16>
    %c0_48 = arith.constant 0 : index
    %c0_49 = arith.constant 0 : index
    %102 = vector.load %arg2[%c0_48, %c0_49] : memref<128x512xbf16, #tpu.memory_space<vmem>>, vector<128x512xbf16>
    %cst_50 = arith.constant dense<0.000000e+00> : vector<8x512xf32>
    %103 = tpu.matmul %101, %102, %cst_50 {dimension_numbers = #tpu.dot_dimension_numbers<[1], [0], [0], [1], [0, 0, 1, 1], [], []>} : vector<8x128xbf16>, vector<128x512xbf16>, vector<8x512xf32> -> vector<8x512xf32>
    %104 = arith.addf %100, %103 : vector<8x512xf32>
    %105 = vector.extract_strided_slice %104 {offsets = [0, 0], sizes = [8, 128], strides = [1, 1]} : vector<8x512xf32> to vector<8x128xf32>
    %cst_51 = arith.constant 5.000000e-01 : f32
    %106 = vector.broadcast %cst_51 : f32 to vector<8x128xf32>
    %107 = arith.mulf %106, %105 : vector<8x128xf32>
    %108 = math.tanh %107 : vector<8x128xf32>
    %cst_52 = arith.constant 5.000000e-01 : f32
    %109 = vector.broadcast %cst_52 : f32 to vector<8x128xf32>
    %110 = arith.mulf %109, %108 : vector<8x128xf32>
    %cst_53 = arith.constant 5.000000e-01 : f32
    %111 = vector.broadcast %cst_53 : f32 to vector<8x128xf32>
    %112 = arith.addf %110, %111 : vector<8x128xf32>
    %113 = vector.extract_strided_slice %104 {offsets = [0, 128], sizes = [8, 128], strides = [1, 1]} : vector<8x512xf32> to vector<8x128xf32>
    %cst_54 = arith.constant 5.000000e-01 : f32
    %114 = vector.broadcast %cst_54 : f32 to vector<8x128xf32>
    %115 = arith.mulf %114, %113 : vector<8x128xf32>
    %116 = math.tanh %115 : vector<8x128xf32>
    %cst_55 = arith.constant 5.000000e-01 : f32
    %117 = vector.broadcast %cst_55 : f32 to vector<8x128xf32>
    %118 = arith.mulf %117, %116 : vector<8x128xf32>
    %cst_56 = arith.constant 5.000000e-01 : f32
    %119 = vector.broadcast %cst_56 : f32 to vector<8x128xf32>
    %120 = arith.addf %118, %119 : vector<8x128xf32>
    %121 = vector.extract_strided_slice %104 {offsets = [0, 256], sizes = [8, 128], strides = [1, 1]} : vector<8x512xf32> to vector<8x128xf32>
    %122 = math.tanh %121 : vector<8x128xf32>
    %123 = vector.extract_strided_slice %104 {offsets = [0, 384], sizes = [8, 128], strides = [1, 1]} : vector<8x512xf32> to vector<8x128xf32>
    %cst_57 = arith.constant 5.000000e-01 : f32
    %124 = vector.broadcast %cst_57 : f32 to vector<8x128xf32>
    %125 = arith.mulf %124, %123 : vector<8x128xf32>
    %126 = math.tanh %125 : vector<8x128xf32>
    %cst_58 = arith.constant 5.000000e-01 : f32
    %127 = vector.broadcast %cst_58 : f32 to vector<8x128xf32>
    %128 = arith.mulf %127, %126 : vector<8x128xf32>
    %cst_59 = arith.constant 5.000000e-01 : f32
    %129 = vector.broadcast %cst_59 : f32 to vector<8x128xf32>
    %130 = arith.addf %128, %129 : vector<8x128xf32>
    %131 = arith.mulf %120, %52 : vector<8x128xf32>
    %132 = arith.mulf %112, %122 : vector<8x128xf32>
    %133 = arith.addf %131, %132 : vector<8x128xf32>
    %134 = math.tanh %133 : vector<8x128xf32>
    %135 = arith.mulf %130, %134 : vector<8x128xf32>
    %136 = arith.truncf %135 : vector<8x128xf32> to vector<8x128xbf16>
    %c0_60 = arith.constant 0 : index
    %c0_61 = arith.constant 0 : index
    %137 = vector.load %arg4[%c0_60, %c0_61] : memref<128x512xbf16, #tpu.memory_space<vmem>>, vector<128x512xbf16>
    %cst_62 = arith.constant dense<0.000000e+00> : vector<8x512xf32>
    %138 = tpu.matmul %136, %137, %cst_62 {dimension_numbers = #tpu.dot_dimension_numbers<[1], [0], [0], [1], [0, 0, 1, 1], [], []>} : vector<8x128xbf16>, vector<128x512xbf16>, vector<8x512xf32> -> vector<8x512xf32>
    %139 = arith.addf %97, %138 : vector<8x512xf32>
    %140 = arith.addf %139, %12 : vector<8x512xf32>
    %141 = vector.extract_strided_slice %140 {offsets = [0, 0], sizes = [8, 128], strides = [1, 1]} : vector<8x512xf32> to vector<8x128xf32>
    %cst_63 = arith.constant 5.000000e-01 : f32
    %142 = vector.broadcast %cst_63 : f32 to vector<8x128xf32>
    %143 = arith.mulf %142, %141 : vector<8x128xf32>
    %144 = math.tanh %143 : vector<8x128xf32>
    %cst_64 = arith.constant 5.000000e-01 : f32
    %145 = vector.broadcast %cst_64 : f32 to vector<8x128xf32>
    %146 = arith.mulf %145, %144 : vector<8x128xf32>
    %cst_65 = arith.constant 5.000000e-01 : f32
    %147 = vector.broadcast %cst_65 : f32 to vector<8x128xf32>
    %148 = arith.addf %146, %147 : vector<8x128xf32>
    %149 = vector.extract_strided_slice %140 {offsets = [0, 128], sizes = [8, 128], strides = [1, 1]} : vector<8x512xf32> to vector<8x128xf32>
    %cst_66 = arith.constant 5.000000e-01 : f32
    %150 = vector.broadcast %cst_66 : f32 to vector<8x128xf32>
    %151 = arith.mulf %150, %149 : vector<8x128xf32>
    %152 = math.tanh %151 : vector<8x128xf32>
    %cst_67 = arith.constant 5.000000e-01 : f32
    %153 = vector.broadcast %cst_67 : f32 to vector<8x128xf32>
    %154 = arith.mulf %153, %152 : vector<8x128xf32>
    %cst_68 = arith.constant 5.000000e-01 : f32
    %155 = vector.broadcast %cst_68 : f32 to vector<8x128xf32>
    %156 = arith.addf %154, %155 : vector<8x128xf32>
    %157 = vector.extract_strided_slice %140 {offsets = [0, 256], sizes = [8, 128], strides = [1, 1]} : vector<8x512xf32> to vector<8x128xf32>
    %158 = math.tanh %157 : vector<8x128xf32>
    %159 = vector.extract_strided_slice %140 {offsets = [0, 384], sizes = [8, 128], strides = [1, 1]} : vector<8x512xf32> to vector<8x128xf32>
    %cst_69 = arith.constant 5.000000e-01 : f32
    %160 = vector.broadcast %cst_69 : f32 to vector<8x128xf32>
    %161 = arith.mulf %160, %159 : vector<8x128xf32>
    %162 = math.tanh %161 : vector<8x128xf32>
    %cst_70 = arith.constant 5.000000e-01 : f32
    %163 = vector.broadcast %cst_70 : f32 to vector<8x128xf32>
    %164 = arith.mulf %163, %162 : vector<8x128xf32>
    %cst_71 = arith.constant 5.000000e-01 : f32
    %165 = vector.broadcast %cst_71 : f32 to vector<8x128xf32>
    %166 = arith.addf %164, %165 : vector<8x128xf32>
    %167 = arith.mulf %156, %88 : vector<8x128xf32>
    %168 = arith.mulf %148, %158 : vector<8x128xf32>
    %169 = arith.addf %167, %168 : vector<8x128xf32>
    %170 = math.tanh %169 : vector<8x128xf32>
    %171 = arith.mulf %166, %170 : vector<8x128xf32>
    %172 = arith.index_cast %c1_i32 : i32 to index
    %c0_72 = arith.constant 0 : index
    %c0_73 = arith.constant 0 : index
    %173 = vector.load %arg17[%172, %c0_72, %c0_73] : memref<8x8x128xf32, #tpu.memory_space<vmem>>, vector<1x8x128xf32>
    %174 = vector.shape_cast %173 : vector<1x8x128xf32> to vector<8x128xf32>
    %175 = vector.shape_cast %171 : vector<8x128xf32> to vector<1x8x128xf32>
    tpu.vector_store %arg17[%172, %c0_72, %c0_73], %175 {strides = array<i32>} : memref<8x8x128xf32, #tpu.memory_space<vmem>>, vector<1x8x128xf32>,
    %c2_i32 = arith.constant 2 : i32
    %176 = arith.truncf %171 : vector<8x128xf32> to vector<8x128xbf16>
    %c0_74 = arith.constant 0 : index
    %c0_75 = arith.constant 0 : index
    %177 = vector.load %arg5[%c0_74, %c0_75] : memref<128x512xbf16, #tpu.memory_space<vmem>>, vector<128x512xbf16>
    %cst_76 = arith.constant dense<0.000000e+00> : vector<8x512xf32>
    %178 = tpu.matmul %176, %177, %cst_76 {dimension_numbers = #tpu.dot_dimension_numbers<[1], [0], [0], [1], [0, 0, 1, 1], [], []>} : vector<8x128xbf16>, vector<128x512xbf16>, vector<8x512xf32> -> vector<8x512xf32>
    %179 = arith.index_cast %c2_i32 : i32 to index
    %c0_77 = arith.constant 0 : index
    %c0_78 = arith.constant 0 : index
    %180 = vector.load %arg16[%179, %c0_77, %c0_78] : memref<8x8x512xf32, #tpu.memory_space<vmem>>, vector<1x8x512xf32>
    %181 = vector.shape_cast %180 : vector<1x8x512xf32> to vector<8x512xf32>
    %182 = arith.truncf %135 : vector<8x128xf32> to vector<8x128xbf16>
    %c0_79 = arith.constant 0 : index
    %c0_80 = arith.constant 0 : index
    %183 = vector.load %arg2[%c0_79, %c0_80] : memref<128x512xbf16, #tpu.memory_space<vmem>>, vector<128x512xbf16>
    %cst_81 = arith.constant dense<0.000000e+00> : vector<8x512xf32>
    %184 = tpu.matmul %182, %183, %cst_81 {dimension_numbers = #tpu.dot_dimension_numbers<[1], [0], [0], [1], [0, 0, 1, 1], [], []>} : vector<8x128xbf16>, vector<128x512xbf16>, vector<8x512xf32> -> vector<8x512xf32>
    %185 = arith.addf %181, %184 : vector<8x512xf32>
    %186 = vector.extract_strided_slice %185 {offsets = [0, 0], sizes = [8, 128], strides = [1, 1]} : vector<8x512xf32> to vector<8x128xf32>
    %cst_82 = arith.constant 5.000000e-01 : f32
    %187 = vector.broadcast %cst_82 : f32 to vector<8x128xf32>
    %188 = arith.mulf %187, %186 : vector<8x128xf32>
    %189 = math.tanh %188 : vector<8x128xf32>
    %cst_83 = arith.constant 5.000000e-01 : f32
    %190 = vector.broadcast %cst_83 : f32 to vector<8x128xf32>
    %191 = arith.mulf %190, %189 : vector<8x128xf32>
    %cst_84 = arith.constant 5.000000e-01 : f32
    %192 = vector.broadcast %cst_84 : f32 to vector<8x128xf32>
    %193 = arith.addf %191, %192 : vector<8x128xf32>
    %194 = vector.extract_strided_slice %185 {offsets = [0, 128], sizes = [8, 128], strides = [1, 1]} : vector<8x512xf32> to vector<8x128xf32>
    %cst_85 = arith.constant 5.000000e-01 : f32
    %195 = vector.broadcast %cst_85 : f32 to vector<8x128xf32>
    %196 = arith.mulf %195, %194 : vector<8x128xf32>
    %197 = math.tanh %196 : vector<8x128xf32>
    %cst_86 = arith.constant 5.000000e-01 : f32
    %198 = vector.broadcast %cst_86 : f32 to vector<8x128xf32>
    %199 = arith.mulf %198, %197 : vector<8x128xf32>
    %cst_87 = arith.constant 5.000000e-01 : f32
    %200 = vector.broadcast %cst_87 : f32 to vector<8x128xf32>
    %201 = arith.addf %199, %200 : vector<8x128xf32>
    %202 = vector.extract_strided_slice %185 {offsets = [0, 256], sizes = [8, 128], strides = [1, 1]} : vector<8x512xf32> to vector<8x128xf32>
    %203 = math.tanh %202 : vector<8x128xf32>
    %204 = vector.extract_strided_slice %185 {offsets = [0, 384], sizes = [8, 128], strides = [1, 1]} : vector<8x512xf32> to vector<8x128xf32>
    %cst_88 = arith.constant 5.000000e-01 : f32
    %205 = vector.broadcast %cst_88 : f32 to vector<8x128xf32>
    %206 = arith.mulf %205, %204 : vector<8x128xf32>
    %207 = math.tanh %206 : vector<8x128xf32>
    %cst_89 = arith.constant 5.000000e-01 : f32
    %208 = vector.broadcast %cst_89 : f32 to vector<8x128xf32>
    %209 = arith.mulf %208, %207 : vector<8x128xf32>
    %cst_90 = arith.constant 5.000000e-01 : f32
    %210 = vector.broadcast %cst_90 : f32 to vector<8x128xf32>
    %211 = arith.addf %209, %210 : vector<8x128xf32>
    %212 = arith.mulf %201, %133 : vector<8x128xf32>
    %213 = arith.mulf %193, %203 : vector<8x128xf32>
    %214 = arith.addf %212, %213 : vector<8x128xf32>
    %215 = math.tanh %214 : vector<8x128xf32>
    %216 = arith.mulf %211, %215 : vector<8x128xf32>
    %217 = arith.truncf %216 : vector<8x128xf32> to vector<8x128xbf16>
    %c0_91 = arith.constant 0 : index
    %c0_92 = arith.constant 0 : index
    %218 = vector.load %arg4[%c0_91, %c0_92] : memref<128x512xbf16, #tpu.memory_space<vmem>>, vector<128x512xbf16>
    %cst_93 = arith.constant dense<0.000000e+00> : vector<8x512xf32>
    %219 = tpu.matmul %217, %218, %cst_93 {dimension_numbers = #tpu.dot_dimension_numbers<[1], [0], [0], [1], [0, 0, 1, 1], [], []>} : vector<8x128xbf16>, vector<128x512xbf16>, vector<8x512xf32> -> vector<8x512xf32>
    %220 = arith.addf %178, %219 : vector<8x512xf32>
    %221 = arith.addf %220, %12 : vector<8x512xf32>
    %222 = vector.extract_strided_slice %221 {offsets = [0, 0], sizes = [8, 128], strides = [1, 1]} : vector<8x512xf32> to vector<8x128xf32>
    %cst_94 = arith.constant 5.000000e-01 : f32
    %223 = vector.broadcast %cst_94 : f32 to vector<8x128xf32>
    %224 = arith.mulf %223, %222 : vector<8x128xf32>
    %225 = math.tanh %224 : vector<8x128xf32>
    %cst_95 = arith.constant 5.000000e-01 : f32
    %226 = vector.broadcast %cst_95 : f32 to vector<8x128xf32>
    %227 = arith.mulf %226, %225 : vector<8x128xf32>
    %cst_96 = arith.constant 5.000000e-01 : f32
    %228 = vector.broadcast %cst_96 : f32 to vector<8x128xf32>
    %229 = arith.addf %227, %228 : vector<8x128xf32>
    %230 = vector.extract_strided_slice %221 {offsets = [0, 128], sizes = [8, 128], strides = [1, 1]} : vector<8x512xf32> to vector<8x128xf32>
    %cst_97 = arith.constant 5.000000e-01 : f32
    %231 = vector.broadcast %cst_97 : f32 to vector<8x128xf32>
    %232 = arith.mulf %231, %230 : vector<8x128xf32>
    %233 = math.tanh %232 : vector<8x128xf32>
    %cst_98 = arith.constant 5.000000e-01 : f32
    %234 = vector.broadcast %cst_98 : f32 to vector<8x128xf32>
    %235 = arith.mulf %234, %233 : vector<8x128xf32>
    %cst_99 = arith.constant 5.000000e-01 : f32
    %236 = vector.broadcast %cst_99 : f32 to vector<8x128xf32>
    %237 = arith.addf %235, %236 : vector<8x128xf32>
    %238 = vector.extract_strided_slice %221 {offsets = [0, 256], sizes = [8, 128], strides = [1, 1]} : vector<8x512xf32> to vector<8x128xf32>
    %239 = math.tanh %238 : vector<8x128xf32>
    %240 = vector.extract_strided_slice %221 {offsets = [0, 384], sizes = [8, 128], strides = [1, 1]} : vector<8x512xf32> to vector<8x128xf32>
    %cst_100 = arith.constant 5.000000e-01 : f32
    %241 = vector.broadcast %cst_100 : f32 to vector<8x128xf32>
    %242 = arith.mulf %241, %240 : vector<8x128xf32>
    %243 = math.tanh %242 : vector<8x128xf32>
    %cst_101 = arith.constant 5.000000e-01 : f32
    %244 = vector.broadcast %cst_101 : f32 to vector<8x128xf32>
    %245 = arith.mulf %244, %243 : vector<8x128xf32>
    %cst_102 = arith.constant 5.000000e-01 : f32
    %246 = vector.broadcast %cst_102 : f32 to vector<8x128xf32>
    %247 = arith.addf %245, %246 : vector<8x128xf32>
    %248 = arith.mulf %237, %169 : vector<8x128xf32>
    %249 = arith.mulf %229, %239 : vector<8x128xf32>
    %250 = arith.addf %248, %249 : vector<8x128xf32>
    %251 = math.tanh %250 : vector<8x128xf32>
    %252 = arith.mulf %247, %251 : vector<8x128xf32>
    %253 = arith.index_cast %c2_i32 : i32 to index
    %c0_103 = arith.constant 0 : index
    %c0_104 = arith.constant 0 : index
    %254 = vector.load %arg17[%253, %c0_103, %c0_104] : memref<8x8x128xf32, #tpu.memory_space<vmem>>, vector<1x8x128xf32>
    %255 = vector.shape_cast %254 : vector<1x8x128xf32> to vector<8x128xf32>
    %256 = vector.shape_cast %252 : vector<8x128xf32> to vector<1x8x128xf32>
    tpu.vector_store %arg17[%253, %c0_103, %c0_104], %256 {strides = array<i32>} : memref<8x8x128xf32, #tpu.memory_space<vmem>>, vector<1x8x128xf32>,
    %c3_i32 = arith.constant 3 : i32
    %257 = arith.truncf %252 : vector<8x128xf32> to vector<8x128xbf16>
    %c0_105 = arith.constant 0 : index
    %c0_106 = arith.constant 0 : index
    %258 = vector.load %arg5[%c0_105, %c0_106] : memref<128x512xbf16, #tpu.memory_space<vmem>>, vector<128x512xbf16>
    %cst_107 = arith.constant dense<0.000000e+00> : vector<8x512xf32>
    %259 = tpu.matmul %257, %258, %cst_107 {dimension_numbers = #tpu.dot_dimension_numbers<[1], [0], [0], [1], [0, 0, 1, 1], [], []>} : vector<8x128xbf16>, vector<128x512xbf16>, vector<8x512xf32> -> vector<8x512xf32>
    %260 = arith.index_cast %c3_i32 : i32 to index
    %c0_108 = arith.constant 0 : index
    %c0_109 = arith.constant 0 : index
    %261 = vector.load %arg16[%260, %c0_108, %c0_109] : memref<8x8x512xf32, #tpu.memory_space<vmem>>, vector<1x8x512xf32>
    %262 = vector.shape_cast %261 : vector<1x8x512xf32> to vector<8x512xf32>
    %263 = arith.truncf %216 : vector<8x128xf32> to vector<8x128xbf16>
    %c0_110 = arith.constant 0 : index
    %c0_111 = arith.constant 0 : index
    %264 = vector.load %arg2[%c0_110, %c0_111] : memref<128x512xbf16, #tpu.memory_space<vmem>>, vector<128x512xbf16>
    %cst_112 = arith.constant dense<0.000000e+00> : vector<8x512xf32>
    %265 = tpu.matmul %263, %264, %cst_112 {dimension_numbers = #tpu.dot_dimension_numbers<[1], [0], [0], [1], [0, 0, 1, 1], [], []>} : vector<8x128xbf16>, vector<128x512xbf16>, vector<8x512xf32> -> vector<8x512xf32>
    %266 = arith.addf %262, %265 : vector<8x512xf32>
    %267 = vector.extract_strided_slice %266 {offsets = [0, 0], sizes = [8, 128], strides = [1, 1]} : vector<8x512xf32> to vector<8x128xf32>
    %cst_113 = arith.constant 5.000000e-01 : f32
    %268 = vector.broadcast %cst_113 : f32 to vector<8x128xf32>
    %269 = arith.mulf %268, %267 : vector<8x128xf32>
    %270 = math.tanh %269 : vector<8x128xf32>
    %cst_114 = arith.constant 5.000000e-01 : f32
    %271 = vector.broadcast %cst_114 : f32 to vector<8x128xf32>
    %272 = arith.mulf %271, %270 : vector<8x128xf32>
    %cst_115 = arith.constant 5.000000e-01 : f32
    %273 = vector.broadcast %cst_115 : f32 to vector<8x128xf32>
    %274 = arith.addf %272, %273 : vector<8x128xf32>
    %275 = vector.extract_strided_slice %266 {offsets = [0, 128], sizes = [8, 128], strides = [1, 1]} : vector<8x512xf32> to vector<8x128xf32>
    %cst_116 = arith.constant 5.000000e-01 : f32
    %276 = vector.broadcast %cst_116 : f32 to vector<8x128xf32>
    %277 = arith.mulf %276, %275 : vector<8x128xf32>
    %278 = math.tanh %277 : vector<8x128xf32>
    %cst_117 = arith.constant 5.000000e-01 : f32
    %279 = vector.broadcast %cst_117 : f32 to vector<8x128xf32>
    %280 = arith.mulf %279, %278 : vector<8x128xf32>
    %cst_118 = arith.constant 5.000000e-01 : f32
    %281 = vector.broadcast %cst_118 : f32 to vector<8x128xf32>
    %282 = arith.addf %280, %281 : vector<8x128xf32>
    %283 = vector.extract_strided_slice %266 {offsets = [0, 256], sizes = [8, 128], strides = [1, 1]} : vector<8x512xf32> to vector<8x128xf32>
    %284 = math.tanh %283 : vector<8x128xf32>
    %285 = vector.extract_strided_slice %266 {offsets = [0, 384], sizes = [8, 128], strides = [1, 1]} : vector<8x512xf32> to vector<8x128xf32>
    %cst_119 = arith.constant 5.000000e-01 : f32
    %286 = vector.broadcast %cst_119 : f32 to vector<8x128xf32>
    %287 = arith.mulf %286, %285 : vector<8x128xf32>
    %288 = math.tanh %287 : vector<8x128xf32>
    %cst_120 = arith.constant 5.000000e-01 : f32
    %289 = vector.broadcast %cst_120 : f32 to vector<8x128xf32>
    %290 = arith.mulf %289, %288 : vector<8x128xf32>
    %cst_121 = arith.constant 5.000000e-01 : f32
    %291 = vector.broadcast %cst_121 : f32 to vector<8x128xf32>
    %292 = arith.addf %290, %291 : vector<8x128xf32>
    %293 = arith.mulf %282, %214 : vector<8x128xf32>
    %294 = arith.mulf %274, %284 : vector<8x128xf32>
    %295 = arith.addf %293, %294 : vector<8x128xf32>
    %296 = math.tanh %295 : vector<8x128xf32>
    %297 = arith.mulf %292, %296 : vector<8x128xf32>
    %298 = arith.truncf %297 : vector<8x128xf32> to vector<8x128xbf16>
    %c0_122 = arith.constant 0 : index
    %c0_123 = arith.constant 0 : index
    %299 = vector.load %arg4[%c0_122, %c0_123] : memref<128x512xbf16, #tpu.memory_space<vmem>>, vector<128x512xbf16>
    %cst_124 = arith.constant dense<0.000000e+00> : vector<8x512xf32>
    %300 = tpu.matmul %298, %299, %cst_124 {dimension_numbers = #tpu.dot_dimension_numbers<[1], [0], [0], [1], [0, 0, 1, 1], [], []>} : vector<8x128xbf16>, vector<128x512xbf16>, vector<8x512xf32> -> vector<8x512xf32>
    %301 = arith.addf %259, %300 : vector<8x512xf32>
    %302 = arith.addf %301, %12 : vector<8x512xf32>
    %303 = vector.extract_strided_slice %302 {offsets = [0, 0], sizes = [8, 128], strides = [1, 1]} : vector<8x512xf32> to vector<8x128xf32>
    %cst_125 = arith.constant 5.000000e-01 : f32
    %304 = vector.broadcast %cst_125 : f32 to vector<8x128xf32>
    %305 = arith.mulf %304, %303 : vector<8x128xf32>
    %306 = math.tanh %305 : vector<8x128xf32>
    %cst_126 = arith.constant 5.000000e-01 : f32
    %307 = vector.broadcast %cst_126 : f32 to vector<8x128xf32>
    %308 = arith.mulf %307, %306 : vector<8x128xf32>
    %cst_127 = arith.constant 5.000000e-01 : f32
    %309 = vector.broadcast %cst_127 : f32 to vector<8x128xf32>
    %310 = arith.addf %308, %309 : vector<8x128xf32>
    %311 = vector.extract_strided_slice %302 {offsets = [0, 128], sizes = [8, 128], strides = [1, 1]} : vector<8x512xf32> to vector<8x128xf32>
    %cst_128 = arith.constant 5.000000e-01 : f32
    %312 = vector.broadcast %cst_128 : f32 to vector<8x128xf32>
    %313 = arith.mulf %312, %311 : vector<8x128xf32>
    %314 = math.tanh %313 : vector<8x128xf32>
    %cst_129 = arith.constant 5.000000e-01 : f32
    %315 = vector.broadcast %cst_129 : f32 to vector<8x128xf32>
    %316 = arith.mulf %315, %314 : vector<8x128xf32>
    %cst_130 = arith.constant 5.000000e-01 : f32
    %317 = vector.broadcast %cst_130 : f32 to vector<8x128xf32>
    %318 = arith.addf %316, %317 : vector<8x128xf32>
    %319 = vector.extract_strided_slice %302 {offsets = [0, 256], sizes = [8, 128], strides = [1, 1]} : vector<8x512xf32> to vector<8x128xf32>
    %320 = math.tanh %319 : vector<8x128xf32>
    %321 = vector.extract_strided_slice %302 {offsets = [0, 384], sizes = [8, 128], strides = [1, 1]} : vector<8x512xf32> to vector<8x128xf32>
    %cst_131 = arith.constant 5.000000e-01 : f32
    %322 = vector.broadcast %cst_131 : f32 to vector<8x128xf32>
    %323 = arith.mulf %322, %321 : vector<8x128xf32>
    %324 = math.tanh %323 : vector<8x128xf32>
    %cst_132 = arith.constant 5.000000e-01 : f32
    %325 = vector.broadcast %cst_132 : f32 to vector<8x128xf32>
    %326 = arith.mulf %325, %324 : vector<8x128xf32>
    %cst_133 = arith.constant 5.000000e-01 : f32
    %327 = vector.broadcast %cst_133 : f32 to vector<8x128xf32>
    %328 = arith.addf %326, %327 : vector<8x128xf32>
    %329 = arith.mulf %318, %250 : vector<8x128xf32>
    %330 = arith.mulf %310, %320 : vector<8x128xf32>
    %331 = arith.addf %329, %330 : vector<8x128xf32>
    %332 = math.tanh %331 : vector<8x128xf32>
    %333 = arith.mulf %328, %332 : vector<8x128xf32>
    %334 = arith.index_cast %c3_i32 : i32 to index
    %c0_134 = arith.constant 0 : index
    %c0_135 = arith.constant 0 : index
    %335 = vector.load %arg17[%334, %c0_134, %c0_135] : memref<8x8x128xf32, #tpu.memory_space<vmem>>, vector<1x8x128xf32>
    %336 = vector.shape_cast %335 : vector<1x8x128xf32> to vector<8x128xf32>
    %337 = vector.shape_cast %333 : vector<8x128xf32> to vector<1x8x128xf32>
    tpu.vector_store %arg17[%334, %c0_134, %c0_135], %337 {strides = array<i32>} : memref<8x8x128xf32, #tpu.memory_space<vmem>>, vector<1x8x128xf32>,
    %c4_i32 = arith.constant 4 : i32
    %338 = arith.truncf %333 : vector<8x128xf32> to vector<8x128xbf16>
    %c0_136 = arith.constant 0 : index
    %c0_137 = arith.constant 0 : index
    %339 = vector.load %arg5[%c0_136, %c0_137] : memref<128x512xbf16, #tpu.memory_space<vmem>>, vector<128x512xbf16>
    %cst_138 = arith.constant dense<0.000000e+00> : vector<8x512xf32>
    %340 = tpu.matmul %338, %339, %cst_138 {dimension_numbers = #tpu.dot_dimension_numbers<[1], [0], [0], [1], [0, 0, 1, 1], [], []>} : vector<8x128xbf16>, vector<128x512xbf16>, vector<8x512xf32> -> vector<8x512xf32>
    %341 = arith.index_cast %c4_i32 : i32 to index
    %c0_139 = arith.constant 0 : index
    %c0_140 = arith.constant 0 : index
    %342 = vector.load %arg16[%341, %c0_139, %c0_140] : memref<8x8x512xf32, #tpu.memory_space<vmem>>, vector<1x8x512xf32>
    %343 = vector.shape_cast %342 : vector<1x8x512xf32> to vector<8x512xf32>
    %344 = arith.truncf %297 : vector<8x128xf32> to vector<8x128xbf16>
    %c0_141 = arith.constant 0 : index
    %c0_142 = arith.constant 0 : index
    %345 = vector.load %arg2[%c0_141, %c0_142] : memref<128x512xbf16, #tpu.memory_space<vmem>>, vector<128x512xbf16>
    %cst_143 = arith.constant dense<0.000000e+00> : vector<8x512xf32>
    %346 = tpu.matmul %344, %345, %cst_143 {dimension_numbers = #tpu.dot_dimension_numbers<[1], [0], [0], [1], [0, 0, 1, 1], [], []>} : vector<8x128xbf16>, vector<128x512xbf16>, vector<8x512xf32> -> vector<8x512xf32>
    %347 = arith.addf %343, %346 : vector<8x512xf32>
    %348 = vector.extract_strided_slice %347 {offsets = [0, 0], sizes = [8, 128], strides = [1, 1]} : vector<8x512xf32> to vector<8x128xf32>
    %cst_144 = arith.constant 5.000000e-01 : f32
    %349 = vector.broadcast %cst_144 : f32 to vector<8x128xf32>
    %350 = arith.mulf %349, %348 : vector<8x128xf32>
    %351 = math.tanh %350 : vector<8x128xf32>
    %cst_145 = arith.constant 5.000000e-01 : f32
    %352 = vector.broadcast %cst_145 : f32 to vector<8x128xf32>
    %353 = arith.mulf %352, %351 : vector<8x128xf32>
    %cst_146 = arith.constant 5.000000e-01 : f32
    %354 = vector.broadcast %cst_146 : f32 to vector<8x128xf32>
    %355 = arith.addf %353, %354 : vector<8x128xf32>
    %356 = vector.extract_strided_slice %347 {offsets = [0, 128], sizes = [8, 128], strides = [1, 1]} : vector<8x512xf32> to vector<8x128xf32>
    %cst_147 = arith.constant 5.000000e-01 : f32
    %357 = vector.broadcast %cst_147 : f32 to vector<8x128xf32>
    %358 = arith.mulf %357, %356 : vector<8x128xf32>
    %359 = math.tanh %358 : vector<8x128xf32>
    %cst_148 = arith.constant 5.000000e-01 : f32
    %360 = vector.broadcast %cst_148 : f32 to vector<8x128xf32>
    %361 = arith.mulf %360, %359 : vector<8x128xf32>
    %cst_149 = arith.constant 5.000000e-01 : f32
    %362 = vector.broadcast %cst_149 : f32 to vector<8x128xf32>
    %363 = arith.addf %361, %362 : vector<8x128xf32>
    %364 = vector.extract_strided_slice %347 {offsets = [0, 256], sizes = [8, 128], strides = [1, 1]} : vector<8x512xf32> to vector<8x128xf32>
    %365 = math.tanh %364 : vector<8x128xf32>
    %366 = vector.extract_strided_slice %347 {offsets = [0, 384], sizes = [8, 128], strides = [1, 1]} : vector<8x512xf32> to vector<8x128xf32>
    %cst_150 = arith.constant 5.000000e-01 : f32
    %367 = vector.broadcast %cst_150 : f32 to vector<8x128xf32>
    %368 = arith.mulf %367, %366 : vector<8x128xf32>
    %369 = math.tanh %368 : vector<8x128xf32>
    %cst_151 = arith.constant 5.000000e-01 : f32
    %370 = vector.broadcast %cst_151 : f32 to vector<8x128xf32>
    %371 = arith.mulf %370, %369 : vector<8x128xf32>
    %cst_152 = arith.constant 5.000000e-01 : f32
    %372 = vector.broadcast %cst_152 : f32 to vector<8x128xf32>
    %373 = arith.addf %371, %372 : vector<8x128xf32>
    %374 = arith.mulf %363, %295 : vector<8x128xf32>
    %375 = arith.mulf %355, %365 : vector<8x128xf32>
    %376 = arith.addf %374, %375 : vector<8x128xf32>
    %377 = math.tanh %376 : vector<8x128xf32>
    %378 = arith.mulf %373, %377 : vector<8x128xf32>
    %379 = arith.truncf %378 : vector<8x128xf32> to vector<8x128xbf16>
    %c0_153 = arith.constant 0 : index
    %c0_154 = arith.constant 0 : index
    %380 = vector.load %arg4[%c0_153, %c0_154] : memref<128x512xbf16, #tpu.memory_space<vmem>>, vector<128x512xbf16>
    %cst_155 = arith.constant dense<0.000000e+00> : vector<8x512xf32>
    %381 = tpu.matmul %379, %380, %cst_155 {dimension_numbers = #tpu.dot_dimension_numbers<[1], [0], [0], [1], [0, 0, 1, 1], [], []>} : vector<8x128xbf16>, vector<128x512xbf16>, vector<8x512xf32> -> vector<8x512xf32>
    %382 = arith.addf %340, %381 : vector<8x512xf32>
    %383 = arith.addf %382, %12 : vector<8x512xf32>
    %384 = vector.extract_strided_slice %383 {offsets = [0, 0], sizes = [8, 128], strides = [1, 1]} : vector<8x512xf32> to vector<8x128xf32>
    %cst_156 = arith.constant 5.000000e-01 : f32
    %385 = vector.broadcast %cst_156 : f32 to vector<8x128xf32>
    %386 = arith.mulf %385, %384 : vector<8x128xf32>
    %387 = math.tanh %386 : vector<8x128xf32>
    %cst_157 = arith.constant 5.000000e-01 : f32
    %388 = vector.broadcast %cst_157 : f32 to vector<8x128xf32>
    %389 = arith.mulf %388, %387 : vector<8x128xf32>
    %cst_158 = arith.constant 5.000000e-01 : f32
    %390 = vector.broadcast %cst_158 : f32 to vector<8x128xf32>
    %391 = arith.addf %389, %390 : vector<8x128xf32>
    %392 = vector.extract_strided_slice %383 {offsets = [0, 128], sizes = [8, 128], strides = [1, 1]} : vector<8x512xf32> to vector<8x128xf32>
    %cst_159 = arith.constant 5.000000e-01 : f32
    %393 = vector.broadcast %cst_159 : f32 to vector<8x128xf32>
    %394 = arith.mulf %393, %392 : vector<8x128xf32>
    %395 = math.tanh %394 : vector<8x128xf32>
    %cst_160 = arith.constant 5.000000e-01 : f32
    %396 = vector.broadcast %cst_160 : f32 to vector<8x128xf32>
    %397 = arith.mulf %396, %395 : vector<8x128xf32>
    %cst_161 = arith.constant 5.000000e-01 : f32
    %398 = vector.broadcast %cst_161 : f32 to vector<8x128xf32>
    %399 = arith.addf %397, %398 : vector<8x128xf32>
    %400 = vector.extract_strided_slice %383 {offsets = [0, 256], sizes = [8, 128], strides = [1, 1]} : vector<8x512xf32> to vector<8x128xf32>
    %401 = math.tanh %400 : vector<8x128xf32>
    %402 = vector.extract_strided_slice %383 {offsets = [0, 384], sizes = [8, 128], strides = [1, 1]} : vector<8x512xf32> to vector<8x128xf32>
    %cst_162 = arith.constant 5.000000e-01 : f32
    %403 = vector.broadcast %cst_162 : f32 to vector<8x128xf32>
    %404 = arith.mulf %403, %402 : vector<8x128xf32>
    %405 = math.tanh %404 : vector<8x128xf32>
    %cst_163 = arith.constant 5.000000e-01 : f32
    %406 = vector.broadcast %cst_163 : f32 to vector<8x128xf32>
    %407 = arith.mulf %406, %405 : vector<8x128xf32>
    %cst_164 = arith.constant 5.000000e-01 : f32
    %408 = vector.broadcast %cst_164 : f32 to vector<8x128xf32>
    %409 = arith.addf %407, %408 : vector<8x128xf32>
    %410 = arith.mulf %399, %331 : vector<8x128xf32>
    %411 = arith.mulf %391, %401 : vector<8x128xf32>
    %412 = arith.addf %410, %411 : vector<8x128xf32>
    %413 = math.tanh %412 : vector<8x128xf32>
    %414 = arith.mulf %409, %413 : vector<8x128xf32>
    %415 = arith.index_cast %c4_i32 : i32 to index
    %c0_165 = arith.constant 0 : index
    %c0_166 = arith.constant 0 : index
    %416 = vector.load %arg17[%415, %c0_165, %c0_166] : memref<8x8x128xf32, #tpu.memory_space<vmem>>, vector<1x8x128xf32>
    %417 = vector.shape_cast %416 : vector<1x8x128xf32> to vector<8x128xf32>
    %418 = vector.shape_cast %414 : vector<8x128xf32> to vector<1x8x128xf32>
    tpu.vector_store %arg17[%415, %c0_165, %c0_166], %418 {strides = array<i32>} : memref<8x8x128xf32, #tpu.memory_space<vmem>>, vector<1x8x128xf32>,
    %c5_i32 = arith.constant 5 : i32
    %419 = arith.truncf %414 : vector<8x128xf32> to vector<8x128xbf16>
    %c0_167 = arith.constant 0 : index
    %c0_168 = arith.constant 0 : index
    %420 = vector.load %arg5[%c0_167, %c0_168] : memref<128x512xbf16, #tpu.memory_space<vmem>>, vector<128x512xbf16>
    %cst_169 = arith.constant dense<0.000000e+00> : vector<8x512xf32>
    %421 = tpu.matmul %419, %420, %cst_169 {dimension_numbers = #tpu.dot_dimension_numbers<[1], [0], [0], [1], [0, 0, 1, 1], [], []>} : vector<8x128xbf16>, vector<128x512xbf16>, vector<8x512xf32> -> vector<8x512xf32>
    %422 = arith.index_cast %c5_i32 : i32 to index
    %c0_170 = arith.constant 0 : index
    %c0_171 = arith.constant 0 : index
    %423 = vector.load %arg16[%422, %c0_170, %c0_171] : memref<8x8x512xf32, #tpu.memory_space<vmem>>, vector<1x8x512xf32>
    %424 = vector.shape_cast %423 : vector<1x8x512xf32> to vector<8x512xf32>
    %425 = arith.truncf %378 : vector<8x128xf32> to vector<8x128xbf16>
    %c0_172 = arith.constant 0 : index
    %c0_173 = arith.constant 0 : index
    %426 = vector.load %arg2[%c0_172, %c0_173] : memref<128x512xbf16, #tpu.memory_space<vmem>>, vector<128x512xbf16>
    %cst_174 = arith.constant dense<0.000000e+00> : vector<8x512xf32>
    %427 = tpu.matmul %425, %426, %cst_174 {dimension_numbers = #tpu.dot_dimension_numbers<[1], [0], [0], [1], [0, 0, 1, 1], [], []>} : vector<8x128xbf16>, vector<128x512xbf16>, vector<8x512xf32> -> vector<8x512xf32>
    %428 = arith.addf %424, %427 : vector<8x512xf32>
    %429 = vector.extract_strided_slice %428 {offsets = [0, 0], sizes = [8, 128], strides = [1, 1]} : vector<8x512xf32> to vector<8x128xf32>
    %cst_175 = arith.constant 5.000000e-01 : f32
    %430 = vector.broadcast %cst_175 : f32 to vector<8x128xf32>
    %431 = arith.mulf %430, %429 : vector<8x128xf32>
    %432 = math.tanh %431 : vector<8x128xf32>
    %cst_176 = arith.constant 5.000000e-01 : f32
    %433 = vector.broadcast %cst_176 : f32 to vector<8x128xf32>
    %434 = arith.mulf %433, %432 : vector<8x128xf32>
    %cst_177 = arith.constant 5.000000e-01 : f32
    %435 = vector.broadcast %cst_177 : f32 to vector<8x128xf32>
    %436 = arith.addf %434, %435 : vector<8x128xf32>
    %437 = vector.extract_strided_slice %428 {offsets = [0, 128], sizes = [8, 128], strides = [1, 1]} : vector<8x512xf32> to vector<8x128xf32>
    %cst_178 = arith.constant 5.000000e-01 : f32
    %438 = vector.broadcast %cst_178 : f32 to vector<8x128xf32>
    %439 = arith.mulf %438, %437 : vector<8x128xf32>
    %440 = math.tanh %439 : vector<8x128xf32>
    %cst_179 = arith.constant 5.000000e-01 : f32
    %441 = vector.broadcast %cst_179 : f32 to vector<8x128xf32>
    %442 = arith.mulf %441, %440 : vector<8x128xf32>
    %cst_180 = arith.constant 5.000000e-01 : f32
    %443 = vector.broadcast %cst_180 : f32 to vector<8x128xf32>
    %444 = arith.addf %442, %443 : vector<8x128xf32>
    %445 = vector.extract_strided_slice %428 {offsets = [0, 256], sizes = [8, 128], strides = [1, 1]} : vector<8x512xf32> to vector<8x128xf32>
    %446 = math.tanh %445 : vector<8x128xf32>
    %447 = vector.extract_strided_slice %428 {offsets = [0, 384], sizes = [8, 128], strides = [1, 1]} : vector<8x512xf32> to vector<8x128xf32>
    %cst_181 = arith.constant 5.000000e-01 : f32
    %448 = vector.broadcast %cst_181 : f32 to vector<8x128xf32>
    %449 = arith.mulf %448, %447 : vector<8x128xf32>
    %450 = math.tanh %449 : vector<8x128xf32>
    %cst_182 = arith.constant 5.000000e-01 : f32
    %451 = vector.broadcast %cst_182 : f32 to vector<8x128xf32>
    %452 = arith.mulf %451, %450 : vector<8x128xf32>
    %cst_183 = arith.constant 5.000000e-01 : f32
    %453 = vector.broadcast %cst_183 : f32 to vector<8x128xf32>
    %454 = arith.addf %452, %453 : vector<8x128xf32>
    %455 = arith.mulf %444, %376 : vector<8x128xf32>
    %456 = arith.mulf %436, %446 : vector<8x128xf32>
    %457 = arith.addf %455, %456 : vector<8x128xf32>
    %458 = math.tanh %457 : vector<8x128xf32>
    %459 = arith.mulf %454, %458 : vector<8x128xf32>
    %460 = arith.truncf %459 : vector<8x128xf32> to vector<8x128xbf16>
    %c0_184 = arith.constant 0 : index
    %c0_185 = arith.constant 0 : index
    %461 = vector.load %arg4[%c0_184, %c0_185] : memref<128x512xbf16, #tpu.memory_space<vmem>>, vector<128x512xbf16>
    %cst_186 = arith.constant dense<0.000000e+00> : vector<8x512xf32>
    %462 = tpu.matmul %460, %461, %cst_186 {dimension_numbers = #tpu.dot_dimension_numbers<[1], [0], [0], [1], [0, 0, 1, 1], [], []>} : vector<8x128xbf16>, vector<128x512xbf16>, vector<8x512xf32> -> vector<8x512xf32>
    %463 = arith.addf %421, %462 : vector<8x512xf32>
    %464 = arith.addf %463, %12 : vector<8x512xf32>
    %465 = vector.extract_strided_slice %464 {offsets = [0, 0], sizes = [8, 128], strides = [1, 1]} : vector<8x512xf32> to vector<8x128xf32>
    %cst_187 = arith.constant 5.000000e-01 : f32
    %466 = vector.broadcast %cst_187 : f32 to vector<8x128xf32>
    %467 = arith.mulf %466, %465 : vector<8x128xf32>
    %468 = math.tanh %467 : vector<8x128xf32>
    %cst_188 = arith.constant 5.000000e-01 : f32
    %469 = vector.broadcast %cst_188 : f32 to vector<8x128xf32>
    %470 = arith.mulf %469, %468 : vector<8x128xf32>
    %cst_189 = arith.constant 5.000000e-01 : f32
    %471 = vector.broadcast %cst_189 : f32 to vector<8x128xf32>
    %472 = arith.addf %470, %471 : vector<8x128xf32>
    %473 = vector.extract_strided_slice %464 {offsets = [0, 128], sizes = [8, 128], strides = [1, 1]} : vector<8x512xf32> to vector<8x128xf32>
    %cst_190 = arith.constant 5.000000e-01 : f32
    %474 = vector.broadcast %cst_190 : f32 to vector<8x128xf32>
    %475 = arith.mulf %474, %473 : vector<8x128xf32>
    %476 = math.tanh %475 : vector<8x128xf32>
    %cst_191 = arith.constant 5.000000e-01 : f32
    %477 = vector.broadcast %cst_191 : f32 to vector<8x128xf32>
    %478 = arith.mulf %477, %476 : vector<8x128xf32>
    %cst_192 = arith.constant 5.000000e-01 : f32
    %479 = vector.broadcast %cst_192 : f32 to vector<8x128xf32>
    %480 = arith.addf %478, %479 : vector<8x128xf32>
    %481 = vector.extract_strided_slice %464 {offsets = [0, 256], sizes = [8, 128], strides = [1, 1]} : vector<8x512xf32> to vector<8x128xf32>
    %482 = math.tanh %481 : vector<8x128xf32>
    %483 = vector.extract_strided_slice %464 {offsets = [0, 384], sizes = [8, 128], strides = [1, 1]} : vector<8x512xf32> to vector<8x128xf32>
    %cst_193 = arith.constant 5.000000e-01 : f32
    %484 = vector.broadcast %cst_193 : f32 to vector<8x128xf32>
    %485 = arith.mulf %484, %483 : vector<8x128xf32>
    %486 = math.tanh %485 : vector<8x128xf32>
    %cst_194 = arith.constant 5.000000e-01 : f32
    %487 = vector.broadcast %cst_194 : f32 to vector<8x128xf32>
    %488 = arith.mulf %487, %486 : vector<8x128xf32>
    %cst_195 = arith.constant 5.000000e-01 : f32
    %489 = vector.broadcast %cst_195 : f32 to vector<8x128xf32>
    %490 = arith.addf %488, %489 : vector<8x128xf32>
    %491 = arith.mulf %480, %412 : vector<8x128xf32>
    %492 = arith.mulf %472, %482 : vector<8x128xf32>
    %493 = arith.addf %491, %492 : vector<8x128xf32>
    %494 = math.tanh %493 : vector<8x128xf32>
    %495 = arith.mulf %490, %494 : vector<8x128xf32>
    %496 = arith.index_cast %c5_i32 : i32 to index
    %c0_196 = arith.constant 0 : index
    %c0_197 = arith.constant 0 : index
    %497 = vector.load %arg17[%496, %c0_196, %c0_197] : memref<8x8x128xf32, #tpu.memory_space<vmem>>, vector<1x8x128xf32>
    %498 = vector.shape_cast %497 : vector<1x8x128xf32> to vector<8x128xf32>
    %499 = vector.shape_cast %495 : vector<8x128xf32> to vector<1x8x128xf32>
    tpu.vector_store %arg17[%496, %c0_196, %c0_197], %499 {strides = array<i32>} : memref<8x8x128xf32, #tpu.memory_space<vmem>>, vector<1x8x128xf32>,
    %c6_i32 = arith.constant 6 : i32
    %500 = arith.truncf %495 : vector<8x128xf32> to vector<8x128xbf16>
    %c0_198 = arith.constant 0 : index
    %c0_199 = arith.constant 0 : index
    %501 = vector.load %arg5[%c0_198, %c0_199] : memref<128x512xbf16, #tpu.memory_space<vmem>>, vector<128x512xbf16>
    %cst_200 = arith.constant dense<0.000000e+00> : vector<8x512xf32>
    %502 = tpu.matmul %500, %501, %cst_200 {dimension_numbers = #tpu.dot_dimension_numbers<[1], [0], [0], [1], [0, 0, 1, 1], [], []>} : vector<8x128xbf16>, vector<128x512xbf16>, vector<8x512xf32> -> vector<8x512xf32>
    %503 = arith.index_cast %c6_i32 : i32 to index
    %c0_201 = arith.constant 0 : index
    %c0_202 = arith.constant 0 : index
    %504 = vector.load %arg16[%503, %c0_201, %c0_202] : memref<8x8x512xf32, #tpu.memory_space<vmem>>, vector<1x8x512xf32>
    %505 = vector.shape_cast %504 : vector<1x8x512xf32> to vector<8x512xf32>
    %506 = arith.truncf %459 : vector<8x128xf32> to vector<8x128xbf16>
    %c0_203 = arith.constant 0 : index
    %c0_204 = arith.constant 0 : index
    %507 = vector.load %arg2[%c0_203, %c0_204] : memref<128x512xbf16, #tpu.memory_space<vmem>>, vector<128x512xbf16>
    %cst_205 = arith.constant dense<0.000000e+00> : vector<8x512xf32>
    %508 = tpu.matmul %506, %507, %cst_205 {dimension_numbers = #tpu.dot_dimension_numbers<[1], [0], [0], [1], [0, 0, 1, 1], [], []>} : vector<8x128xbf16>, vector<128x512xbf16>, vector<8x512xf32> -> vector<8x512xf32>
    %509 = arith.addf %505, %508 : vector<8x512xf32>
    %510 = vector.extract_strided_slice %509 {offsets = [0, 0], sizes = [8, 128], strides = [1, 1]} : vector<8x512xf32> to vector<8x128xf32>
    %cst_206 = arith.constant 5.000000e-01 : f32
    %511 = vector.broadcast %cst_206 : f32 to vector<8x128xf32>
    %512 = arith.mulf %511, %510 : vector<8x128xf32>
    %513 = math.tanh %512 : vector<8x128xf32>
    %cst_207 = arith.constant 5.000000e-01 : f32
    %514 = vector.broadcast %cst_207 : f32 to vector<8x128xf32>
    %515 = arith.mulf %514, %513 : vector<8x128xf32>
    %cst_208 = arith.constant 5.000000e-01 : f32
    %516 = vector.broadcast %cst_208 : f32 to vector<8x128xf32>
    %517 = arith.addf %515, %516 : vector<8x128xf32>
    %518 = vector.extract_strided_slice %509 {offsets = [0, 128], sizes = [8, 128], strides = [1, 1]} : vector<8x512xf32> to vector<8x128xf32>
    %cst_209 = arith.constant 5.000000e-01 : f32
    %519 = vector.broadcast %cst_209 : f32 to vector<8x128xf32>
    %520 = arith.mulf %519, %518 : vector<8x128xf32>
    %521 = math.tanh %520 : vector<8x128xf32>
    %cst_210 = arith.constant 5.000000e-01 : f32
    %522 = vector.broadcast %cst_210 : f32 to vector<8x128xf32>
    %523 = arith.mulf %522, %521 : vector<8x128xf32>
    %cst_211 = arith.constant 5.000000e-01 : f32
    %524 = vector.broadcast %cst_211 : f32 to vector<8x128xf32>
    %525 = arith.addf %523, %524 : vector<8x128xf32>
    %526 = vector.extract_strided_slice %509 {offsets = [0, 256], sizes = [8, 128], strides = [1, 1]} : vector<8x512xf32> to vector<8x128xf32>
    %527 = math.tanh %526 : vector<8x128xf32>
    %528 = vector.extract_strided_slice %509 {offsets = [0, 384], sizes = [8, 128], strides = [1, 1]} : vector<8x512xf32> to vector<8x128xf32>
    %cst_212 = arith.constant 5.000000e-01 : f32
    %529 = vector.broadcast %cst_212 : f32 to vector<8x128xf32>
    %530 = arith.mulf %529, %528 : vector<8x128xf32>
    %531 = math.tanh %530 : vector<8x128xf32>
    %cst_213 = arith.constant 5.000000e-01 : f32
    %532 = vector.broadcast %cst_213 : f32 to vector<8x128xf32>
    %533 = arith.mulf %532, %531 : vector<8x128xf32>
    %cst_214 = arith.constant 5.000000e-01 : f32
    %534 = vector.broadcast %cst_214 : f32 to vector<8x128xf32>
    %535 = arith.addf %533, %534 : vector<8x128xf32>
    %536 = arith.mulf %525, %457 : vector<8x128xf32>
    %537 = arith.mulf %517, %527 : vector<8x128xf32>
    %538 = arith.addf %536, %537 : vector<8x128xf32>
    %539 = math.tanh %538 : vector<8x128xf32>
    %540 = arith.mulf %535, %539 : vector<8x128xf32>
    %541 = arith.truncf %540 : vector<8x128xf32> to vector<8x128xbf16>
    %c0_215 = arith.constant 0 : index
    %c0_216 = arith.constant 0 : index
    %542 = vector.load %arg4[%c0_215, %c0_216] : memref<128x512xbf16, #tpu.memory_space<vmem>>, vector<128x512xbf16>
    %cst_217 = arith.constant dense<0.000000e+00> : vector<8x512xf32>
    %543 = tpu.matmul %541, %542, %cst_217 {dimension_numbers = #tpu.dot_dimension_numbers<[1], [0], [0], [1], [0, 0, 1, 1], [], []>} : vector<8x128xbf16>, vector<128x512xbf16>, vector<8x512xf32> -> vector<8x512xf32>
    %544 = arith.addf %502, %543 : vector<8x512xf32>
    %545 = arith.addf %544, %12 : vector<8x512xf32>
    %546 = vector.extract_strided_slice %545 {offsets = [0, 0], sizes = [8, 128], strides = [1, 1]} : vector<8x512xf32> to vector<8x128xf32>
    %cst_218 = arith.constant 5.000000e-01 : f32
    %547 = vector.broadcast %cst_218 : f32 to vector<8x128xf32>
    %548 = arith.mulf %547, %546 : vector<8x128xf32>
    %549 = math.tanh %548 : vector<8x128xf32>
    %cst_219 = arith.constant 5.000000e-01 : f32
    %550 = vector.broadcast %cst_219 : f32 to vector<8x128xf32>
    %551 = arith.mulf %550, %549 : vector<8x128xf32>
    %cst_220 = arith.constant 5.000000e-01 : f32
    %552 = vector.broadcast %cst_220 : f32 to vector<8x128xf32>
    %553 = arith.addf %551, %552 : vector<8x128xf32>
    %554 = vector.extract_strided_slice %545 {offsets = [0, 128], sizes = [8, 128], strides = [1, 1]} : vector<8x512xf32> to vector<8x128xf32>
    %cst_221 = arith.constant 5.000000e-01 : f32
    %555 = vector.broadcast %cst_221 : f32 to vector<8x128xf32>
    %556 = arith.mulf %555, %554 : vector<8x128xf32>
    %557 = math.tanh %556 : vector<8x128xf32>
    %cst_222 = arith.constant 5.000000e-01 : f32
    %558 = vector.broadcast %cst_222 : f32 to vector<8x128xf32>
    %559 = arith.mulf %558, %557 : vector<8x128xf32>
    %cst_223 = arith.constant 5.000000e-01 : f32
    %560 = vector.broadcast %cst_223 : f32 to vector<8x128xf32>
    %561 = arith.addf %559, %560 : vector<8x128xf32>
    %562 = vector.extract_strided_slice %545 {offsets = [0, 256], sizes = [8, 128], strides = [1, 1]} : vector<8x512xf32> to vector<8x128xf32>
    %563 = math.tanh %562 : vector<8x128xf32>
    %564 = vector.extract_strided_slice %545 {offsets = [0, 384], sizes = [8, 128], strides = [1, 1]} : vector<8x512xf32> to vector<8x128xf32>
    %cst_224 = arith.constant 5.000000e-01 : f32
    %565 = vector.broadcast %cst_224 : f32 to vector<8x128xf32>
    %566 = arith.mulf %565, %564 : vector<8x128xf32>
    %567 = math.tanh %566 : vector<8x128xf32>
    %cst_225 = arith.constant 5.000000e-01 : f32
    %568 = vector.broadcast %cst_225 : f32 to vector<8x128xf32>
    %569 = arith.mulf %568, %567 : vector<8x128xf32>
    %cst_226 = arith.constant 5.000000e-01 : f32
    %570 = vector.broadcast %cst_226 : f32 to vector<8x128xf32>
    %571 = arith.addf %569, %570 : vector<8x128xf32>
    %572 = arith.mulf %561, %493 : vector<8x128xf32>
    %573 = arith.mulf %553, %563 : vector<8x128xf32>
    %574 = arith.addf %572, %573 : vector<8x128xf32>
    %575 = math.tanh %574 : vector<8x128xf32>
    %576 = arith.mulf %571, %575 : vector<8x128xf32>
    %577 = arith.index_cast %c6_i32 : i32 to index
    %c0_227 = arith.constant 0 : index
    %c0_228 = arith.constant 0 : index
    %578 = vector.load %arg17[%577, %c0_227, %c0_228] : memref<8x8x128xf32, #tpu.memory_space<vmem>>, vector<1x8x128xf32>
    %579 = vector.shape_cast %578 : vector<1x8x128xf32> to vector<8x128xf32>
    %580 = vector.shape_cast %576 : vector<8x128xf32> to vector<1x8x128xf32>
    tpu.vector_store %arg17[%577, %c0_227, %c0_228], %580 {strides = array<i32>} : memref<8x8x128xf32, #tpu.memory_space<vmem>>, vector<1x8x128xf32>,
    %c7_i32 = arith.constant 7 : i32
    %581 = arith.truncf %576 : vector<8x128xf32> to vector<8x128xbf16>
    %c0_229 = arith.constant 0 : index
    %c0_230 = arith.constant 0 : index
    %582 = vector.load %arg5[%c0_229, %c0_230] : memref<128x512xbf16, #tpu.memory_space<vmem>>, vector<128x512xbf16>
    %cst_231 = arith.constant dense<0.000000e+00> : vector<8x512xf32>
    %583 = tpu.matmul %581, %582, %cst_231 {dimension_numbers = #tpu.dot_dimension_numbers<[1], [0], [0], [1], [0, 0, 1, 1], [], []>} : vector<8x128xbf16>, vector<128x512xbf16>, vector<8x512xf32> -> vector<8x512xf32>
    %584 = arith.index_cast %c7_i32 : i32 to index
    %c0_232 = arith.constant 0 : index
    %c0_233 = arith.constant 0 : index
    %585 = vector.load %arg16[%584, %c0_232, %c0_233] : memref<8x8x512xf32, #tpu.memory_space<vmem>>, vector<1x8x512xf32>
    %586 = vector.shape_cast %585 : vector<1x8x512xf32> to vector<8x512xf32>
    %587 = arith.truncf %540 : vector<8x128xf32> to vector<8x128xbf16>
    %c0_234 = arith.constant 0 : index
    %c0_235 = arith.constant 0 : index
    %588 = vector.load %arg2[%c0_234, %c0_235] : memref<128x512xbf16, #tpu.memory_space<vmem>>, vector<128x512xbf16>
    %cst_236 = arith.constant dense<0.000000e+00> : vector<8x512xf32>
    %589 = tpu.matmul %587, %588, %cst_236 {dimension_numbers = #tpu.dot_dimension_numbers<[1], [0], [0], [1], [0, 0, 1, 1], [], []>} : vector<8x128xbf16>, vector<128x512xbf16>, vector<8x512xf32> -> vector<8x512xf32>
    %590 = arith.addf %586, %589 : vector<8x512xf32>
    %591 = vector.extract_strided_slice %590 {offsets = [0, 0], sizes = [8, 128], strides = [1, 1]} : vector<8x512xf32> to vector<8x128xf32>
    %cst_237 = arith.constant 5.000000e-01 : f32
    %592 = vector.broadcast %cst_237 : f32 to vector<8x128xf32>
    %593 = arith.mulf %592, %591 : vector<8x128xf32>
    %594 = math.tanh %593 : vector<8x128xf32>
    %cst_238 = arith.constant 5.000000e-01 : f32
    %595 = vector.broadcast %cst_238 : f32 to vector<8x128xf32>
    %596 = arith.mulf %595, %594 : vector<8x128xf32>
    %cst_239 = arith.constant 5.000000e-01 : f32
    %597 = vector.broadcast %cst_239 : f32 to vector<8x128xf32>
    %598 = arith.addf %596, %597 : vector<8x128xf32>
    %599 = vector.extract_strided_slice %590 {offsets = [0, 128], sizes = [8, 128], strides = [1, 1]} : vector<8x512xf32> to vector<8x128xf32>
    %cst_240 = arith.constant 5.000000e-01 : f32
    %600 = vector.broadcast %cst_240 : f32 to vector<8x128xf32>
    %601 = arith.mulf %600, %599 : vector<8x128xf32>
    %602 = math.tanh %601 : vector<8x128xf32>
    %cst_241 = arith.constant 5.000000e-01 : f32
    %603 = vector.broadcast %cst_241 : f32 to vector<8x128xf32>
    %604 = arith.mulf %603, %602 : vector<8x128xf32>
    %cst_242 = arith.constant 5.000000e-01 : f32
    %605 = vector.broadcast %cst_242 : f32 to vector<8x128xf32>
    %606 = arith.addf %604, %605 : vector<8x128xf32>
    %607 = vector.extract_strided_slice %590 {offsets = [0, 256], sizes = [8, 128], strides = [1, 1]} : vector<8x512xf32> to vector<8x128xf32>
    %608 = math.tanh %607 : vector<8x128xf32>
    %609 = vector.extract_strided_slice %590 {offsets = [0, 384], sizes = [8, 128], strides = [1, 1]} : vector<8x512xf32> to vector<8x128xf32>
    %cst_243 = arith.constant 5.000000e-01 : f32
    %610 = vector.broadcast %cst_243 : f32 to vector<8x128xf32>
    %611 = arith.mulf %610, %609 : vector<8x128xf32>
    %612 = math.tanh %611 : vector<8x128xf32>
    %cst_244 = arith.constant 5.000000e-01 : f32
    %613 = vector.broadcast %cst_244 : f32 to vector<8x128xf32>
    %614 = arith.mulf %613, %612 : vector<8x128xf32>
    %cst_245 = arith.constant 5.000000e-01 : f32
    %615 = vector.broadcast %cst_245 : f32 to vector<8x128xf32>
    %616 = arith.addf %614, %615 : vector<8x128xf32>
    %617 = arith.mulf %606, %538 : vector<8x128xf32>
    %618 = arith.mulf %598, %608 : vector<8x128xf32>
    %619 = arith.addf %617, %618 : vector<8x128xf32>
    %620 = math.tanh %619 : vector<8x128xf32>
    %621 = arith.mulf %616, %620 : vector<8x128xf32>
    %622 = arith.truncf %621 : vector<8x128xf32> to vector<8x128xbf16>
    %c0_246 = arith.constant 0 : index
    %c0_247 = arith.constant 0 : index
    %623 = vector.load %arg4[%c0_246, %c0_247] : memref<128x512xbf16, #tpu.memory_space<vmem>>, vector<128x512xbf16>
    %cst_248 = arith.constant dense<0.000000e+00> : vector<8x512xf32>
    %624 = tpu.matmul %622, %623, %cst_248 {dimension_numbers = #tpu.dot_dimension_numbers<[1], [0], [0], [1], [0, 0, 1, 1], [], []>} : vector<8x128xbf16>, vector<128x512xbf16>, vector<8x512xf32> -> vector<8x512xf32>
    %625 = arith.addf %583, %624 : vector<8x512xf32>
    %626 = arith.addf %625, %12 : vector<8x512xf32>
    %627 = vector.extract_strided_slice %626 {offsets = [0, 0], sizes = [8, 128], strides = [1, 1]} : vector<8x512xf32> to vector<8x128xf32>
    %cst_249 = arith.constant 5.000000e-01 : f32
    %628 = vector.broadcast %cst_249 : f32 to vector<8x128xf32>
    %629 = arith.mulf %628, %627 : vector<8x128xf32>
    %630 = math.tanh %629 : vector<8x128xf32>
    %cst_250 = arith.constant 5.000000e-01 : f32
    %631 = vector.broadcast %cst_250 : f32 to vector<8x128xf32>
    %632 = arith.mulf %631, %630 : vector<8x128xf32>
    %cst_251 = arith.constant 5.000000e-01 : f32
    %633 = vector.broadcast %cst_251 : f32 to vector<8x128xf32>
    %634 = arith.addf %632, %633 : vector<8x128xf32>
    %635 = vector.extract_strided_slice %626 {offsets = [0, 128], sizes = [8, 128], strides = [1, 1]} : vector<8x512xf32> to vector<8x128xf32>
    %cst_252 = arith.constant 5.000000e-01 : f32
    %636 = vector.broadcast %cst_252 : f32 to vector<8x128xf32>
    %637 = arith.mulf %636, %635 : vector<8x128xf32>
    %638 = math.tanh %637 : vector<8x128xf32>
    %cst_253 = arith.constant 5.000000e-01 : f32
    %639 = vector.broadcast %cst_253 : f32 to vector<8x128xf32>
    %640 = arith.mulf %639, %638 : vector<8x128xf32>
    %cst_254 = arith.constant 5.000000e-01 : f32
    %641 = vector.broadcast %cst_254 : f32 to vector<8x128xf32>
    %642 = arith.addf %640, %641 : vector<8x128xf32>
    %643 = vector.extract_strided_slice %626 {offsets = [0, 256], sizes = [8, 128], strides = [1, 1]} : vector<8x512xf32> to vector<8x128xf32>
    %644 = math.tanh %643 : vector<8x128xf32>
    %645 = vector.extract_strided_slice %626 {offsets = [0, 384], sizes = [8, 128], strides = [1, 1]} : vector<8x512xf32> to vector<8x128xf32>
    %cst_255 = arith.constant 5.000000e-01 : f32
    %646 = vector.broadcast %cst_255 : f32 to vector<8x128xf32>
    %647 = arith.mulf %646, %645 : vector<8x128xf32>
    %648 = math.tanh %647 : vector<8x128xf32>
    %cst_256 = arith.constant 5.000000e-01 : f32
    %649 = vector.broadcast %cst_256 : f32 to vector<8x128xf32>
    %650 = arith.mulf %649, %648 : vector<8x128xf32>
    %cst_257 = arith.constant 5.000000e-01 : f32
    %651 = vector.broadcast %cst_257 : f32 to vector<8x128xf32>
    %652 = arith.addf %650, %651 : vector<8x128xf32>
    %653 = arith.mulf %642, %574 : vector<8x128xf32>
    %654 = arith.mulf %634, %644 : vector<8x128xf32>
    %655 = arith.addf %653, %654 : vector<8x128xf32>
    %656 = math.tanh %655 : vector<8x128xf32>
    %657 = arith.mulf %652, %656 : vector<8x128xf32>
    %658 = arith.index_cast %c7_i32 : i32 to index
    %c0_258 = arith.constant 0 : index
    %c0_259 = arith.constant 0 : index
    %659 = vector.load %arg17[%658, %c0_258, %c0_259] : memref<8x8x128xf32, #tpu.memory_space<vmem>>, vector<1x8x128xf32>
    %660 = vector.shape_cast %659 : vector<1x8x128xf32> to vector<8x128xf32>
    %661 = vector.shape_cast %657 : vector<8x128xf32> to vector<1x8x128xf32>
    tpu.vector_store %arg17[%658, %c0_258, %c0_259], %661 {strides = array<i32>} : memref<8x8x128xf32, #tpu.memory_space<vmem>>, vector<1x8x128xf32>,
    %c8_i32 = arith.constant 8 : i32
    %c0_260 = arith.constant 0 : index
    %c0_261 = arith.constant 0 : index
    %c0_262 = arith.constant 0 : index
    %662 = vector.load %arg17[%c0_260, %c0_261, %c0_262] : memref<8x8x128xf32, #tpu.memory_space<vmem>>, vector<8x8x128xf32>
    %663 = vector.shape_cast %662 : vector<8x8x128xf32> to vector<64x128xf32>
    %664 = arith.truncf %663 : vector<64x128xf32> to vector<64x128xbf16>
    %c0_263 = arith.constant 0 : index
    %c0_264 = arith.constant 0 : index
    %665 = vector.load %arg7[%c0_263, %c0_264] : memref<128x128xbf16, #tpu.memory_space<vmem>>, vector<128x128xbf16>
    %cst_265 = arith.constant dense<0.000000e+00> : vector<64x128xf32>
    %666 = tpu.matmul %664, %665, %cst_265 {dimension_numbers = #tpu.dot_dimension_numbers<[1], [0], [0], [1], [0, 0, 1, 1], [], []>} : vector<64x128xbf16>, vector<128x128xbf16>, vector<64x128xf32> -> vector<64x128xf32>
    %c0_266 = arith.constant 0 : index
    %c0_267 = arith.constant 0 : index
    %667 = vector.load %arg8[%c0_266, %c0_267] : memref<1x128xf32, #tpu.memory_space<vmem>>, vector<1x128xf32>
    %668 = vector.broadcast %667 : vector<1x128xf32> to vector<64x128xf32>
    %669 = arith.addf %666, %668 : vector<64x128xf32>
    %670 = math.tanh %669 : vector<64x128xf32>
    %671 = arith.truncf %670 : vector<64x128xf32> to vector<64x128xbf16>
    %c0_268 = arith.constant 0 : index
    %c0_269 = arith.constant 0 : index
    %672 = vector.load %arg9[%c0_268, %c0_269] : memref<128x128xbf16, #tpu.memory_space<vmem>>, vector<128x128xbf16>
    %cst_270 = arith.constant dense<0.000000e+00> : vector<64x128xf32>
    %673 = tpu.matmul %671, %672, %cst_270 {dimension_numbers = #tpu.dot_dimension_numbers<[1], [0], [0], [1], [0, 0, 1, 1], [], []>} : vector<64x128xbf16>, vector<128x128xbf16>, vector<64x128xf32> -> vector<64x128xf32>
    %c0_271 = arith.constant 0 : index
    %c0_272 = arith.constant 0 : index
    %674 = vector.load %arg10[%c0_271, %c0_272] : memref<1x128xf32, #tpu.memory_space<vmem>>, vector<1x128xf32>
    %675 = vector.broadcast %674 : vector<1x128xf32> to vector<64x128xf32>
    %676 = arith.addf %673, %675 : vector<64x128xf32>
    %677 = vector.shape_cast %676 : vector<64x128xf32> to vector<8x8x128xf32>
    %cst_273 = arith.constant dense<0xFF800000> : vector<8x128xf32>
    %678 = vector.multi_reduction <maximumf>, %677, %cst_273 [0] : vector<8x8x128xf32> to vector<8x128xf32>
    %679 = vector.shape_cast %678 : vector<8x128xf32> to vector<1x8x128xf32>
    %680 = vector.broadcast %679 : vector<1x8x128xf32> to vector<8x8x128xf32>
    %681 = arith.subf %677, %680 : vector<8x8x128xf32>
    %682 = math.exp %681 : vector<8x8x128xf32>
    %cst_274 = arith.constant dense<0.000000e+00> : vector<8x128xf32>
    %683 = vector.multi_reduction <add>, %682, %cst_274 [0] : vector<8x8x128xf32> to vector<8x128xf32>
    %684 = vector.shape_cast %683 : vector<8x128xf32> to vector<1x8x128xf32>
    %685 = tpu.reciprocal %684 {approx = true} : vector<1x8x128xf32> -> vector<1x8x128xf32>
    %686 = vector.broadcast %685 : vector<1x8x128xf32> to vector<8x8x128xf32>
    %687 = arith.mulf %682, %686 : vector<8x8x128xf32>
    %688 = arith.mulf %687, %662 : vector<8x8x128xf32>
    %cst_275 = arith.constant dense<0.000000e+00> : vector<8x128xf32>
    %689 = vector.multi_reduction <add>, %688, %cst_275 [0] : vector<8x8x128xf32> to vector<8x128xf32>
    %690 = arith.truncf %689 : vector<8x128xf32> to vector<8x128xbf16>
    %c0_276 = arith.constant 0 : index
    %c0_277 = arith.constant 0 : index
    %691 = vector.load %arg11[%c0_276, %c0_277] : memref<128x20xbf16, #tpu.memory_space<vmem>>, vector<128x20xbf16>
    %cst_278 = arith.constant dense<0.000000e+00> : vector<8x20xf32>
    %692 = tpu.matmul %690, %691, %cst_278 {dimension_numbers = #tpu.dot_dimension_numbers<[1], [0], [0], [1], [0, 0, 1, 1], [], []>} : vector<8x128xbf16>, vector<128x20xbf16>, vector<8x20xf32> -> vector<8x20xf32>
    %c0_279 = arith.constant 0 : index
    %c0_280 = arith.constant 0 : index
    %693 = vector.load %arg12[%c0_279, %c0_280] : memref<1x20xf32, #tpu.memory_space<vmem>>, vector<1x20xf32>
    %694 = vector.broadcast %693 : vector<1x20xf32> to vector<8x20xf32>
    %695 = arith.addf %692, %694 : vector<8x20xf32>
    %696 = arith.truncf %695 : vector<8x20xf32> to vector<8x20xbf16>
    %c0_281 = arith.constant 0 : index
    %c0_282 = arith.constant 0 : index
    %697 = vector.load %arg13[%c0_281, %c0_282] : memref<20x7xbf16, #tpu.memory_space<vmem>>, vector<20x7xbf16>
    %cst_283 = arith.constant dense<0.000000e+00> : vector<8x7xf32>
    %698 = tpu.matmul %696, %697, %cst_283 {dimension_numbers = #tpu.dot_dimension_numbers<[1], [0], [0], [1], [0, 0, 1, 1], [], []>} : vector<8x20xbf16>, vector<20x7xbf16>, vector<8x7xf32> -> vector<8x7xf32>
    %c0_284 = arith.constant 0 : index
    %c0_285 = arith.constant 0 : index
    %699 = vector.load %arg14[%c0_284, %c0_285] : memref<1x7xf32, #tpu.memory_space<vmem>>, vector<1x7xf32>
    %700 = vector.broadcast %699 : vector<1x7xf32> to vector<8x7xf32>
    %701 = arith.addf %698, %700 : vector<8x7xf32>
    %c0_286 = arith.constant 0 : index
    %c0_287 = arith.constant 0 : index
    %702 = vector.load %arg15[%c0_286, %c0_287] : memref<8x7xf32, #tpu.memory_space<vmem>>, vector<8x7xf32>
    tpu.vector_store %arg15[%c0_286, %c0_287], %701 {strides = array<i32>} : memref<8x7xf32, #tpu.memory_space<vmem>>, vector<8x7xf32>,
    return
  }
}

</mosaic_0001>

<bundles_post_ra>
// kernel: lstm_forward.1
= control target key start
LH: loop header
LB: loop body
LE: loop exit
PB: predicated region body
PF: predicated region fallthrough
CT: control target
= control target key end

     0   :  { %vm110_vm0 = vcmask 1043456   ;;  %v12911_v2 = vmov 0   ;;  %vm97_vm1 = vcmask 64512   ;;  %vm9638_vm2 = vmmov 0   ;;  %s12891_s1 = inlined_call_operand.vmem [shape: bf16[8,512], index: 1, kind: input, shape index: {}]   ;;  %s12892_s0 = inlined_call_operand.vmem [shape: f32[8,8,8], index: 0, kind: input, shape index: {}]   ;;  %s12893_s2 = inlined_call_operand.vmem [shape: bf16[128,512], index: 2, kind: input, shape index: {}]   ;;  %s12894_s4 = inlined_call_operand.vmem [shape: bf16[128,512], index: 4, kind: input, shape index: {}]   ;;  %s12895_s5 = inlined_call_operand.vmem [shape: bf16[128,512], index: 5, kind: input, shape index: {}]   ;;  %s12896_s3 = inlined_call_operand.vmem [shape: f32[1,512], index: 3, kind: input, shape index: {}]   ;;  %s12897_s6 = inlined_call_operand.vmem [shape: f32[1,512], index: 6, kind: input, shape index: {}]   ;;  %s12898_s7 = inlined_call_operand.vmem [shape: bf16[128,128], index: 7, kind: input, shape index: {}]   ;;  %s12899_s9 = inlined_call_operand.vmem [shape: bf16[128,128], index: 9, kind: input, shape index: {}]   ;;  %s12900_s8 = inlined_call_operand.vmem [shape: f32[1,128], index: 8, kind: input, shape index: {}]   ;;  %s12901_s11 = inlined_call_operand.vmem [shape: bf16[128,20], index: 11, kind: input, shape index: {}]   ;;  %s12902_s13 = inlined_call_operand.vmem [shape: bf16[20,7], index: 13, kind: input, shape index: {}]   ;;  %s12903_s10 = inlined_call_operand.vmem [shape: f32[1,128], index: 10, kind: input, shape index: {}]   ;;  %s12904_s12 = inlined_call_operand.vmem [shape: f32[1,20], index: 12, kind: input, shape index: {}]   ;;  %s12905_s14 = inlined_call_operand.vmem [shape: f32[1,7], index: 14, kind: input, shape index: {}]   ;;  %s12906_s15 = inlined_call_operand.vmem [shape: f32[8,7], index: 15, kind: output, shape index: {}]  }
   0x1   :  { %v63_v0 = vld [vmem:[%s12891_s1] sm:$0xff]  ;;  %v64_v1 = vld [vmem:[%s12891_s1 + $0x8] sm:$0xff]  ;;  %155 = vmatprep.mubr.bf16.mxu0 %v12911_v2  ;;  %228 = vmatprep.mubr.bf16.mxu1 %v12911_v2  ;;  %v53_v20 = vld [vmem:[%s12892_s0 + $0x10] sm:$0xff]  ;;  %vm7814_vm3 = vcmask 1041408   ;;  %vm7810_vm4 = vcmask 162816   ;;  %vm7858_vm5 = vcmask 56320  }
   0x2   :  { %v51_v3 = vld [vmem:[%s12892_s0] sm:$0xff]  ;;  %v7865_v4 = vcombine.high %v63_v0, %v63_v0  ;;  %v7867_v5 = vcombine.high %v64_v1, %v64_v1  ;;  %v7864_v6 = vcombine.low %v63_v0, %v63_v0  ;;  %v7866_v7 = vcombine.low %v64_v1, %v64_v1  ;;  %v52_v8 = vld [vmem:[%s12892_s0 + $0x8] sm:$0xff]  ;;  %v54_v21 = vld [vmem:[%s12892_s0 + $0x18] sm:$0xff] }
   0x3   :  { %v8798_v9 = vld [vmem:[%s12893_s2 + $0x4] ss:$16 sps:$4 sm:$0xff]   ;;  %v59_v12 = vpack.c.bf16 %v52_v8, %v51_v3  ;;  %v8796_v13 = vld [vmem:[%s12893_s2] ss:$16 sps:$4 sm:$0xff]   ;;  %v8799_v14 = vld [vmem:[%s12893_s2 + $0x8] ss:$16 sps:$4 sm:$0xff]   ;;  %v60_v24 = vpack.c.bf16 %v54_v21, %v53_v20 }
   0x4   :  { %7868 = vmatprep.subr.msk.bf16.mxu0 %vm110_vm0, %v7865_v4  ;;  %7873 = vmatprep.subr.msk.bf16.mxu1 %vm110_vm0, %v7867_v5  ;;  %v112_v10 = vsel %vm110_vm0, %v7864_v6, 0  ;;  %v118_v11 = vsel %vm110_vm0, %v7866_v7, 0  ;;  %v8801_v15 = vld [vmem:[%s12893_s2 + $0xc] ss:$16 sps:$4 sm:$0xff]   ;;  %v8804_v16 = vld [vmem:[%s12893_s2 + $0x24] ss:$16 sps:$4 sm:$0xff]  }
   0x5   :  { %124 = vmatpush1.bf16.msra.mxu0 %v112_v10  ;;  %197 = vmatpush1.bf16.msra.mxu1 %v118_v11  ;;  %v8802_v17 = vld [vmem:[%s12893_s2 + $0x20] ss:$16 sps:$4 sm:$0xff]   ;;  %v8807_v18 = vld [vmem:[%s12893_s2 + $0x2c] ss:$16 sps:$4 sm:$0xff]   ;;  %v8805_v19 = vld [vmem:[%s12893_s2 + $0x28] ss:$16 sps:$4 sm:$0xff]  }
   0x6   :  { %551 = vmatprep.subr.bf16.mxu0 %v8798_v9  ;;  %592 = vmatprep.subr.bf16.mxu1 %v8801_v15  ;;  %v8810_v22 = vld [vmem:[%s12893_s2 + $0x44] ss:$16 sps:$4 sm:$0xff]   ;;  %v8813_v23 = vld [vmem:[%s12893_s2 + $0x4c] ss:$16 sps:$4 sm:$0xff]   ;;  %v8808_v25 = vld [vmem:[%s12893_s2 + $0x40] ss:$16 sps:$4 sm:$0xff]  }
   0x7   :  { %v8811_v26 = vld [vmem:[%s12893_s2 + $0x48] ss:$16 sps:$4 sm:$0xff]   ;;  %v8816_v27 = vld [vmem:[%s12893_s2 + $0x64] ss:$16 sps:$4 sm:$0xff]   ;;  %v8819_v28 = vld [vmem:[%s12893_s2 + $0x6c] ss:$16 sps:$4 sm:$0xff]  }
   0x8   :  { %7869 = vmatmul.mubr.msk.bf16.vlgmr.msra.gmra.mrb[0].mxu0 %vm97_vm1, %v59_v12  ;;  %7874 = vmatmul.mubr.msk.bf16.vlgmr.msra.gmra.mrb[0].mxu1 %vm97_vm1, %v59_v12  ;;  %v8814_v29 = vld [vmem:[%s12893_s2 + $0x60] ss:$16 sps:$4 sm:$0xff]   ;;  %v8817_v30 = vld [vmem:[%s12893_s2 + $0x68] ss:$16 sps:$4 sm:$0xff]   ;;  %v8822_v33 = vld [vmem:[%s12893_s2 + $0x84] ss:$16 sps:$4 sm:$0xff]  }
   0x9   :  { %552 = vmatpush1.bf16.msra.mxu0 %v8796_v13  ;;  %593 = vmatpush1.bf16.msra.mxu1 %v8799_v14  ;;  %v55_v31 = vld [vmem:[%s12892_s0 + $0x20] sm:$0xff]  ;;  %v56_v32 = vld [vmem:[%s12892_s0 + $0x28] sm:$0xff]  ;;  %v57_v42 = vld [vmem:[%s12892_s0 + $0x30] sm:$0xff] }
   0xa   :  { %553 = vmatprep.subr.bf16.mxu0 %v8804_v16  ;;  %594 = vmatprep.subr.bf16.mxu1 %v8807_v18  ;;  %v8825_v34 = vld [vmem:[%s12893_s2 + $0x8c] ss:$16 sps:$4 sm:$0xff]   ;;  %v61_v35 = vpack.c.bf16 %v56_v32, %v55_v31  ;;  %v8820_v36 = vld [vmem:[%s12893_s2 + $0x80] ss:$16 sps:$4 sm:$0xff]   ;;  %v8823_v37 = vld [vmem:[%s12893_s2 + $0x88] ss:$16 sps:$4 sm:$0xff]  }
   0xb   :  { %165 = vmatprep.mubr.bf16.mxu0 %v12911_v2  ;;  %238 = vmatprep.mubr.bf16.mxu1 %v12911_v2  ;;  %v8828_v38 = vld [vmem:[%s12893_s2 + $0xa4] ss:$16 sps:$4 sm:$0xff]   ;;  %v8831_v39 = vld [vmem:[%s12893_s2 + $0xac] ss:$16 sps:$4 sm:$0xff]   ;;  %v8826_v40 = vld [vmem:[%s12893_s2 + $0xa0] ss:$16 sps:$4 sm:$0xff]  }
   0xc   :  { %v8829_v41 = vld [vmem:[%s12893_s2 + $0xa8] ss:$16 sps:$4 sm:$0xff]   ;;  %v8834_v44 = vld [vmem:[%s12893_s2 + $0xc4] ss:$16 sps:$4 sm:$0xff]   ;;  %v8837_v45 = vld [vmem:[%s12893_s2 + $0xcc] ss:$16 sps:$4 sm:$0xff]  }
   0xd   :  { %554 = vmatpush1.bf16.msra.mxu0 %v8802_v17  ;;  %595 = vmatpush1.bf16.msra.mxu1 %v8805_v19  ;;  %v58_v43 = vld [vmem:[%s12892_s0 + $0x38] sm:$0xff]  ;;  %v8832_v46 = vld [vmem:[%s12893_s2 + $0xc0] ss:$16 sps:$4 sm:$0xff]   ;;  %v8840_v49 = vld [vmem:[%s12893_s2 + $0xe4] ss:$16 sps:$4 sm:$0xff]  }
   0xe   :  { %555 = vmatprep.subr.bf16.mxu0 %v8810_v22  ;;  %596 = vmatprep.subr.bf16.mxu1 %v8813_v23  ;;  %v8835_v47 = vld [vmem:[%s12893_s2 + $0xc8] ss:$16 sps:$4 sm:$0xff]   ;;  %v62_v48 = vpack.c.bf16 %v58_v43, %v57_v42  ;;  %v8843_v50 = vld [vmem:[%s12893_s2 + $0xec] ss:$16 sps:$4 sm:$0xff]   ;;  %v8838_v51 = vld [vmem:[%s12893_s2 + $0xe0] ss:$16 sps:$4 sm:$0xff]  }
   0xf   :  { %v8841_v52 = vld [vmem:[%s12893_s2 + $0xe8] ss:$16 sps:$4 sm:$0xff]   ;;  %v8846_v53 = vld [vmem:[%s12894_s4 + $0x4] ss:$16 sps:$4 sm:$0xff]   ;;  %v8844_v54 = vld [vmem:[%s12894_s4] ss:$16 sps:$4 sm:$0xff]  }
  0x10   :  { %7870 = vmatmul.mubr.msk.bf16.gmra.mrb[4].mxu0 %vm97_vm1, %v60_v24  ;;  %7875 = vmatmul.mubr.msk.bf16.gmra.mrb[4].mxu1 %vm97_vm1, %v60_v24  ;;  %v8847_v55 = vld [vmem:[%s12894_s4 + $0x8] ss:$16 sps:$4 sm:$0xff]   ;;  %v8849_v56 = vld [vmem:[%s12894_s4 + $0xc] ss:$16 sps:$4 sm:$0xff]   ;;  %v8852_v57 = vld [vmem:[%s12894_s4 + $0x24] ss:$16 sps:$4 sm:$0xff]   ;;  %v67_v24 = vlaneseq }
  0x11   :  { %556 = vmatpush1.bf16.msra.mxu0 %v8808_v25  ;;  %597 = vmatpush1.bf16.msra.mxu1 %v8811_v26  ;;  %v8855_v58 = vld [vmem:[%s12894_s4 + $0x2c] ss:$16 sps:$4 sm:$0xff]   ;;  %v8850_v59 = vld [vmem:[%s12894_s4 + $0x20] ss:$16 sps:$4 sm:$0xff]   ;;  %v8853_v60 = vld [vmem:[%s12894_s4 + $0x28] ss:$16 sps:$4 sm:$0xff]  }
  0x12   :  { %557 = vmatprep.subr.bf16.mxu0 %v8816_v27  ;;  %598 = vmatprep.subr.bf16.mxu1 %v8819_v28  ;;  %v8858_v61 = vld [vmem:[%s12894_s4 + $0x44] ss:$16 sps:$4 sm:$0xff]   ;;  %v8861_v62 = vld [vmem:[%s12894_s4 + $0x4c] ss:$16 sps:$4 sm:$0xff]   ;;  %v8856_v63 = vld [vmem:[%s12894_s4 + $0x40] ss:$16 sps:$4 sm:$0xff]  }
  0x13   :  { %175 = vmatprep.mubr.bf16.mxu0 %v12911_v2  ;;  %248 = vmatprep.mubr.bf16.mxu1 %v12911_v2  ;;  %v8859_v0 = vld [vmem:[%s12894_s4 + $0x48] ss:$16 sps:$4 sm:$0xff]   ;;  %v9906_v1 = vld [vmem:[%s12894_s4 + $0x64] ss:$16 sps:$4 sm:$0xff]   ;;  %v9911_v3 = vld [vmem:[%s12894_s4 + $0x6c] ss:$16 sps:$4 sm:$0xff]  }
  0x14   :  { %v9916_v4 = vld [vmem:[%s12894_s4 + $0x60] ss:$16 sps:$4 sm:$0xff]   ;;  %v9921_v5 = vld [vmem:[%s12894_s4 + $0x68] ss:$16 sps:$4 sm:$0xff]   ;;  %v9929_v6 = vld [vmem:[%s12894_s4 + $0x84] ss:$16 sps:$4 sm:$0xff]  }
  0x15   :  { %558 = vmatpush1.bf16.msra.mxu0 %v8814_v29  ;;  %599 = vmatpush1.bf16.msra.mxu1 %v8817_v30  ;;  %v9934_v7 = vld [vmem:[%s12894_s4 + $0x8c] ss:$16 sps:$4 sm:$0xff]   ;;  %v9940_v8 = vld [vmem:[%s12894_s4 + $0x80] ss:$16 sps:$4 sm:$0xff]   ;;  %v9945_v9 = vld [vmem:[%s12894_s4 + $0x88] ss:$16 sps:$4 sm:$0xff]  }
  0x16   :  { %559 = vmatprep.subr.bf16.mxu0 %v8822_v33  ;;  %600 = vmatprep.subr.bf16.mxu1 %v8825_v34  ;;  %v9953_v10 = vld [vmem:[%s12894_s4 + $0xa4] ss:$16 sps:$4 sm:$0xff]   ;;  %v9958_v11 = vld [vmem:[%s12894_s4 + $0xac] ss:$16 sps:$4 sm:$0xff]   ;;  %v9964_v12 = vld [vmem:[%s12894_s4 + $0xa0] ss:$16 sps:$4 sm:$0xff]  }
  0x17   :  { %v9969_v13 = vld [vmem:[%s12894_s4 + $0xa8] ss:$16 sps:$4 sm:$0xff]   ;;  %v9977_v14 = vld [vmem:[%s12894_s4 + $0xc4] ss:$16 sps:$4 sm:$0xff]   ;;  %v9982_v15 = vld [vmem:[%s12894_s4 + $0xcc] ss:$16 sps:$4 sm:$0xff]  }
  0x18   :  { %7871 = vmatmul.mubr.msk.bf16.gmra.mrb[8].mxu0 %vm97_vm1, %v61_v35  ;;  %7876 = vmatmul.mubr.msk.bf16.gmra.mrb[8].mxu1 %vm97_vm1, %v61_v35  ;;  %v9988_v16 = vld [vmem:[%s12894_s4 + $0xc0] ss:$16 sps:$4 sm:$0xff]   ;;  %v9993_v17 = vld [vmem:[%s12894_s4 + $0xc8] ss:$16 sps:$4 sm:$0xff]   ;;  %v10001_v18 = vld [vmem:[%s12894_s4 + $0xe4] ss:$16 sps:$4 sm:$0xff]  }
  0x19   :  { %560 = vmatpush1.bf16.msra.mxu0 %v8820_v36  ;;  %601 = vmatpush1.bf16.msra.mxu1 %v8823_v37  ;;  %v10006_v19 = vld [vmem:[%s12894_s4 + $0xec] ss:$16 sps:$4 sm:$0xff]   ;;  %v10012_v20 = vld [vmem:[%s12894_s4 + $0xe0] ss:$16 sps:$4 sm:$0xff]   ;;  %v10017_v21 = vld [vmem:[%s12894_s4 + $0xe8] ss:$16 sps:$4 sm:$0xff]  }
  0x1a   :  { %561 = vmatprep.subr.bf16.mxu0 %v8828_v38  ;;  %602 = vmatprep.subr.bf16.mxu1 %v8831_v39  ;;  %v10026_v22 = vld [vmem:[%s12895_s5 + $0x4] ss:$16 sps:$4 sm:$0xff]   ;;  %v10031_v23 = vld [vmem:[%s12895_s5 + $0xc] ss:$16 sps:$4 sm:$0xff]   ;;  %v10035_v25 = vshrl.u32 %v67_v24, 7 }
  0x1b   :  { %185 = vmatprep.mubr.bf16.mxu0 %v12911_v2  ;;  %258 = vmatprep.mubr.bf16.mxu1 %v12911_v2  ;;  %v65_v27 = vld [vmem:[%s12896_s3] sm:$0xf] }
  0x1c   :  { %v12908_v26 = vsub.s32 2, %v10035_v25  ;;  %v12907_v28 = vsub.s32 3, %v10035_v25  ;;  %v12910_v29 = vsub.s32 0, %v10035_v25  ;;  %v12909_v30 = vsub.s32 1, %v10035_v25 }
  0x1d   :  { %562 = vmatpush1.bf16.msra.mxu0 %v8826_v40  ;;  %603 = vmatpush1.bf16.msra.mxu1 %v8829_v41 }
  0x1e   :  { %563 = vmatprep.subr.bf16.mxu0 %v8834_v44  ;;  %604 = vmatprep.subr.bf16.mxu1 %v8837_v45  ;;  %v10046_v31 = vrot.slane %v65_v27, %v12908_v26  ;;  %v10054_v34 = vrot.slane %v65_v27, %v12907_v28  ;;  %v70_v35 = vrot.slane %v65_v27, %v12910_v29 }
  0x1f   :  { %v74_v38 = vrot.slane %v65_v27, %v12909_v30 }
  0x20   :  { %7872 = vmatmul.mubr.msk.bf16.gmra.mrb[12].mxu0 %vm97_vm1, %v62_v48  ;;  %7877 = vmatmul.mubr.msk.bf16.gmra.mrb[12].mxu1 %vm97_vm1, %v62_v48 }
  0x21   :  { %564 = vmatpush1.bf16.msra.mxu0 %v8832_v46  ;;  %605 = vmatpush1.bf16.msra.mxu1 %v8835_v47 }
  0x22   :  { %565 = vmatprep.subr.bf16.mxu0 %v8840_v49  ;;  %606 = vmatprep.subr.bf16.mxu1 %v8843_v50 }
  0x23   :  { %583 = vmatprep.mubr.bf16.mxu0 %v12911_v2  ;;  %624 = vmatprep.mubr.bf16.mxu1 %v12911_v2 }
  0x25   :  { %566 = vmatpush1.bf16.msra.mxu0 %v8838_v51  ;;  %607 = vmatpush1.bf16.msra.mxu1 %v8841_v52 }
  0x26   :  { %848 = vmatprep.subr.bf16.mxu0 %v8846_v53  ;;  %889 = vmatprep.subr.bf16.mxu1 %v8849_v56 }
  0x28   :  { %584 = vmatmul.mubr.bf16.vlgmr.msra.gmra.mrb[16].mxu0 %v12911_v2  ;;  %625 = vmatmul.mubr.bf16.vlgmr.msra.gmra.mrb[16].mxu1 %v12911_v2 }
  0x29   :  { %880 = vmatprep.mubr.bf16.mxu0 %v12911_v2  ;;  %921 = vmatprep.mubr.bf16.mxu1 %v12911_v2 }
  0x2a   :  { %849 = vmatpush1.bf16.msra.mxu0 %v8844_v54  ;;  %890 = vmatpush1.bf16.msra.mxu1 %v8847_v55 }
  0x2b   :  { %850 = vmatprep.subr.bf16.mxu0 %v8852_v57  ;;  %891 = vmatprep.subr.bf16.mxu1 %v8855_v58 }
  0x2e   :  { %851 = vmatpush1.bf16.msra.mxu0 %v8850_v59  ;;  %892 = vmatpush1.bf16.msra.mxu1 %v8853_v60 }
  0x2f   :  { %852 = vmatprep.subr.bf16.mxu0 %v8858_v61  ;;  %893 = vmatprep.subr.bf16.mxu1 %v8861_v62 }
  0x32   :  { %853 = vmatpush1.bf16.msra.mxu0 %v8856_v63  ;;  %894 = vmatpush1.bf16.msra.mxu1 %v8859_v0 }
  0x33   :  { %854 = vmatprep.subr.bf16.mxu0 %v9906_v1  ;;  %895 = vmatprep.subr.bf16.mxu1 %v9911_v3 }
  0x36   :  { %855 = vmatpush1.bf16.msra.mxu0 %v9916_v4  ;;  %896 = vmatpush1.bf16.msra.mxu1 %v9921_v5 }
  0x37   :  { %856 = vmatprep.subr.bf16.mxu0 %v9929_v6  ;;  %897 = vmatprep.subr.bf16.mxu1 %v9934_v7 }
  0x3a   :  { %857 = vmatpush1.bf16.msra.mxu0 %v9940_v8  ;;  %898 = vmatpush1.bf16.msra.mxu1 %v9945_v9 }
  0x3b   :  { %858 = vmatprep.subr.bf16.mxu0 %v9953_v10  ;;  %899 = vmatprep.subr.bf16.mxu1 %v9958_v11 }
  0x3e   :  { %859 = vmatpush1.bf16.msra.mxu0 %v9964_v12  ;;  %900 = vmatpush1.bf16.msra.mxu1 %v9969_v13 }
  0x3f   :  { %860 = vmatprep.subr.bf16.mxu0 %v9977_v14  ;;  %901 = vmatprep.subr.bf16.mxu1 %v9982_v15 }
  0x42   :  { %861 = vmatpush1.bf16.msra.mxu0 %v9988_v16  ;;  %902 = vmatpush1.bf16.msra.mxu1 %v9993_v17 }
  0x43   :  { %862 = vmatprep.subr.bf16.mxu0 %v10001_v18  ;;  %903 = vmatprep.subr.bf16.mxu1 %v10006_v19 }
  0x46   :  { %863 = vmatpush1.bf16.msra.mxu0 %v10012_v20  ;;  %904 = vmatpush1.bf16.msra.mxu1 %v10017_v21 }
  0x47   :  { %1090 = vmatprep.subr.bf16.mxu0 %v10026_v22  ;;  %1131 = vmatprep.subr.bf16.mxu1 %v10031_v23 }
  0xdb   :  { %v10048_v32 = vpop.f32.mrb[0].mxu0  ;;  %v10050_v33 = vpop.f32.mrb[0].mxu1 }
  0xdc   :  { %v159_v36 = vpop.f32.mrb[1].mxu0  ;;  %v232_v37 = vpop.f32.mrb[1].mxu1 }
  0xdd   :  { %v161_v39 = vpop.f32.mrb[2].mxu0  ;;  %v234_v40 = vpop.f32.mrb[2].mxu1 }
  0xde   :  { %v10060_v41 = vadd.f32 %v161_v39, %v70_v35  ;;  %v163_v42 = vpop.f32.mrb[3].mxu0  ;;  %v10063_v43 = vadd.f32 %v234_v40, %v10046_v31  ;;  %v236_v44 = vpop.f32.mrb[3].mxu1 }
  0xdf   :  { %v10065_v45 = vadd.f32 %v163_v42, %v74_v38  ;;  %v10068_v46 = vadd.f32 %v236_v44, %v10054_v34 }
  0xe3   :  { %v167_v47 = vpop.f32.mrb[4].mxu0  ;;  %v240_v48 = vpop.f32.mrb[4].mxu1 }
  0xe4   :  { %v10070_v49 = vadd.f32 %v167_v47, %v70_v35  ;;  %v169_v50 = vpop.f32.mrb[5].mxu0  ;;  %v10073_v51 = vadd.f32 %v240_v48, %v10046_v31  ;;  %v242_v52 = vpop.f32.mrb[5].mxu1 }
  0xe5   :  { %v10075_v53 = vadd.f32 %v169_v50, %v74_v38  ;;  %v171_v54 = vpop.f32.mrb[6].mxu0  ;;  %v10078_v55 = vadd.f32 %v242_v52, %v10054_v34  ;;  %v244_v56 = vpop.f32.mrb[6].mxu1 }
  0xe6   :  { %13057 = vst [vmem:[#allocation4_spill] sm:$0xff] %v10070_v49  ;;  %13058 = vst [vmem:[#allocation5_spill] sm:$0xff] %v10073_v51  ;;  %v10080_v57 = vadd.f32 %v171_v54, %v70_v35  ;;  %v173_v58 = vpop.f32.mrb[7].mxu0  ;;  %v10083_v59 = vadd.f32 %v244_v56, %v10046_v31  ;;  %v246_v60 = vpop.f32.mrb[7].mxu1  ;;  %v9594_v51 = vld [vmem:[%s12893_s2] ss:$16 sps:$4 sm:$0xff]  }
  0xe7   :  { %13059 = vst [vmem:[#allocation6_spill] sm:$0xff] %v10075_v53  ;;  %13060 = vst [vmem:[#allocation7_spill] sm:$0xff] %v10078_v55  ;;  %v10085_v61 = vadd.f32 %v173_v58, %v74_v38  ;;  %v10088_v62 = vadd.f32 %v246_v60, %v10054_v34  ;;  %v9592_v55 = vld [vmem:[%s12893_s2 + $0x4] ss:$16 sps:$4 sm:$0xff]   ;;  %v9593_v53 = vld [vmem:[%s12893_s2 + $0xc] ss:$16 sps:$4 sm:$0xff]  }
  0xe8   :  { %13061 = vst [vmem:[#allocation8_spill] sm:$0xff] %v10080_v57  ;;  %13062 = vst [vmem:[#allocation9_spill] sm:$0xff] %v10083_v59  ;;  %v10312_v59 = vld [vmem:[%s12895_s5 + $0xe0] ss:$16 sps:$4 sm:$0xff]   ;;  %v10317_v57 = vld [vmem:[%s12895_s5 + $0xe8] ss:$16 sps:$4 sm:$0xff]  }
  0xe9   :  { %13063 = vst [vmem:[#allocation10_spill] sm:$0xff] %v10085_v61  ;;  %13064 = vst [vmem:[#allocation11_spill] sm:$0xff] %v10088_v62  ;;  %v10300_v62 = vld [vmem:[%s12895_s5 + $0xe4] ss:$16 sps:$4 sm:$0xff]   ;;  %v10305_v61 = vld [vmem:[%s12895_s5 + $0xec] ss:$16 sps:$4 sm:$0xff]  }
  0xea   :  { %13082 = vst [vmem:[#allocation28_spill] sm:$0xff] %v10317_v57  ;;  %v9595_v49 = vld [vmem:[%s12893_s2 + $0x8] ss:$16 sps:$4 sm:$0xff]  }
  0xeb   :  { %v177_v63 = vpop.f32.mrb[8].mxu0  ;;  %v250_v0 = vpop.f32.mrb[8].mxu1 }
  0xec   :  { %v10090_v24 = vadd.f32 %v177_v63, %v70_v35  ;;  %v179_v27 = vpop.f32.mrb[9].mxu0  ;;  %v10093_v39 = vadd.f32 %v250_v0, %v10046_v31  ;;  %v252_v40 = vpop.f32.mrb[9].mxu1 }
  0xed   :  { %v10095_v42 = vadd.f32 %v179_v27, %v74_v38  ;;  %v181_v44 = vpop.f32.mrb[10].mxu0  ;;  %v10098_v47 = vadd.f32 %v252_v40, %v10054_v34  ;;  %v254_v48 = vpop.f32.mrb[10].mxu1 }
  0xee   :  { %13065 = vst [vmem:[#allocation12_spill] sm:$0xff] %v10090_v24  ;;  %13066 = vst [vmem:[#allocation13_spill] sm:$0xff] %v10093_v39  ;;  %v10100_v50 = vadd.f32 %v181_v44, %v70_v35  ;;  %v183_v52 = vpop.f32.mrb[11].mxu0  ;;  %v10103_v54 = vadd.f32 %v254_v48, %v10046_v31  ;;  %v256_v56 = vpop.f32.mrb[11].mxu1  ;;  %v10288_v39 = vld [vmem:[%s12895_s5 + $0xc0] ss:$16 sps:$4 sm:$0xff]  }
  0xef   :  { %13067 = vst [vmem:[#allocation14_spill] sm:$0xff] %v10095_v42  ;;  %13068 = vst [vmem:[#allocation15_spill] sm:$0xff] %v10098_v47  ;;  %v10105_v58 = vadd.f32 %v183_v52, %v74_v38  ;;  %v10108_v60 = vadd.f32 %v256_v56, %v10054_v34  ;;  %v10276_v47 = vld [vmem:[%s12895_s5 + $0xc4] ss:$16 sps:$4 sm:$0xff]   ;;  %v10281_v42 = vld [vmem:[%s12895_s5 + $0xcc] ss:$16 sps:$4 sm:$0xff]  }
  0xf0   :  { %13069 = vst [vmem:[#allocation16_spill] sm:$0xff] %v10100_v50  ;;  %13070 = vst [vmem:[#allocation17_spill] sm:$0xff] %v10103_v54  ;;  %v10293_v24 = vld [vmem:[%s12895_s5 + $0xc8] ss:$16 sps:$4 sm:$0xff]  }
  0xf1   :  { %13071 = vst [vmem:[#allocation18_spill] sm:$0xff] %v10105_v58  ;;  %13072 = vst [vmem:[#allocation19_spill] sm:$0xff] %v10108_v60 }
  0xf3   :  { %v187_v63 = vpop.f32.mrb[12].mxu0  ;;  %v260_v0 = vpop.f32.mrb[12].mxu1 }
  0xf4   :  { %v10110_v27 = vadd.f32 %v187_v63, %v70_v35  ;;  %v189_v28 = vpop.f32.mrb[13].mxu0  ;;  %v10113_v40 = vadd.f32 %v260_v0, %v10046_v31  ;;  %v262_v44 = vpop.f32.mrb[13].mxu1 }
  0xf5   :  { %v10115_v26 = vadd.f32 %v189_v28, %v74_v38  ;;  %v191_v30 = vpop.f32.mrb[14].mxu0  ;;  %v10118_v48 = vadd.f32 %v262_v44, %v10054_v34  ;;  %v264_v52 = vpop.f32.mrb[14].mxu1  ;;  %v158_v28 = vadd.f32 %v10048_v32, %v70_v35  ;;  %v160_v44 = vadd.f32 %v159_v36, %v74_v38 }
  0xf6   :  { %13073 = vst [vmem:[#allocation20_spill] sm:$0xff] %v10110_v27  ;;  %13074 = vst [vmem:[#allocation21_spill] sm:$0xff] %v10113_v40  ;;  %v10120_v29 = vadd.f32 %v191_v30, %v70_v35  ;;  %v193_v56 = vpop.f32.mrb[15].mxu0  ;;  %v10123_v2 = vadd.f32 %v264_v52, %v10046_v31  ;;  %v266_v63 = vpop.f32.mrb[15].mxu1 }
  0xf7   :  { %13075 = vst [vmem:[#allocation22_spill] sm:$0xff] %v10115_v26  ;;  %13076 = vst [vmem:[#allocation23_spill] sm:$0xff] %v10118_v48  ;;  %v10125_v27 = vadd.f32 %v193_v56, %v74_v38  ;;  %v10128_v0 = vadd.f32 %v266_v63, %v10054_v34  ;;  %v231_v26 = vadd.f32 %v10050_v33, %v10046_v31 }
  0xf8   :  { %13077 = vst [vmem:[#allocation24_spill] sm:$0xff] %v10120_v29  ;;  %13078 = vst [vmem:[#allocation25_spill] sm:$0xff] %v10123_v2  ;;  %v233_v48 = vadd.f32 %v232_v37, %v10054_v34 }
  0xf9   :  { %13079 = vst [vmem:[#allocation26_spill] sm:$0xff] %v10125_v27  ;;  %13080 = vst [vmem:[#allocation27_spill] sm:$0xff] %v10128_v0 }
  0xfb   :  { %v585_v30 = vpop.f32.mrb[16].mxu0  ;;  %v626_v29 = vpop.f32.mrb[16].mxu1 }
  0xfc   :  { %v633_v40 = vadd.f32 %v585_v30, %v158_v28  ;;  %v635_v60 = vadd.f32 %v626_v29, %v231_v26  ;;  %v587_v52 = vpop.f32.mrb[17].mxu0  ;;  %v628_v2 = vpop.f32.mrb[17].mxu1  ;;  %v10157_v30 = vld [vmem:[%s12895_s5 + $0x2c] ss:$16 sps:$4 sm:$0xff]  }
  0xfd   :  { %v634_v58 = vadd.f32 %v587_v52, %v160_v44  ;;  %v636_v56 = vadd.f32 %v628_v2, %v233_v48  ;;  %v589_v27 = vpop.f32.mrb[18].mxu0  ;;  %v630_v54 = vpop.f32.mrb[18].mxu1  ;;  %v10140_v48 = vld [vmem:[%s12895_s5] ss:$16 sps:$4 sm:$0xff]   ;;  %v10152_v44 = vld [vmem:[%s12895_s5 + $0x24] ss:$16 sps:$4 sm:$0xff]  }
  0xfe   :  { %v637_v63 = vmul.f32 0.5, %v633_v40  ;;  %v590_v0 = vpop.f32.mrb[19].mxu0  ;;  %v631_v50 = vpop.f32.mrb[19].mxu1  ;;  %v10166_v52 = vld [vmem:[%s12895_s5 + $0x20] ss:$16 sps:$4 sm:$0xff]  }
  0xff   :  { %v641_v32 = vmul.f32 0.5, %v634_v58  ;;  %v646_v31 = vmul.f32 0.5, %v636_v56  ;;  %v10145_v0 = vld [vmem:[%s12895_s5 + $0x8] ss:$16 sps:$4 sm:$0xff]  }
 0x100   :  { %9398 = vtanh.f32 %v637_v63  ;;  %v10171_v56 = vld [vmem:[%s12895_s5 + $0x28] ss:$16 sps:$4 sm:$0xff]   ;;  %v10178_v63 = vld [vmem:[%s12895_s5 + $0x44] ss:$16 sps:$4 sm:$0xff]  }
 0x101   :  { %9400 = vtanh.f32 %v641_v32  ;;  %v10183_v32 = vld [vmem:[%s12895_s5 + $0x4c] ss:$16 sps:$4 sm:$0xff]  }
 0x102   :  { %9402 = vtanh.f32 %v635_v60 }
 0x103   :  { %9404 = vtanh.f32 %v646_v31  ;;  %v13081_v31 = vmov 0  }
 0x10a   :  { %v9399_v33 = vpop.eup %9398 }
 0x10b   :  { %v9401_v34 = vpop.eup %9400  ;;  %v639_v35 = vmul.f32 0.5, %v9399_v33  ;;  %v10192_v33 = vld [vmem:[%s12895_s5 + $0x40] ss:$16 sps:$4 sm:$0xff]  }
 0x10c   :  { %v643_v36 = vmul.f32 0.5, %v9401_v34  ;;  %v9403_v29 = vpop.eup %9402  ;;  %v10197_v34 = vld [vmem:[%s12895_s5 + $0x48] ss:$16 sps:$4 sm:$0xff]  }
 0x10d   :  { %v640_v26 = vadd.f32 0.5, %v639_v35  ;;  %v9405_v50 = vpop.eup %9404  ;;  %v10204_v35 = vld [vmem:[%s12895_s5 + $0x64] ss:$16 sps:$4 sm:$0xff]  }
 0x10e   :  { %v644_v37 = vadd.f32 0.5, %v643_v36  ;;  %v648_v54 = vmul.f32 0.5, %v9405_v50  ;;  %v10209_v36 = vld [vmem:[%s12895_s5 + $0x6c] ss:$16 sps:$4 sm:$0xff]   ;;  %v10245_v50 = vld [vmem:[%s12895_s5 + $0x88] ss:$16 sps:$4 sm:$0xff]  }
 0x10f   :  { %v651_v38 = vmul.f32 %v9403_v29, %v640_v26  ;;  %v10216_v26 = vld [vmem:[%s12895_s5 + $0x60] ss:$16 sps:$4 sm:$0xff]   ;;  %v10221_v29 = vld [vmem:[%s12895_s5 + $0x68] ss:$16 sps:$4 sm:$0xff]  }
 0x110   :  { %v650_v2 = vmul.f32 0.0, %v644_v37  ;;  %v649_v58 = vadd.f32 0.5, %v648_v54  ;;  %v10228_v37 = vld [vmem:[%s12895_s5 + $0x84] ss:$16 sps:$4 sm:$0xff]  }
 0x111   :  { %v10252_v54 = vld [vmem:[%s12895_s5 + $0xa4] ss:$16 sps:$4 sm:$0xff]  }
 0x112   :  { %v10134_v27 = vadd.f32 %v651_v38, %v650_v2  ;;  %v10233_v38 = vld [vmem:[%s12895_s5 + $0x8c] ss:$16 sps:$4 sm:$0xff]   ;;  %v10240_v2 = vld [vmem:[%s12895_s5 + $0x80] ss:$16 sps:$4 sm:$0xff]  }
 0x114   :  { %9406 = vtanh.f32 %v10134_v27 }
 0x11e   :  { %v9407_v40 = vpop.eup %9406 }
 0x11f   :  { %v654_v60 = vmul.f32 %v9407_v40, %v649_v58  ;;  %v10257_v58 = vld [vmem:[%s12895_s5 + $0xac] ss:$16 sps:$4 sm:$0xff]   ;;  %v10264_v40 = vld [vmem:[%s12895_s5 + $0xa0] ss:$16 sps:$4 sm:$0xff]  }
 0x121   :  { %v10147_v28 = vpack.c.bf16 %v654_v60, %v654_v60  ;;  %v10269_v60 = vld [vmem:[%s12895_s5 + $0xa8] ss:$16 sps:$4 sm:$0xff]  }
 0x123   :  { %881 = vmatmul.mubr.bf16.vlgmr.msra.gmra.mrb[20].mxu0 %v10147_v28  ;;  %922 = vmatmul.mubr.bf16.vlgmr.msra.gmra.mrb[20].mxu1 %v10147_v28 }
 0x124   :  { %1091 = vmatpush1.bf16.msra.mxu0 %v10140_v48  ;;  %1132 = vmatpush1.bf16.msra.mxu1 %v10145_v0 }
 0x125   :  { %1092 = vmatprep.subr.bf16.mxu0 %v10152_v44  ;;  %1133 = vmatprep.subr.bf16.mxu1 %v10157_v30 }
 0x126   :  { %1122 = vmatprep.mubr.bf16.mxu0 %v13081_v31  ;;  %1163 = vmatprep.mubr.bf16.mxu1 %v13081_v31 }
 0x128   :  { %1093 = vmatpush1.bf16.msra.mxu0 %v10166_v52  ;;  %1134 = vmatpush1.bf16.msra.mxu1 %v10171_v56 }
 0x129   :  { %1094 = vmatprep.subr.bf16.mxu0 %v10178_v63  ;;  %1135 = vmatprep.subr.bf16.mxu1 %v10183_v32 }
 0x12c   :  { %1095 = vmatpush1.bf16.msra.mxu0 %v10192_v33  ;;  %1136 = vmatpush1.bf16.msra.mxu1 %v10197_v34 }
 0x12d   :  { %1096 = vmatprep.subr.bf16.mxu0 %v10204_v35  ;;  %1137 = vmatprep.subr.bf16.mxu1 %v10209_v36 }
 0x130   :  { %1097 = vmatpush1.bf16.msra.mxu0 %v10216_v26  ;;  %1138 = vmatpush1.bf16.msra.mxu1 %v10221_v29 }
 0x131   :  { %1098 = vmatprep.subr.bf16.mxu0 %v10228_v37  ;;  %1139 = vmatprep.subr.bf16.mxu1 %v10233_v38 }
 0x134   :  { %1099 = vmatpush1.bf16.msra.mxu0 %v10240_v2  ;;  %1140 = vmatpush1.bf16.msra.mxu1 %v10245_v50 }
 0x135   :  { %1100 = vmatprep.subr.bf16.mxu0 %v10252_v54  ;;  %1141 = vmatprep.subr.bf16.mxu1 %v10257_v58 }
 0x138   :  { %1101 = vmatpush1.bf16.msra.mxu0 %v10264_v40  ;;  %1142 = vmatpush1.bf16.msra.mxu1 %v10269_v60 }
 0x139   :  { %1102 = vmatprep.subr.bf16.mxu0 %v10276_v47  ;;  %1143 = vmatprep.subr.bf16.mxu1 %v10281_v42 }
 0x13c   :  { %1103 = vmatpush1.bf16.msra.mxu0 %v10288_v39  ;;  %1144 = vmatpush1.bf16.msra.mxu1 %v10293_v24 }
 0x13d   :  { %1104 = vmatprep.subr.bf16.mxu0 %v10300_v62  ;;  %1145 = vmatprep.subr.bf16.mxu1 %v10305_v61 }
 0x140   :  { %1105 = vmatpush1.bf16.msra.mxu0 %v10312_v59  ;;  %1146 = vmatpush1.bf16.msra.mxu1 %v10317_v57  ;;  %v9602_v57 = vld [vmem:[%s12893_s2 + $0x40] ss:$16 sps:$4 sm:$0xff]  }
 0x141   :  { %1425 = vmatprep.subr.bf16.mxu0 %v9592_v55  ;;  %1466 = vmatprep.subr.bf16.mxu1 %v9593_v53  ;;  %v9596_v55 = vld [vmem:[%s12893_s2 + $0x24] ss:$16 sps:$4 sm:$0xff]   ;;  %v9597_v53 = vld [vmem:[%s12893_s2 + $0x2c] ss:$16 sps:$4 sm:$0xff]  }
 0x143   :  { %1123 = vmatmul.mubr.bf16.vlgmr.msra.gmra.mrb[24].mxu0 %v13081_v31  ;;  %1164 = vmatmul.mubr.bf16.vlgmr.msra.gmra.mrb[24].mxu1 %v13081_v31 }
 0x144   :  { %1426 = vmatpush1.bf16.msra.mxu0 %v9594_v51  ;;  %1467 = vmatpush1.bf16.msra.mxu1 %v9595_v49  ;;  %v9598_v51 = vld [vmem:[%s12893_s2 + $0x20] ss:$16 sps:$4 sm:$0xff]   ;;  %v9599_v49 = vld [vmem:[%s12893_s2 + $0x28] ss:$16 sps:$4 sm:$0xff]  }
 0x145   :  { %1427 = vmatprep.subr.bf16.mxu0 %v9596_v55  ;;  %1468 = vmatprep.subr.bf16.mxu1 %v9597_v53  ;;  %v9600_v55 = vld [vmem:[%s12893_s2 + $0x44] ss:$16 sps:$4 sm:$0xff]   ;;  %v9601_v53 = vld [vmem:[%s12893_s2 + $0x4c] ss:$16 sps:$4 sm:$0xff]  }
 0x146   :  { %1457 = vmatprep.mubr.bf16.mxu0 %v13081_v31  ;;  %1498 = vmatprep.mubr.bf16.mxu1 %v13081_v31 }
 0x148   :  { %1428 = vmatpush1.bf16.msra.mxu0 %v9598_v51  ;;  %1469 = vmatpush1.bf16.msra.mxu1 %v9599_v49  ;;  %v9603_v51 = vld [vmem:[%s12893_s2 + $0x48] ss:$16 sps:$4 sm:$0xff]   ;;  %v9604_v49 = vld [vmem:[%s12893_s2 + $0x64] ss:$16 sps:$4 sm:$0xff]  }
 0x149   :  { %1429 = vmatprep.subr.bf16.mxu0 %v9600_v55  ;;  %1470 = vmatprep.subr.bf16.mxu1 %v9601_v53  ;;  %v9605_v55 = vld [vmem:[%s12893_s2 + $0x6c] ss:$16 sps:$4 sm:$0xff]   ;;  %v9606_v53 = vld [vmem:[%s12893_s2 + $0x60] ss:$16 sps:$4 sm:$0xff]  }
 0x14c   :  { %1430 = vmatpush1.bf16.msra.mxu0 %v9602_v57  ;;  %1471 = vmatpush1.bf16.msra.mxu1 %v9603_v51  ;;  %v9607_v57 = vld [vmem:[%s12893_s2 + $0x68] ss:$16 sps:$4 sm:$0xff]   ;;  %v9608_v51 = vld [vmem:[%s12893_s2 + $0x84] ss:$16 sps:$4 sm:$0xff]  }
 0x14d   :  { %1431 = vmatprep.subr.bf16.mxu0 %v9604_v49  ;;  %1472 = vmatprep.subr.bf16.mxu1 %v9605_v55  ;;  %v9609_v49 = vld [vmem:[%s12893_s2 + $0x8c] ss:$16 sps:$4 sm:$0xff]   ;;  %v9610_v55 = vld [vmem:[%s12893_s2 + $0x80] ss:$16 sps:$4 sm:$0xff]  }
 0x150   :  { %1432 = vmatpush1.bf16.msra.mxu0 %v9606_v53  ;;  %1473 = vmatpush1.bf16.msra.mxu1 %v9607_v57  ;;  %v9611_v53 = vld [vmem:[%s12893_s2 + $0x88] ss:$16 sps:$4 sm:$0xff]   ;;  %v9612_v57 = vld [vmem:[%s12893_s2 + $0xa4] ss:$16 sps:$4 sm:$0xff]  }
 0x151   :  { %1433 = vmatprep.subr.bf16.mxu0 %v9608_v51  ;;  %1474 = vmatprep.subr.bf16.mxu1 %v9609_v49  ;;  %v9613_v51 = vld [vmem:[%s12893_s2 + $0xac] ss:$16 sps:$4 sm:$0xff]   ;;  %v9614_v49 = vld [vmem:[%s12893_s2 + $0xa0] ss:$16 sps:$4 sm:$0xff]  }
 0x154   :  { %1434 = vmatpush1.bf16.msra.mxu0 %v9610_v55  ;;  %1475 = vmatpush1.bf16.msra.mxu1 %v9611_v53  ;;  %v9615_v55 = vld [vmem:[%s12893_s2 + $0xa8] ss:$16 sps:$4 sm:$0xff]   ;;  %v9616_v53 = vld [vmem:[%s12893_s2 + $0xc4] ss:$16 sps:$4 sm:$0xff]  }
 0x155   :  { %1435 = vmatprep.subr.bf16.mxu0 %v9612_v57  ;;  %1476 = vmatprep.subr.bf16.mxu1 %v9613_v51  ;;  %v9617_v57 = vld [vmem:[%s12893_s2 + $0xcc] ss:$16 sps:$4 sm:$0xff]   ;;  %v9618_v51 = vld [vmem:[%s12893_s2 + $0xc0] ss:$16 sps:$4 sm:$0xff]  }
 0x158   :  { %1436 = vmatpush1.bf16.msra.mxu0 %v9614_v49  ;;  %1477 = vmatpush1.bf16.msra.mxu1 %v9615_v55  ;;  %v9619_v49 = vld [vmem:[%s12893_s2 + $0xc8] ss:$16 sps:$4 sm:$0xff]   ;;  %v9620_v55 = vld [vmem:[%s12893_s2 + $0xe4] ss:$16 sps:$4 sm:$0xff]  }
 0x159   :  { %1437 = vmatprep.subr.bf16.mxu0 %v9616_v53  ;;  %1478 = vmatprep.subr.bf16.mxu1 %v9617_v57  ;;  %v9621_v53 = vld [vmem:[%s12893_s2 + $0xec] ss:$16 sps:$4 sm:$0xff]   ;;  %v9622_v57 = vld [vmem:[%s12893_s2 + $0xe0] ss:$16 sps:$4 sm:$0xff]  }
 0x15c   :  { %1438 = vmatpush1.bf16.msra.mxu0 %v9618_v51  ;;  %1479 = vmatpush1.bf16.msra.mxu1 %v9619_v49  ;;  %v9623_v51 = vld [vmem:[%s12893_s2 + $0xe8] ss:$16 sps:$4 sm:$0xff]   ;;  %v9624_v49 = vld [vmem:[%s12894_s4 + $0x4] ss:$16 sps:$4 sm:$0xff]  }
 0x15d   :  { %1439 = vmatprep.subr.bf16.mxu0 %v9620_v55  ;;  %1480 = vmatprep.subr.bf16.mxu1 %v9621_v53  ;;  %v9625_v55 = vld [vmem:[%s12894_s4 + $0xc] ss:$16 sps:$4 sm:$0xff]   ;;  %v9626_v53 = vld [vmem:[%s12894_s4] ss:$16 sps:$4 sm:$0xff]  }
 0x160   :  { %1440 = vmatpush1.bf16.msra.mxu0 %v9622_v57  ;;  %1481 = vmatpush1.bf16.msra.mxu1 %v9623_v51  ;;  %v9627_v57 = vld [vmem:[%s12894_s4 + $0x8] ss:$16 sps:$4 sm:$0xff]   ;;  %v9628_v51 = vld [vmem:[%s12894_s4 + $0x24] ss:$16 sps:$4 sm:$0xff]  }
 0x161   :  { %1722 = vmatprep.subr.bf16.mxu0 %v9624_v49  ;;  %1763 = vmatprep.subr.bf16.mxu1 %v9625_v55  ;;  %v9629_v49 = vld [vmem:[%s12894_s4 + $0x2c] ss:$16 sps:$4 sm:$0xff]   ;;  %v9631_v55 = vld [vmem:[%s12894_s4 + $0x28] ss:$16 sps:$4 sm:$0xff]  }
 0x163   :  { %1458 = vmatmul.mubr.bf16.vlgmr.msra.gmra.mrb[28].mxu0 %v10147_v28  ;;  %1499 = vmatmul.mubr.bf16.vlgmr.msra.gmra.mrb[28].mxu1 %v10147_v28  ;;  %v9630_v28 = vld [vmem:[%s12894_s4 + $0x20] ss:$16 sps:$4 sm:$0xff]  }
 0x164   :  { %1723 = vmatpush1.bf16.msra.mxu0 %v9626_v53  ;;  %1764 = vmatpush1.bf16.msra.mxu1 %v9627_v57  ;;  %v9632_v53 = vld [vmem:[%s12894_s4 + $0x44] ss:$16 sps:$4 sm:$0xff]   ;;  %v9633_v57 = vld [vmem:[%s12894_s4 + $0x4c] ss:$16 sps:$4 sm:$0xff]  }
 0x165   :  { %1724 = vmatprep.subr.bf16.mxu0 %v9628_v51  ;;  %1765 = vmatprep.subr.bf16.mxu1 %v9629_v49  ;;  %v9634_v51 = vld [vmem:[%s12894_s4 + $0x40] ss:$16 sps:$4 sm:$0xff]   ;;  %v9635_v49 = vld [vmem:[%s12894_s4 + $0x48] ss:$16 sps:$4 sm:$0xff]  }
 0x166   :  { %1754 = vmatprep.mubr.bf16.mxu0 %v13081_v31  ;;  %1795 = vmatprep.mubr.bf16.mxu1 %v13081_v31 }
 0x168   :  { %1725 = vmatpush1.bf16.msra.mxu0 %v9630_v28  ;;  %1766 = vmatpush1.bf16.msra.mxu1 %v9631_v55 }
 0x169   :  { %1726 = vmatprep.subr.bf16.mxu0 %v9632_v53  ;;  %1767 = vmatprep.subr.bf16.mxu1 %v9633_v57  ;;  %v13085_v53 = vsub.s32 2, %v10035_v25 }
 0x16c   :  { %1727 = vmatpush1.bf16.msra.mxu0 %v9634_v51  ;;  %1768 = vmatpush1.bf16.msra.mxu1 %v9635_v49 }
 0x16d   :  { %1728 = vmatprep.subr.bf16.mxu0 %v9906_v1  ;;  %1769 = vmatprep.subr.bf16.mxu1 %v9911_v3 }
 0x170   :  { %1729 = vmatpush1.bf16.msra.mxu0 %v9916_v4  ;;  %1770 = vmatpush1.bf16.msra.mxu1 %v9921_v5 }
 0x171   :  { %1730 = vmatprep.subr.bf16.mxu0 %v9929_v6  ;;  %1771 = vmatprep.subr.bf16.mxu1 %v9934_v7 }
 0x174   :  { %1731 = vmatpush1.bf16.msra.mxu0 %v9940_v8  ;;  %1772 = vmatpush1.bf16.msra.mxu1 %v9945_v9 }
 0x175   :  { %1732 = vmatprep.subr.bf16.mxu0 %v9953_v10  ;;  %1773 = vmatprep.subr.bf16.mxu1 %v9958_v11  ;;  %v10488_v10 = vld [vmem:[%s12897_s6] sm:$0xf]  ;;  %v13083_v11 = vsub.s32 0, %v10035_v25 }
 0x176   :  { %v10504_v57 = vrot.slane %v10488_v10, %v13085_v53 }
 0x178   :  { %1733 = vmatpush1.bf16.msra.mxu0 %v9964_v12  ;;  %1774 = vmatpush1.bf16.msra.mxu1 %v9969_v13  ;;  %v10493_v12 = vrot.slane %v10488_v10, %v13083_v11  ;;  %13086 = vst [vmem:[#allocation29_spill] sm:$0xff] %v10504_v57 }
 0x179   :  { %1734 = vmatprep.subr.bf16.mxu0 %v9977_v14  ;;  %1775 = vmatprep.subr.bf16.mxu1 %v9982_v15  ;;  %v13084_v15 = vsub.s32 1, %v10035_v25 }
 0x17c   :  { %1735 = vmatpush1.bf16.msra.mxu0 %v9988_v16  ;;  %1776 = vmatpush1.bf16.msra.mxu1 %v9993_v17  ;;  %v10498_v16 = vrot.slane %v10488_v10, %v13084_v15 }
 0x17d   :  { %1736 = vmatprep.subr.bf16.mxu0 %v10001_v18  ;;  %1777 = vmatprep.subr.bf16.mxu1 %v10006_v19 }
 0x180   :  { %1737 = vmatpush1.bf16.msra.mxu0 %v10012_v20  ;;  %1778 = vmatpush1.bf16.msra.mxu1 %v10017_v21 }
 0x181   :  { %1964 = vmatprep.subr.bf16.mxu0 %v10026_v22  ;;  %2005 = vmatprep.subr.bf16.mxu1 %v10031_v23 }
 0x1f6   :  { %v882_v1 = vpop.f32.mrb[20].mxu0  ;;  %v923_v3 = vpop.f32.mrb[20].mxu1 }
 0x1f7   :  { %v884_v4 = vpop.f32.mrb[21].mxu0  ;;  %v925_v5 = vpop.f32.mrb[21].mxu1 }
 0x1f8   :  { %v886_v6 = vpop.f32.mrb[22].mxu0  ;;  %v927_v7 = vpop.f32.mrb[22].mxu1 }
 0x1f9   :  { %v887_v8 = vpop.f32.mrb[23].mxu0  ;;  %v928_v9 = vpop.f32.mrb[23].mxu1 }
 0x216   :  { %v1124_v13 = vpop.f32.mrb[24].mxu0  ;;  %v1165_v14 = vpop.f32.mrb[24].mxu1 }
 0x217   :  { %v1125_v17 = vadd.f32 %v1124_v13, %v882_v1  ;;  %v1166_v18 = vadd.f32 %v1165_v14, %v923_v3  ;;  %v1126_v19 = vpop.f32.mrb[25].mxu0  ;;  %v1167_v20 = vpop.f32.mrb[25].mxu1 }
 0x218   :  { %v1127_v21 = vadd.f32 %v1126_v19, %v884_v4  ;;  %v1168_v22 = vadd.f32 %v1167_v20, %v925_v5  ;;  %v1128_v23 = vpop.f32.mrb[26].mxu0  ;;  %v1169_v28 = vpop.f32.mrb[26].mxu1 }
 0x219   :  { %v1172_v55 = vadd.f32 %v1125_v17, %v10493_v12  ;;  %v1129_v51 = vpop.f32.mrb[27].mxu0  ;;  %v1170_v49 = vpop.f32.mrb[27].mxu1  ;;  %v1174_v3 = vadd.f32 %v1166_v18, %v10504_v57 }
 0x21a   :  { %v1173_v6 = vadd.f32 %v1127_v21, %v10498_v16 }
 0x21b   :  { %v1176_v7 = vmul.f32 0.5, %v1172_v55 }
 0x21c   :  { %v1180_v1 = vmul.f32 0.5, %v1173_v6 }
 0x21d   :  { %9408 = vtanh.f32 %v1176_v7 }
 0x21e   :  { %9410 = vtanh.f32 %v1180_v1 }
 0x21f   :  { %9412 = vtanh.f32 %v1174_v3 }
 0x227   :  { %v9409_v4 = vpop.eup %9408 }
 0x228   :  { %v9411_v5 = vpop.eup %9410  ;;  %v1178_v8 = vmul.f32 0.5, %v9409_v4 }
 0x229   :  { %v1182_v9 = vmul.f32 0.5, %v9411_v5  ;;  %v9413_v13 = vpop.eup %9412 }
 0x22a   :  { %v1179_v11 = vadd.f32 0.5, %v1178_v8 }
 0x22b   :  { %v1183_v14 = vadd.f32 0.5, %v1182_v9 }
 0x22c   :  { %v1190_v15 = vmul.f32 %v9413_v13, %v1179_v11 }
 0x22d   :  { %v1189_v17 = vmul.f32 0.0, %v1183_v14 }
 0x22f   :  { %v10508_v19 = vadd.f32 %v1190_v15, %v1189_v17 }
 0x236   :  { %v1459_v20 = vpop.f32.mrb[28].mxu0  ;;  %v1500_v21 = vpop.f32.mrb[28].mxu1 }
 0x237   :  { %v1507_v23 = vadd.f32 %v1459_v20, %v10060_v41  ;;  %v1509_v28 = vadd.f32 %v1500_v21, %v10063_v43  ;;  %v1461_v18 = vpop.f32.mrb[29].mxu0  ;;  %v1502_v55 = vpop.f32.mrb[29].mxu1 }
 0x238   :  { %v1508_v53 = vadd.f32 %v1461_v18, %v10065_v45  ;;  %v1510_v51 = vadd.f32 %v1502_v55, %v10068_v46  ;;  %v1463_v49 = vpop.f32.mrb[30].mxu0  ;;  %v1504_v6 = vpop.f32.mrb[30].mxu1 }
 0x239   :  { %v1511_v7 = vmul.f32 0.5, %v1507_v23  ;;  %v1464_v1 = vpop.f32.mrb[31].mxu0  ;;  %v1505_v3 = vpop.f32.mrb[31].mxu1  ;;  %v10717_v49 = vld [vmem:[%s12893_s2 + $0xcc] ss:$16 sps:$4 sm:$0xff]  }
 0x23a   :  { %v1515_v4 = vmul.f32 0.5, %v1508_v53  ;;  %v1520_v5 = vmul.f32 0.5, %v1510_v51  ;;  %v10724_v6 = vld [vmem:[%s12893_s2 + $0xc0] ss:$16 sps:$4 sm:$0xff]   ;;  %v10736_v1 = vld [vmem:[%s12893_s2 + $0xe4] ss:$16 sps:$4 sm:$0xff]  }
 0x23b   :  { %9414 = vtanh.f32 %v1511_v7  ;;  %v10729_v7 = vld [vmem:[%s12893_s2 + $0xc8] ss:$16 sps:$4 sm:$0xff]   ;;  %v10741_v3 = vld [vmem:[%s12893_s2 + $0xec] ss:$16 sps:$4 sm:$0xff]  }
 0x23c   :  { %9416 = vtanh.f32 %v1515_v4  ;;  %v10748_v4 = vld [vmem:[%s12893_s2 + $0xe0] ss:$16 sps:$4 sm:$0xff]  }
 0x23d   :  { %9418 = vtanh.f32 %v1509_v28  ;;  %v13087_v28 = vsub.s32 3, %v10035_v25 }
 0x23e   :  { %9420 = vtanh.f32 %v1520_v5  ;;  %v10753_v5 = vld [vmem:[%s12893_s2 + $0xe8] ss:$16 sps:$4 sm:$0xff]  }
 0x23f   :  { %v10521_v18 = vrot.slane %v10488_v10, %v13087_v28  ;;  %v10705_v10 = vld [vmem:[%s12893_s2 + $0xa8] ss:$16 sps:$4 sm:$0xff]   ;;  %v10843_v28 = vld [vmem:[%s12894_s4 + $0x6c] ss:$16 sps:$4 sm:$0xff]  }
 0x240   :  { %13099 = vst [vmem:[#allocation39_spill] sm:$0xff] %v10843_v28 }
 0x241   :  { %v1175_v51 = vadd.f32 %v1168_v22, %v10521_v18  ;;  %v10712_v22 = vld [vmem:[%s12893_s2 + $0xc4] ss:$16 sps:$4 sm:$0xff]  }
 0x243   :  { %v1185_v25 = vmul.f32 0.5, %v1175_v51  ;;  %v10862_v51 = vld [vmem:[%s12894_s4 + $0x84] ss:$16 sps:$4 sm:$0xff]  }
 0x244   :  { %13102 = vst [vmem:[#allocation42_spill] sm:$0xff] %v10862_v51 }
 0x245   :  { %v9415_v8 = vpop.eup %9414 }
 0x246   :  { %v9417_v41 = vpop.eup %9416  ;;  %v1513_v9 = vmul.f32 0.5, %v9415_v8  ;;  %v10766_v8 = vld [vmem:[%s12894_s4 + $0x4] ss:$16 sps:$4 sm:$0xff]  }
 0x247   :  { %v1517_v43 = vmul.f32 0.5, %v9417_v41  ;;  %v9419_v13 = vpop.eup %9418  ;;  %v10771_v41 = vld [vmem:[%s12894_s4 + $0xc] ss:$16 sps:$4 sm:$0xff]  }
 0x248   :  { %v1514_v11 = vadd.f32 0.5, %v1513_v9  ;;  %v9421_v17 = vpop.eup %9420  ;;  %v10776_v9 = vld [vmem:[%s12894_s4] ss:$16 sps:$4 sm:$0xff]  }
 0x249   :  { %v1518_v45 = vadd.f32 0.5, %v1517_v43  ;;  %v1522_v20 = vmul.f32 0.5, %v9421_v17  ;;  %v10781_v43 = vld [vmem:[%s12894_s4 + $0x8] ss:$16 sps:$4 sm:$0xff]   ;;  %v10819_v17 = vld [vmem:[%s12894_s4 + $0x4c] ss:$16 sps:$4 sm:$0xff]  }
 0x24a   :  { %v1525_v14 = vmul.f32 %v9419_v13, %v1514_v11  ;;  %v10790_v11 = vld [vmem:[%s12894_s4 + $0x24] ss:$16 sps:$4 sm:$0xff]   ;;  %v10795_v13 = vld [vmem:[%s12894_s4 + $0x2c] ss:$16 sps:$4 sm:$0xff]   ;;  %13095 = vst [vmem:[#allocation35_spill] sm:$0xff] %v10819_v17 }
 0x24b   :  { %v1524_v46 = vmul.f32 %v1518_v45, %v10134_v27  ;;  %v1523_v21 = vadd.f32 0.5, %v1522_v20  ;;  %13091 = vst [vmem:[#allocation31_spill] sm:$0xff] %v10795_v13  ;;  %v10800_v45 = vld [vmem:[%s12894_s4 + $0x20] ss:$16 sps:$4 sm:$0xff]  }
 0x24c   :  { %13092 = vst [vmem:[#allocation32_spill] sm:$0xff] %v10800_v45  ;;  %v10824_v20 = vld [vmem:[%s12894_s4 + $0x40] ss:$16 sps:$4 sm:$0xff]  }
 0x24d   :  { %v10515_v15 = vadd.f32 %v1525_v14, %v1524_v46  ;;  %v10805_v14 = vld [vmem:[%s12894_s4 + $0x28] ss:$16 sps:$4 sm:$0xff]   ;;  %v10814_v46 = vld [vmem:[%s12894_s4 + $0x44] ss:$16 sps:$4 sm:$0xff]   ;;  %13096 = vst [vmem:[#allocation36_spill] sm:$0xff] %v10824_v20 }
 0x24e   :  { %13093 = vst [vmem:[#allocation33_spill] sm:$0xff] %v10805_v14  ;;  %13094 = vst [vmem:[#allocation34_spill] sm:$0xff] %v10814_v46 }
 0x24f   :  { %9422 = vtanh.f32 %v10515_v15 }
 0x250   :  { %9424 = vtanh.f32 %v1185_v25  ;;  %v10867_v25 = vld [vmem:[%s12894_s4 + $0x8c] ss:$16 sps:$4 sm:$0xff]  }
 0x251   :  { %9426 = vtanh.f32 %v10508_v19  ;;  %13103 = vst [vmem:[#allocation43_spill] sm:$0xff] %v10867_v25 }
 0x259   :  { %v9423_v23 = vpop.eup %9422 }
 0x25a   :  { %v1528_v55 = vmul.f32 %v9423_v23, %v1523_v21  ;;  %v9425_v27 = vpop.eup %9424  ;;  %v10829_v21 = vld [vmem:[%s12894_s4 + $0x48] ss:$16 sps:$4 sm:$0xff]   ;;  %v10838_v23 = vld [vmem:[%s12894_s4 + $0x64] ss:$16 sps:$4 sm:$0xff]  }
 0x25b   :  { %13097 = vst [vmem:[#allocation37_spill] sm:$0xff] %v10829_v21  ;;  %13098 = vst [vmem:[#allocation38_spill] sm:$0xff] %v10838_v23 }
 0x25c   :  { %v10523_v53 = vpack.c.bf16 %v1528_v55, %v1528_v55  ;;  %v10848_v55 = vld [vmem:[%s12894_s4 + $0x60] ss:$16 sps:$4 sm:$0xff]  }
 0x25d   :  { %13100 = vst [vmem:[#allocation40_spill] sm:$0xff] %v10848_v55 }
 0x25e   :  { %1755 = vmatmul.mubr.bf16.vlgmr.msra.gmra.mrb[32].mxu0 %v10523_v53  ;;  %1796 = vmatmul.mubr.bf16.vlgmr.msra.gmra.mrb[32].mxu1 %v10523_v53 }
 0x25f   :  { %1965 = vmatpush1.bf16.msra.mxu0 %v10140_v48  ;;  %2006 = vmatpush1.bf16.msra.mxu1 %v10145_v0  ;;  %v1187_v48 = vmul.f32 0.5, %v9425_v27  ;;  %v9427_v0 = vpop.eup %9426  ;;  %v10872_v27 = vld [vmem:[%s12894_s4 + $0x80] ss:$16 sps:$4 sm:$0xff]  }
 0x260   :  { %1966 = vmatprep.subr.bf16.mxu0 %v10152_v44  ;;  %2007 = vmatprep.subr.bf16.mxu1 %v10157_v30  ;;  %13104 = vst [vmem:[#allocation44_spill] sm:$0xff] %v10872_v27 }
 0x261   :  { %1996 = vmatprep.mubr.bf16.mxu0 %v13081_v31  ;;  %2037 = vmatprep.mubr.bf16.mxu1 %v13081_v31  ;;  %v1188_v44 = vadd.f32 0.5, %v1187_v48  ;;  %v10877_v48 = vld [vmem:[%s12894_s4 + $0x88] ss:$16 sps:$4 sm:$0xff]  }
 0x262   :  { %13105 = vst [vmem:[#allocation45_spill] sm:$0xff] %v10877_v48 }
 0x263   :  { %1967 = vmatpush1.bf16.msra.mxu0 %v10166_v52  ;;  %2008 = vmatpush1.bf16.msra.mxu1 %v10171_v56  ;;  %v10557_v30 = vmul.f32 %v9427_v0, %v1188_v44  ;;  %v10564_v52 = vld [vmem:[%s12893_s2 + $0x4] ss:$16 sps:$4 sm:$0xff]   ;;  %v10602_v56 = vld [vmem:[%s12893_s2 + $0x20] ss:$16 sps:$4 sm:$0xff]   ;;  %v10891_v44 = vld [vmem:[%s12894_s4 + $0xac] ss:$16 sps:$4 sm:$0xff]  }
 0x264   :  { %1968 = vmatprep.subr.bf16.mxu0 %v10178_v63  ;;  %2009 = vmatprep.subr.bf16.mxu1 %v10183_v32  ;;  %v10607_v63 = vld [vmem:[%s12893_s2 + $0x28] ss:$16 sps:$4 sm:$0xff]   ;;  %v10614_v32 = vld [vmem:[%s12893_s2 + $0x44] ss:$16 sps:$4 sm:$0xff]   ;;  %13107 = vst [vmem:[#allocation47_spill] sm:$0xff] %v10891_v44 }
 0x265   :  { %13088 = vst [vmem:[#allocation30_spill] sm:$0xff] %v10557_v30  ;;  %v10886_v0 = vld [vmem:[%s12894_s4 + $0xa4] ss:$16 sps:$4 sm:$0xff]  }
 0x266   :  { %13106 = vst [vmem:[#allocation46_spill] sm:$0xff] %v10886_v0 }
 0x267   :  { %1969 = vmatpush1.bf16.msra.mxu0 %v10192_v33  ;;  %2010 = vmatpush1.bf16.msra.mxu1 %v10197_v34  ;;  %v10619_v33 = vld [vmem:[%s12893_s2 + $0x4c] ss:$16 sps:$4 sm:$0xff]   ;;  %v10628_v34 = vld [vmem:[%s12893_s2 + $0x40] ss:$16 sps:$4 sm:$0xff]  }
 0x268   :  { %1970 = vmatprep.subr.bf16.mxu0 %v10204_v35  ;;  %2011 = vmatprep.subr.bf16.mxu1 %v10209_v36  ;;  %v10633_v35 = vld [vmem:[%s12893_s2 + $0x48] ss:$16 sps:$4 sm:$0xff]   ;;  %v10640_v36 = vld [vmem:[%s12893_s2 + $0x64] ss:$16 sps:$4 sm:$0xff]  }
 0x26b   :  { %1971 = vmatpush1.bf16.msra.mxu0 %v10216_v26  ;;  %2012 = vmatpush1.bf16.msra.mxu1 %v10221_v29  ;;  %v10645_v26 = vld [vmem:[%s12893_s2 + $0x6c] ss:$16 sps:$4 sm:$0xff]   ;;  %v10652_v29 = vld [vmem:[%s12893_s2 + $0x60] ss:$16 sps:$4 sm:$0xff]  }
 0x26c   :  { %1972 = vmatprep.subr.bf16.mxu0 %v10228_v37  ;;  %2013 = vmatprep.subr.bf16.mxu1 %v10233_v38  ;;  %v10657_v37 = vld [vmem:[%s12893_s2 + $0x68] ss:$16 sps:$4 sm:$0xff]   ;;  %v10664_v38 = vld [vmem:[%s12893_s2 + $0x84] ss:$16 sps:$4 sm:$0xff]  }
 0x26f   :  { %1973 = vmatpush1.bf16.msra.mxu0 %v10240_v2  ;;  %2014 = vmatpush1.bf16.msra.mxu1 %v10245_v50  ;;  %v10669_v2 = vld [vmem:[%s12893_s2 + $0x8c] ss:$16 sps:$4 sm:$0xff]   ;;  %v10676_v50 = vld [vmem:[%s12893_s2 + $0x80] ss:$16 sps:$4 sm:$0xff]  }
 0x270   :  { %1974 = vmatprep.subr.bf16.mxu0 %v10252_v54  ;;  %2015 = vmatprep.subr.bf16.mxu1 %v10257_v58  ;;  %v10681_v54 = vld [vmem:[%s12893_s2 + $0x88] ss:$16 sps:$4 sm:$0xff]   ;;  %v10688_v58 = vld [vmem:[%s12893_s2 + $0xa4] ss:$16 sps:$4 sm:$0xff]  }
 0x273   :  { %1975 = vmatpush1.bf16.msra.mxu0 %v10264_v40  ;;  %2016 = vmatpush1.bf16.msra.mxu1 %v10269_v60  ;;  %v10693_v40 = vld [vmem:[%s12893_s2 + $0xac] ss:$16 sps:$4 sm:$0xff]   ;;  %v10700_v60 = vld [vmem:[%s12893_s2 + $0xa0] ss:$16 sps:$4 sm:$0xff]  }
 0x274   :  { %1976 = vmatprep.subr.bf16.mxu0 %v10276_v47  ;;  %2017 = vmatprep.subr.bf16.mxu1 %v10281_v42  ;;  %v10569_v42 = vld [vmem:[%s12893_s2 + $0xc] ss:$16 sps:$4 sm:$0xff]  }
 0x275   :  { %v10595_v47 = vld [vmem:[%s12893_s2 + $0x2c] ss:$16 sps:$4 sm:$0xff]  }
 0x277   :  { %1977 = vmatpush1.bf16.msra.mxu0 %v10288_v39  ;;  %2018 = vmatpush1.bf16.msra.mxu1 %v10293_v24  ;;  %v13089_v39 = vld [vmem:[#allocation28_spill] sm:$0xff]  ;;  %v1195_v24 = vpack.c.bf16 %v10557_v30, %v10557_v30 }
 0x278   :  { %1978 = vmatprep.subr.bf16.mxu0 %v10300_v62  ;;  %2019 = vmatprep.subr.bf16.mxu1 %v10305_v61  ;;  %v10576_v62 = vld [vmem:[%s12893_s2] ss:$16 sps:$4 sm:$0xff]   ;;  %v10581_v61 = vld [vmem:[%s12893_s2 + $0x8] ss:$16 sps:$4 sm:$0xff]   ;;  %13090 = vst [vmem:[#allocation28_spill] sm:$0xff] %v10790_v11 }
 0x279   :  { %v10910_v30 = vld [vmem:[%s12894_s4 + $0xc4] ss:$16 sps:$4 sm:$0xff]  }
 0x27a   :  { %13110 = vst [vmem:[#allocation50_spill] sm:$0xff] %v10910_v30 }
 0x27b   :  { %1979 = vmatpush1.bf16.msra.mxu0 %v10312_v59  ;;  %2020 = vmatpush1.bf16.msra.mxu1 %v13089_v39  ;;  %v10590_v59 = vld [vmem:[%s12893_s2 + $0x24] ss:$16 sps:$4 sm:$0xff]   ;;  %v10896_v39 = vld [vmem:[%s12894_s4 + $0xa0] ss:$16 sps:$4 sm:$0xff]  }
 0x27c   :  { %2300 = vmatprep.subr.bf16.mxu0 %v10564_v52  ;;  %2341 = vmatprep.subr.bf16.mxu1 %v10569_v42  ;;  %13108 = vst [vmem:[#allocation48_spill] sm:$0xff] %v10896_v39 }
 0x27e   :  { %1997 = vmatmul.mubr.bf16.vlgmr.msra.gmra.mrb[36].mxu0 %v1195_v24  ;;  %2038 = vmatmul.mubr.bf16.vlgmr.msra.gmra.mrb[36].mxu1 %v1195_v24  ;;  %v10901_v24 = vld [vmem:[%s12894_s4 + $0xa8] ss:$16 sps:$4 sm:$0xff]  }
 0x27f   :  { %2301 = vmatpush1.bf16.msra.mxu0 %v10576_v62  ;;  %2342 = vmatpush1.bf16.msra.mxu1 %v10581_v61  ;;  %13109 = vst [vmem:[#allocation49_spill] sm:$0xff] %v10901_v24 }
 0x280   :  { %2302 = vmatprep.subr.bf16.mxu0 %v10590_v59  ;;  %2343 = vmatprep.subr.bf16.mxu1 %v10595_v47 }
 0x281   :  { %2332 = vmatprep.mubr.bf16.mxu0 %v13081_v31  ;;  %2373 = vmatprep.mubr.bf16.mxu1 %v13081_v31 }
 0x283   :  { %2303 = vmatpush1.bf16.msra.mxu0 %v10602_v56  ;;  %2344 = vmatpush1.bf16.msra.mxu1 %v10607_v63 }
 0x284   :  { %2304 = vmatprep.subr.bf16.mxu0 %v10614_v32  ;;  %2345 = vmatprep.subr.bf16.mxu1 %v10619_v33 }
 0x287   :  { %2305 = vmatpush1.bf16.msra.mxu0 %v10628_v34  ;;  %2346 = vmatpush1.bf16.msra.mxu1 %v10633_v35 }
 0x288   :  { %2306 = vmatprep.subr.bf16.mxu0 %v10640_v36  ;;  %2347 = vmatprep.subr.bf16.mxu1 %v10645_v26 }
 0x28b   :  { %2307 = vmatpush1.bf16.msra.mxu0 %v10652_v29  ;;  %2348 = vmatpush1.bf16.msra.mxu1 %v10657_v37 }
 0x28c   :  { %2308 = vmatprep.subr.bf16.mxu0 %v10664_v38  ;;  %2349 = vmatprep.subr.bf16.mxu1 %v10669_v2 }
 0x28f   :  { %2309 = vmatpush1.bf16.msra.mxu0 %v10676_v50  ;;  %2350 = vmatpush1.bf16.msra.mxu1 %v10681_v54 }
 0x290   :  { %2310 = vmatprep.subr.bf16.mxu0 %v10688_v58  ;;  %2351 = vmatprep.subr.bf16.mxu1 %v10693_v40 }
 0x293   :  { %2311 = vmatpush1.bf16.msra.mxu0 %v10700_v60  ;;  %2352 = vmatpush1.bf16.msra.mxu1 %v10705_v10 }
 0x294   :  { %2312 = vmatprep.subr.bf16.mxu0 %v10712_v22  ;;  %2353 = vmatprep.subr.bf16.mxu1 %v10717_v49 }
 0x297   :  { %2313 = vmatpush1.bf16.msra.mxu0 %v10724_v6  ;;  %2354 = vmatpush1.bf16.msra.mxu1 %v10729_v7 }
 0x298   :  { %2314 = vmatprep.subr.bf16.mxu0 %v10736_v1  ;;  %2355 = vmatprep.subr.bf16.mxu1 %v10741_v3 }
 0x29b   :  { %2315 = vmatpush1.bf16.msra.mxu0 %v10748_v4  ;;  %2356 = vmatpush1.bf16.msra.mxu1 %v10753_v5 }
 0x29c   :  { %2597 = vmatprep.subr.bf16.mxu0 %v10766_v8  ;;  %2638 = vmatprep.subr.bf16.mxu1 %v10771_v41 }
 0x29e   :  { %2333 = vmatmul.mubr.bf16.vlgmr.msra.gmra.mrb[40].mxu0 %v10523_v53  ;;  %2374 = vmatmul.mubr.bf16.vlgmr.msra.gmra.mrb[40].mxu1 %v10523_v53  ;;  %v10853_v53 = vld [vmem:[%s12894_s4 + $0x68] ss:$16 sps:$4 sm:$0xff]  }
 0x29f   :  { %2629 = vmatprep.mubr.bf16.mxu0 %v13081_v31  ;;  %2670 = vmatprep.mubr.bf16.mxu1 %v13081_v31  ;;  %13101 = vst [vmem:[#allocation41_spill] sm:$0xff] %v10853_v53 }
 0x2a0   :  { %2598 = vmatpush1.bf16.msra.mxu0 %v10776_v9  ;;  %2639 = vmatpush1.bf16.msra.mxu1 %v10781_v43 }
 0x2a1   :  { %2599 = vmatprep.subr.bf16.mxu0 %v10790_v11  ;;  %2640 = vmatprep.subr.bf16.mxu1 %v10795_v13 }
 0x2a4   :  { %2600 = vmatpush1.bf16.msra.mxu0 %v10800_v45  ;;  %2641 = vmatpush1.bf16.msra.mxu1 %v10805_v14 }
 0x2a5   :  { %2601 = vmatprep.subr.bf16.mxu0 %v10814_v46  ;;  %2642 = vmatprep.subr.bf16.mxu1 %v10819_v17 }
 0x2a8   :  { %2602 = vmatpush1.bf16.msra.mxu0 %v10824_v20  ;;  %2643 = vmatpush1.bf16.msra.mxu1 %v10829_v21 }
 0x2a9   :  { %2603 = vmatprep.subr.bf16.mxu0 %v10838_v23  ;;  %2644 = vmatprep.subr.bf16.mxu1 %v10843_v28 }
 0x2ac   :  { %2604 = vmatpush1.bf16.msra.mxu0 %v10848_v55  ;;  %2645 = vmatpush1.bf16.msra.mxu1 %v10853_v53 }
 0x2ad   :  { %2605 = vmatprep.subr.bf16.mxu0 %v10862_v51  ;;  %2646 = vmatprep.subr.bf16.mxu1 %v10867_v25 }
 0x2b0   :  { %2606 = vmatpush1.bf16.msra.mxu0 %v10872_v27  ;;  %2647 = vmatpush1.bf16.msra.mxu1 %v10877_v48  ;;  %v10915_v48 = vld [vmem:[%s12894_s4 + $0xcc] ss:$16 sps:$4 sm:$0xff]  }
 0x2b1   :  { %2607 = vmatprep.subr.bf16.mxu0 %v10886_v0  ;;  %2648 = vmatprep.subr.bf16.mxu1 %v10891_v44  ;;  %13111 = vst [vmem:[#allocation51_spill] sm:$0xff] %v10915_v48  ;;  %v10920_v0 = vld [vmem:[%s12894_s4 + $0xc0] ss:$16 sps:$4 sm:$0xff]   ;;  %v10939_v44 = vld [vmem:[%s12894_s4 + $0xec] ss:$16 sps:$4 sm:$0xff]  }
 0x2b2   :  { %13112 = vst [vmem:[#allocation52_spill] sm:$0xff] %v10920_v0  ;;  %13115 = vst [vmem:[#allocation55_spill] sm:$0xff] %v10939_v44 }
 0x2b4   :  { %2608 = vmatpush1.bf16.msra.mxu0 %v10896_v39  ;;  %2649 = vmatpush1.bf16.msra.mxu1 %v10901_v24  ;;  %v10925_v39 = vld [vmem:[%s12894_s4 + $0xc8] ss:$16 sps:$4 sm:$0xff]   ;;  %v10934_v24 = vld [vmem:[%s12894_s4 + $0xe4] ss:$16 sps:$4 sm:$0xff]  }
 0x2b5   :  { %13113 = vst [vmem:[#allocation53_spill] sm:$0xff] %v10925_v39  ;;  %2609 = vmatprep.subr.bf16.mxu0 %v10910_v30  ;;  %2650 = vmatprep.subr.bf16.mxu1 %v10915_v48  ;;  %13114 = vst [vmem:[#allocation54_spill] sm:$0xff] %v10934_v24  ;;  %v10944_v30 = vld [vmem:[%s12894_s4 + $0xe0] ss:$16 sps:$4 sm:$0xff]   ;;  %v10963_v48 = vld [vmem:[%s12895_s5 + $0xc] ss:$16 sps:$4 sm:$0xff]  }
 0x2b6   :  { %13116 = vst [vmem:[#allocation56_spill] sm:$0xff] %v10944_v30  ;;  %13119 = vst [vmem:[#allocation59_spill] sm:$0xff] %v10963_v48 }
 0x2b8   :  { %2610 = vmatpush1.bf16.msra.mxu0 %v10920_v0  ;;  %2651 = vmatpush1.bf16.msra.mxu1 %v10925_v39  ;;  %v10949_v0 = vld [vmem:[%s12894_s4 + $0xe8] ss:$16 sps:$4 sm:$0xff]   ;;  %v10958_v39 = vld [vmem:[%s12895_s5 + $0x4] ss:$16 sps:$4 sm:$0xff]  }
 0x2b9   :  { %13117 = vst [vmem:[#allocation57_spill] sm:$0xff] %v10949_v0  ;;  %2611 = vmatprep.subr.bf16.mxu0 %v10934_v24  ;;  %2652 = vmatprep.subr.bf16.mxu1 %v10939_v44  ;;  %13118 = vst [vmem:[#allocation58_spill] sm:$0xff] %v10958_v39 }
 0x2bc   :  { %2612 = vmatpush1.bf16.msra.mxu0 %v10944_v30  ;;  %2653 = vmatpush1.bf16.msra.mxu1 %v10949_v0 }
 0x2bd   :  { %2839 = vmatprep.subr.bf16.mxu0 %v10958_v39  ;;  %2880 = vmatprep.subr.bf16.mxu1 %v10963_v48 }
 0x331   :  { %v1756_v24 = vpop.f32.mrb[32].mxu0  ;;  %v1797_v44 = vpop.f32.mrb[32].mxu1 }
 0x332   :  { %v1758_v27 = vpop.f32.mrb[33].mxu0  ;;  %v1799_v30 = vpop.f32.mrb[33].mxu1 }
 0x333   :  { %v1760_v25 = vpop.f32.mrb[34].mxu0  ;;  %v1801_v0 = vpop.f32.mrb[34].mxu1 }
 0x334   :  { %v1761_v51 = vpop.f32.mrb[35].mxu0  ;;  %v1802_v53 = vpop.f32.mrb[35].mxu1 }
 0x351   :  { %v1998_v55 = vpop.f32.mrb[36].mxu0  ;;  %v2039_v28 = vpop.f32.mrb[36].mxu1 }
 0x352   :  { %v1999_v23 = vadd.f32 %v1998_v55, %v1756_v24  ;;  %v2040_v21 = vadd.f32 %v2039_v28, %v1797_v44  ;;  %v2000_v20 = vpop.f32.mrb[37].mxu0  ;;  %v2041_v17 = vpop.f32.mrb[37].mxu1  ;;  %v13121_v24 = vld [vmem:[#allocation5_spill] sm:$0xff] }
 0x353   :  { %v2001_v46 = vadd.f32 %v2000_v20, %v1758_v27  ;;  %v10967_v14 = vadd.f32 %v2041_v17, %v1799_v30  ;;  %v2002_v39 = vpop.f32.mrb[38].mxu0  ;;  %v2043_v45 = vpop.f32.mrb[38].mxu1 }
 0x354   :  { %v2046_v48 = vadd.f32 %v1999_v23, %v10493_v12  ;;  %v2003_v13 = vpop.f32.mrb[39].mxu0  ;;  %v2044_v11 = vpop.f32.mrb[39].mxu1  ;;  %v2048_v53 = vadd.f32 %v2040_v21, %v10504_v57 }
 0x355   :  { %v2047_v25 = vadd.f32 %v2001_v46, %v10498_v16 }
 0x356   :  { %v2050_v0 = vmul.f32 0.5, %v2046_v48  ;;  %v13120_v48 = vld [vmem:[#allocation4_spill] sm:$0xff] }
 0x357   :  { %v2054_v51 = vmul.f32 0.5, %v2047_v25 }
 0x358   :  { %9428 = vtanh.f32 %v2050_v0 }
 0x359   :  { %9430 = vtanh.f32 %v2054_v51  ;;  %v13122_v51 = vld [vmem:[#allocation6_spill] sm:$0xff] }
 0x35a   :  { %9432 = vtanh.f32 %v2048_v53 }
 0x362   :  { %v9429_v28 = vpop.eup %9428 }
 0x363   :  { %v9431_v55 = vpop.eup %9430  ;;  %v2052_v20 = vmul.f32 0.5, %v9429_v28  ;;  %v13123_v28 = vld [vmem:[#allocation7_spill] sm:$0xff] }
 0x364   :  { %v2056_v30 = vmul.f32 0.5, %v9431_v55  ;;  %v9433_v27 = vpop.eup %9432 }
 0x365   :  { %v2053_v17 = vadd.f32 0.5, %v2052_v20 }
 0x366   :  { %v2057_v45 = vadd.f32 0.5, %v2056_v30 }
 0x367   :  { %v2064_v44 = vmul.f32 %v9433_v27, %v2053_v17 }
 0x368   :  { %v2063_v13 = vmul.f32 %v2057_v45, %v10508_v19 }
 0x36a   :  { %v10973_v11 = vadd.f32 %v2064_v44, %v2063_v13 }
 0x371   :  { %v2334_v46 = vpop.f32.mrb[40].mxu0  ;;  %v2375_v23 = vpop.f32.mrb[40].mxu1 }
 0x372   :  { %v2382_v39 = vadd.f32 %v2334_v46, %v13120_v48  ;;  %v2384_v21 = vadd.f32 %v2375_v23, %v13121_v24  ;;  %v2336_v25 = vpop.f32.mrb[41].mxu0  ;;  %v2377_v0 = vpop.f32.mrb[41].mxu1 }
 0x373   :  { %v2383_v53 = vadd.f32 %v2336_v25, %v13122_v51  ;;  %v2385_v55 = vadd.f32 %v2377_v0, %v13123_v28  ;;  %v2338_v20 = vpop.f32.mrb[42].mxu0  ;;  %v2379_v57 = vpop.f32.mrb[42].mxu1 }
 0x374   :  { %v2386_v30 = vmul.f32 0.5, %v2382_v39  ;;  %v2339_v17 = vpop.f32.mrb[43].mxu0  ;;  %v2380_v27 = vpop.f32.mrb[43].mxu1  ;;  %v10986_v20 = vld [vmem:[%s12895_s5] ss:$16 sps:$4 sm:$0xff]  }
 0x375   :  { %v2390_v19 = vmul.f32 0.5, %v2383_v53  ;;  %v2395_v45 = vmul.f32 0.5, %v2385_v55  ;;  %v10998_v17 = vld [vmem:[%s12895_s5 + $0x24] ss:$16 sps:$4 sm:$0xff]   ;;  %v11003_v27 = vld [vmem:[%s12895_s5 + $0x2c] ss:$16 sps:$4 sm:$0xff]  }
 0x376   :  { %9434 = vtanh.f32 %v2386_v30  ;;  %v10991_v30 = vld [vmem:[%s12895_s5 + $0x8] ss:$16 sps:$4 sm:$0xff]  }
 0x377   :  { %9436 = vtanh.f32 %v2390_v19  ;;  %v2049_v19 = vadd.f32 %v10967_v14, %v10521_v18  ;;  %v11026_v14 = vld [vmem:[%s12895_s5 + $0x44] ss:$16 sps:$4 sm:$0xff]  }
 0x378   :  { %9438 = vtanh.f32 %v2384_v21 }
 0x379   :  { %9440 = vtanh.f32 %v2395_v45  ;;  %v11014_v45 = vld [vmem:[%s12895_s5 + $0x20] ss:$16 sps:$4 sm:$0xff]  }
 0x380   :  { %v9435_v44 = vpop.eup %9434 }
 0x381   :  { %v9437_v13 = vpop.eup %9436  ;;  %v2388_v46 = vmul.f32 0.5, %v9435_v44  ;;  %v11019_v44 = vld [vmem:[%s12895_s5 + $0x28] ss:$16 sps:$4 sm:$0xff]  }
 0x382   :  { %v2392_v23 = vmul.f32 0.5, %v9437_v13  ;;  %v9439_v24 = vpop.eup %9438  ;;  %v11031_v13 = vld [vmem:[%s12895_s5 + $0x4c] ss:$16 sps:$4 sm:$0xff]  }
 0x383   :  { %v2389_v48 = vadd.f32 0.5, %v2388_v46  ;;  %v9441_v39 = vpop.eup %9440  ;;  %v2059_v46 = vmul.f32 0.5, %v2049_v19  ;;  %v11106_v19 = vld [vmem:[%s12895_s5 + $0xac] ss:$16 sps:$4 sm:$0xff]  }
 0x384   :  { %v2393_v25 = vadd.f32 0.5, %v2392_v23  ;;  %v2397_v53 = vmul.f32 0.5, %v9441_v39  ;;  %v11040_v23 = vld [vmem:[%s12895_s5 + $0x40] ss:$16 sps:$4 sm:$0xff]   ;;  %v11076_v39 = vld [vmem:[%s12895_s5 + $0x84] ss:$16 sps:$4 sm:$0xff]  }
 0x385   :  { %v2400_v51 = vmul.f32 %v9439_v24, %v2389_v48  ;;  %v11045_v48 = vld [vmem:[%s12895_s5 + $0x48] ss:$16 sps:$4 sm:$0xff]   ;;  %v11052_v24 = vld [vmem:[%s12895_s5 + $0x64] ss:$16 sps:$4 sm:$0xff]   ;;  %13127 = vst [vmem:[#allocation7_spill] sm:$0xff] %v11076_v39  ;;  %13132 = vst [vmem:[#allocation64_spill] sm:$0xff] %v11106_v19 }
 0x386   :  { %v2399_v0 = vmul.f32 %v2393_v25, %v10515_v15  ;;  %v2398_v28 = vadd.f32 0.5, %v2397_v53  ;;  %v11057_v25 = vld [vmem:[%s12895_s5 + $0x6c] ss:$16 sps:$4 sm:$0xff]  }
 0x387   :  { %13124 = vst [vmem:[#allocation4_spill] sm:$0xff] %v11057_v25  ;;  %v11081_v53 = vld [vmem:[%s12895_s5 + $0x8c] ss:$16 sps:$4 sm:$0xff]  }
 0x388   :  { %v10980_v57 = vadd.f32 %v2400_v51, %v2399_v0  ;;  %v11064_v51 = vld [vmem:[%s12895_s5 + $0x60] ss:$16 sps:$4 sm:$0xff]   ;;  %v11069_v0 = vld [vmem:[%s12895_s5 + $0x68] ss:$16 sps:$4 sm:$0xff]   ;;  %13128 = vst [vmem:[#allocation60_spill] sm:$0xff] %v11081_v53 }
 0x389   :  { %13125 = vst [vmem:[#allocation5_spill] sm:$0xff] %v11064_v51  ;;  %13126 = vst [vmem:[#allocation6_spill] sm:$0xff] %v11069_v0 }
 0x38a   :  { %9442 = vtanh.f32 %v10980_v57 }
 0x38b   :  { %9444 = vtanh.f32 %v2059_v46 }
 0x38c   :  { %9446 = vtanh.f32 %v10973_v11 }
 0x394   :  { %v9443_v21 = vpop.eup %9442 }
 0x395   :  { %v2403_v55 = vmul.f32 %v9443_v21, %v2398_v28  ;;  %v11089_v28 = vld [vmem:[%s12895_s5 + $0x80] ss:$16 sps:$4 sm:$0xff]   ;;  %v11094_v21 = vld [vmem:[%s12895_s5 + $0x88] ss:$16 sps:$4 sm:$0xff]   ;;  %v9445_v46 = vpop.eup %9444 }
 0x396   :  { %13129 = vst [vmem:[#allocation61_spill] sm:$0xff] %v11089_v28  ;;  %13130 = vst [vmem:[#allocation62_spill] sm:$0xff] %v11094_v21 }
 0x397   :  { %v10993_v15 = vpack.c.bf16 %v2403_v55, %v2403_v55  ;;  %v11101_v55 = vld [vmem:[%s12895_s5 + $0xa4] ss:$16 sps:$4 sm:$0xff]  }
 0x398   :  { %13131 = vst [vmem:[#allocation63_spill] sm:$0xff] %v11101_v55 }
 0x399   :  { %2630 = vmatmul.mubr.bf16.vlgmr.msra.gmra.mrb[44].mxu0 %v10993_v15  ;;  %2671 = vmatmul.mubr.bf16.vlgmr.msra.gmra.mrb[44].mxu1 %v10993_v15 }
 0x39a   :  { %2840 = vmatpush1.bf16.msra.mxu0 %v10986_v20  ;;  %2881 = vmatpush1.bf16.msra.mxu1 %v10991_v30 }
 0x39b   :  { %2841 = vmatprep.subr.bf16.mxu0 %v10998_v17  ;;  %2882 = vmatprep.subr.bf16.mxu1 %v11003_v27 }
 0x39c   :  { %2871 = vmatprep.mubr.bf16.mxu0 %v13081_v31  ;;  %2912 = vmatprep.mubr.bf16.mxu1 %v13081_v31 }
 0x39e   :  { %2842 = vmatpush1.bf16.msra.mxu0 %v11014_v45  ;;  %2883 = vmatpush1.bf16.msra.mxu1 %v11019_v44 }
 0x39f   :  { %2843 = vmatprep.subr.bf16.mxu0 %v11026_v14  ;;  %2884 = vmatprep.subr.bf16.mxu1 %v11031_v13 }
 0x3a2   :  { %2844 = vmatpush1.bf16.msra.mxu0 %v11040_v23  ;;  %2885 = vmatpush1.bf16.msra.mxu1 %v11045_v48 }
 0x3a3   :  { %2845 = vmatprep.subr.bf16.mxu0 %v11052_v24  ;;  %2886 = vmatprep.subr.bf16.mxu1 %v11057_v25 }
 0x3a6   :  { %2846 = vmatpush1.bf16.msra.mxu0 %v11064_v51  ;;  %2887 = vmatpush1.bf16.msra.mxu1 %v11069_v0  ;;  %v2061_v0 = vmul.f32 0.5, %v9445_v46  ;;  %v11149_v46 = vld [vmem:[%s12895_s5 + $0xe4] ss:$16 sps:$4 sm:$0xff]  }
 0x3a7   :  { %2847 = vmatprep.subr.bf16.mxu0 %v11076_v39  ;;  %2888 = vmatprep.subr.bf16.mxu1 %v11081_v53  ;;  %v11113_v39 = vld [vmem:[%s12895_s5 + $0xa0] ss:$16 sps:$4 sm:$0xff]   ;;  %v11118_v53 = vld [vmem:[%s12895_s5 + $0xa8] ss:$16 sps:$4 sm:$0xff]  }
 0x3a8   :  { %13133 = vst [vmem:[#allocation65_spill] sm:$0xff] %v11113_v39  ;;  %13134 = vst [vmem:[#allocation66_spill] sm:$0xff] %v11118_v53  ;;  %v2062_v51 = vadd.f32 0.5, %v2061_v0 }
 0x3aa   :  { %2848 = vmatpush1.bf16.msra.mxu0 %v11089_v28  ;;  %2889 = vmatpush1.bf16.msra.mxu1 %v11094_v21  ;;  %v11125_v28 = vld [vmem:[%s12895_s5 + $0xc4] ss:$16 sps:$4 sm:$0xff]   ;;  %v11130_v21 = vld [vmem:[%s12895_s5 + $0xcc] ss:$16 sps:$4 sm:$0xff]  }
 0x3ab   :  { %2849 = vmatprep.subr.bf16.mxu0 %v11101_v55  ;;  %2890 = vmatprep.subr.bf16.mxu1 %v11106_v19  ;;  %13135 = vst [vmem:[#allocation67_spill] sm:$0xff] %v11125_v28  ;;  %13136 = vst [vmem:[#allocation68_spill] sm:$0xff] %v11130_v21  ;;  %v11137_v55 = vld [vmem:[%s12895_s5 + $0xc0] ss:$16 sps:$4 sm:$0xff]   ;;  %v11142_v19 = vld [vmem:[%s12895_s5 + $0xc8] ss:$16 sps:$4 sm:$0xff]  }
 0x3ae   :  { %2850 = vmatpush1.bf16.msra.mxu0 %v11113_v39  ;;  %2891 = vmatpush1.bf16.msra.mxu1 %v11118_v53  ;;  %v11154_v53 = vld [vmem:[%s12895_s5 + $0xec] ss:$16 sps:$4 sm:$0xff]   ;;  %v9447_v39 = vpop.eup %9446 }
 0x3af   :  { %2851 = vmatprep.subr.bf16.mxu0 %v11125_v28  ;;  %2892 = vmatprep.subr.bf16.mxu1 %v11130_v21  ;;  %v11161_v21 = vld [vmem:[%s12895_s5 + $0xe0] ss:$16 sps:$4 sm:$0xff]   ;;  %v11166_v28 = vld [vmem:[%s12895_s5 + $0xe8] ss:$16 sps:$4 sm:$0xff]   ;;  %v11168_v25 = vmul.f32 %v9447_v39, %v2062_v51 }
 0x3b1   :  { %13137 = vst [vmem:[#allocation69_spill] sm:$0xff] %v11168_v25  ;;  %v2070_v0 = vpack.c.bf16 %v11168_v25, %v11168_v25  ;;  %v11649_v25 = vld [vmem:[%s12894_s4 + $0xc4] ss:$16 sps:$4 sm:$0xff]  }
 0x3b2   :  { %2852 = vmatpush1.bf16.msra.mxu0 %v11137_v55  ;;  %2893 = vmatpush1.bf16.msra.mxu1 %v11142_v19 }
 0x3b3   :  { %2853 = vmatprep.subr.bf16.mxu0 %v11149_v46  ;;  %2894 = vmatprep.subr.bf16.mxu1 %v11154_v53 }
 0x3b6   :  { %2854 = vmatpush1.bf16.msra.mxu0 %v11161_v21  ;;  %2895 = vmatpush1.bf16.msra.mxu1 %v11166_v28 }
 0x3b7   :  { %3175 = vmatprep.subr.bf16.mxu0 %v10564_v52  ;;  %3216 = vmatprep.subr.bf16.mxu1 %v10569_v42  ;;  %v13138_v52 = vld [vmem:[#allocation28_spill] sm:$0xff]  ;;  %v13139_v42 = vld [vmem:[#allocation31_spill] sm:$0xff] }
 0x3b9   :  { %2872 = vmatmul.mubr.bf16.vlgmr.msra.gmra.mrb[48].mxu0 %v2070_v0  ;;  %2913 = vmatmul.mubr.bf16.vlgmr.msra.gmra.mrb[48].mxu1 %v2070_v0 }
 0x3ba   :  { %3176 = vmatpush1.bf16.msra.mxu0 %v10576_v62  ;;  %3217 = vmatpush1.bf16.msra.mxu1 %v10581_v61  ;;  %v13140_v62 = vld [vmem:[#allocation32_spill] sm:$0xff]  ;;  %v13141_v61 = vld [vmem:[#allocation33_spill] sm:$0xff] }
 0x3bb   :  { %3177 = vmatprep.subr.bf16.mxu0 %v10590_v59  ;;  %3218 = vmatprep.subr.bf16.mxu1 %v10595_v47  ;;  %v13142_v59 = vld [vmem:[#allocation34_spill] sm:$0xff]  ;;  %v13143_v47 = vld [vmem:[#allocation35_spill] sm:$0xff] }
 0x3bc   :  { %3207 = vmatprep.mubr.bf16.mxu0 %v13081_v31  ;;  %3248 = vmatprep.mubr.bf16.mxu1 %v13081_v31 }
 0x3be   :  { %3178 = vmatpush1.bf16.msra.mxu0 %v10602_v56  ;;  %3219 = vmatpush1.bf16.msra.mxu1 %v10607_v63  ;;  %v13144_v56 = vld [vmem:[#allocation36_spill] sm:$0xff]  ;;  %v13145_v63 = vld [vmem:[#allocation37_spill] sm:$0xff] }
 0x3bf   :  { %3179 = vmatprep.subr.bf16.mxu0 %v10614_v32  ;;  %3220 = vmatprep.subr.bf16.mxu1 %v10619_v33  ;;  %v13146_v32 = vld [vmem:[#allocation38_spill] sm:$0xff]  ;;  %v13147_v33 = vld [vmem:[#allocation39_spill] sm:$0xff] }
 0x3c2   :  { %3180 = vmatpush1.bf16.msra.mxu0 %v10628_v34  ;;  %3221 = vmatpush1.bf16.msra.mxu1 %v10633_v35  ;;  %v13148_v34 = vld [vmem:[#allocation40_spill] sm:$0xff]  ;;  %v13149_v35 = vld [vmem:[#allocation41_spill] sm:$0xff] }
 0x3c3   :  { %3181 = vmatprep.subr.bf16.mxu0 %v10640_v36  ;;  %3222 = vmatprep.subr.bf16.mxu1 %v10645_v26  ;;  %v13150_v36 = vld [vmem:[#allocation42_spill] sm:$0xff]  ;;  %v13151_v26 = vld [vmem:[#allocation43_spill] sm:$0xff] }
 0x3c6   :  { %3182 = vmatpush1.bf16.msra.mxu0 %v10652_v29  ;;  %3223 = vmatpush1.bf16.msra.mxu1 %v10657_v37  ;;  %v13152_v29 = vld [vmem:[#allocation44_spill] sm:$0xff]  ;;  %v13153_v37 = vld [vmem:[#allocation45_spill] sm:$0xff] }
 0x3c7   :  { %3183 = vmatprep.subr.bf16.mxu0 %v10664_v38  ;;  %3224 = vmatprep.subr.bf16.mxu1 %v10669_v2  ;;  %v13154_v38 = vld [vmem:[#allocation46_spill] sm:$0xff]  ;;  %v13155_v2 = vld [vmem:[#allocation47_spill] sm:$0xff] }
 0x3ca   :  { %3184 = vmatpush1.bf16.msra.mxu0 %v10676_v50  ;;  %3225 = vmatpush1.bf16.msra.mxu1 %v10681_v54  ;;  %v13156_v50 = vld [vmem:[#allocation48_spill] sm:$0xff]  ;;  %v13157_v54 = vld [vmem:[#allocation49_spill] sm:$0xff] }
 0x3cb   :  { %3185 = vmatprep.subr.bf16.mxu0 %v10688_v58  ;;  %3226 = vmatprep.subr.bf16.mxu1 %v10693_v40  ;;  %v13158_v58 = vld [vmem:[#allocation50_spill] sm:$0xff]  ;;  %v13159_v40 = vld [vmem:[#allocation51_spill] sm:$0xff] }
 0x3cc   :  { %13207 = vst [vmem:[#allocation51_spill] sm:$0xff] %v11649_v25 }
 0x3ce   :  { %3186 = vmatpush1.bf16.msra.mxu0 %v10700_v60  ;;  %3227 = vmatpush1.bf16.msra.mxu1 %v10705_v10  ;;  %v13160_v60 = vld [vmem:[#allocation52_spill] sm:$0xff]  ;;  %v13161_v10 = vld [vmem:[#allocation53_spill] sm:$0xff] }
 0x3cf   :  { %3187 = vmatprep.subr.bf16.mxu0 %v10712_v22  ;;  %3228 = vmatprep.subr.bf16.mxu1 %v10717_v49  ;;  %v13162_v22 = vld [vmem:[#allocation54_spill] sm:$0xff]  ;;  %v13163_v49 = vld [vmem:[#allocation55_spill] sm:$0xff] }
 0x3d2   :  { %3188 = vmatpush1.bf16.msra.mxu0 %v10724_v6  ;;  %3229 = vmatpush1.bf16.msra.mxu1 %v10729_v7  ;;  %v13164_v6 = vld [vmem:[#allocation56_spill] sm:$0xff]  ;;  %v13165_v7 = vld [vmem:[#allocation57_spill] sm:$0xff] }
 0x3d3   :  { %3189 = vmatprep.subr.bf16.mxu0 %v10736_v1  ;;  %3230 = vmatprep.subr.bf16.mxu1 %v10741_v3  ;;  %v13166_v1 = vld [vmem:[#allocation58_spill] sm:$0xff]  ;;  %v13167_v3 = vld [vmem:[#allocation59_spill] sm:$0xff] }
 0x3d6   :  { %3190 = vmatpush1.bf16.msra.mxu0 %v10748_v4  ;;  %3231 = vmatpush1.bf16.msra.mxu1 %v10753_v5 }
 0x3d7   :  { %3472 = vmatprep.subr.bf16.mxu0 %v10766_v8  ;;  %3513 = vmatprep.subr.bf16.mxu1 %v10771_v41 }
 0x3d9   :  { %3208 = vmatmul.mubr.bf16.vlgmr.msra.gmra.mrb[52].mxu0 %v10993_v15  ;;  %3249 = vmatmul.mubr.bf16.vlgmr.msra.gmra.mrb[52].mxu1 %v10993_v15 }
 0x3da   :  { %3473 = vmatpush1.bf16.msra.mxu0 %v10776_v9  ;;  %3514 = vmatpush1.bf16.msra.mxu1 %v10781_v43 }
 0x3db   :  { %3474 = vmatprep.subr.bf16.mxu0 %v13138_v52  ;;  %3515 = vmatprep.subr.bf16.mxu1 %v13139_v42 }
 0x3dc   :  { %3504 = vmatprep.mubr.bf16.mxu0 %v13081_v31  ;;  %3545 = vmatprep.mubr.bf16.mxu1 %v13081_v31 }
 0x3de   :  { %3475 = vmatpush1.bf16.msra.mxu0 %v13140_v62  ;;  %3516 = vmatpush1.bf16.msra.mxu1 %v13141_v61 }
 0x3df   :  { %3476 = vmatprep.subr.bf16.mxu0 %v13142_v59  ;;  %3517 = vmatprep.subr.bf16.mxu1 %v13143_v47 }
 0x3e2   :  { %3477 = vmatpush1.bf16.msra.mxu0 %v13144_v56  ;;  %3518 = vmatpush1.bf16.msra.mxu1 %v13145_v63 }
 0x3e3   :  { %3478 = vmatprep.subr.bf16.mxu0 %v13146_v32  ;;  %3519 = vmatprep.subr.bf16.mxu1 %v13147_v33 }
 0x3e6   :  { %3479 = vmatpush1.bf16.msra.mxu0 %v13148_v34  ;;  %3520 = vmatpush1.bf16.msra.mxu1 %v13149_v35 }
 0x3e7   :  { %3480 = vmatprep.subr.bf16.mxu0 %v13150_v36  ;;  %3521 = vmatprep.subr.bf16.mxu1 %v13151_v26 }
 0x3ea   :  { %3481 = vmatpush1.bf16.msra.mxu0 %v13152_v29  ;;  %3522 = vmatpush1.bf16.msra.mxu1 %v13153_v37  ;;  %v13168_v29 = vld [vmem:[#allocation29_spill] sm:$0xff] }
 0x3eb   :  { %3482 = vmatprep.subr.bf16.mxu0 %v13154_v38  ;;  %3523 = vmatprep.subr.bf16.mxu1 %v13155_v2 }
 0x3ee   :  { %3483 = vmatpush1.bf16.msra.mxu0 %v13156_v50  ;;  %3524 = vmatpush1.bf16.msra.mxu1 %v13157_v54 }
 0x3ef   :  { %3484 = vmatprep.subr.bf16.mxu0 %v13158_v58  ;;  %3525 = vmatprep.subr.bf16.mxu1 %v13159_v40 }
 0x3f2   :  { %3485 = vmatpush1.bf16.msra.mxu0 %v13160_v60  ;;  %3526 = vmatpush1.bf16.msra.mxu1 %v13161_v10 }
 0x3f3   :  { %3486 = vmatprep.subr.bf16.mxu0 %v13162_v22  ;;  %3527 = vmatprep.subr.bf16.mxu1 %v13163_v49 }
 0x3f6   :  { %3487 = vmatpush1.bf16.msra.mxu0 %v13164_v6  ;;  %3528 = vmatpush1.bf16.msra.mxu1 %v13165_v7 }
 0x3f7   :  { %3714 = vmatprep.subr.bf16.mxu0 %v13166_v1  ;;  %3755 = vmatprep.subr.bf16.mxu1 %v13167_v3  ;;  %v13169_v1 = vld [vmem:[#allocation8_spill] sm:$0xff] }
 0x46c   :  { %v2631_v4 = vpop.f32.mrb[44].mxu0  ;;  %v2672_v5 = vpop.f32.mrb[44].mxu1 }
 0x46d   :  { %v2633_v8 = vpop.f32.mrb[45].mxu0  ;;  %v2674_v41 = vpop.f32.mrb[45].mxu1 }
 0x46e   :  { %v2635_v9 = vpop.f32.mrb[46].mxu0  ;;  %v2676_v43 = vpop.f32.mrb[46].mxu1 }
 0x46f   :  { %v2636_v15 = vpop.f32.mrb[47].mxu0  ;;  %v2677_v51 = vpop.f32.mrb[47].mxu1  ;;  %v13171_v9 = vld [vmem:[#allocation10_spill] sm:$0xff] }
 0x470   :  { %v13172_v15 = vld [vmem:[#allocation11_spill] sm:$0xff] }
 0x48c   :  { %v2873_v39 = vpop.f32.mrb[48].mxu0  ;;  %v2914_v0 = vpop.f32.mrb[48].mxu1 }
 0x48d   :  { %v2874_v52 = vadd.f32 %v2873_v39, %v2631_v4  ;;  %v2915_v42 = vadd.f32 %v2914_v0, %v2672_v5  ;;  %v2875_v62 = vpop.f32.mrb[49].mxu0  ;;  %v2916_v61 = vpop.f32.mrb[49].mxu1  ;;  %v13170_v4 = vld [vmem:[#allocation9_spill] sm:$0xff] }
 0x48e   :  { %v2876_v59 = vadd.f32 %v2875_v62, %v2633_v8  ;;  %v2917_v47 = vadd.f32 %v2916_v61, %v2674_v41  ;;  %v2877_v56 = vpop.f32.mrb[50].mxu0  ;;  %v2918_v63 = vpop.f32.mrb[50].mxu1 }
 0x48f   :  { %v2921_v32 = vadd.f32 %v2874_v52, %v10493_v12  ;;  %v2878_v33 = vpop.f32.mrb[51].mxu0  ;;  %v2919_v34 = vpop.f32.mrb[51].mxu1  ;;  %v2923_v37 = vadd.f32 %v2915_v42, %v13168_v29 }
 0x490   :  { %v2922_v35 = vadd.f32 %v2876_v59, %v10498_v16 }
 0x491   :  { %v2925_v36 = vmul.f32 0.5, %v2921_v32 }
 0x492   :  { %v2929_v26 = vmul.f32 0.5, %v2922_v35 }
 0x493   :  { %9448 = vtanh.f32 %v2925_v36 }
 0x494   :  { %9450 = vtanh.f32 %v2929_v26 }
 0x495   :  { %9452 = vtanh.f32 %v2923_v37 }
 0x49d   :  { %v9449_v38 = vpop.eup %9448 }
 0x49e   :  { %v9451_v2 = vpop.eup %9450  ;;  %v2927_v50 = vmul.f32 0.5, %v9449_v38 }
 0x49f   :  { %v2931_v54 = vmul.f32 0.5, %v9451_v2  ;;  %v9453_v40 = vpop.eup %9452 }
 0x4a0   :  { %v2928_v58 = vadd.f32 0.5, %v2927_v50 }
 0x4a1   :  { %v2932_v60 = vadd.f32 0.5, %v2931_v54 }
 0x4a2   :  { %v2939_v10 = vmul.f32 %v9453_v40, %v2928_v58 }
 0x4a3   :  { %v2938_v22 = vmul.f32 %v2932_v60, %v10973_v11  ;;  %v2924_v60 = vadd.f32 %v2917_v47, %v10521_v18  ;;  %v13182_v47 = vld [vmem:[#allocation65_spill] sm:$0xff] }
 0x4a5   :  { %v11252_v49 = vadd.f32 %v2939_v10, %v2938_v22  ;;  %v13183_v10 = vld [vmem:[#allocation66_spill] sm:$0xff]  ;;  %v13184_v22 = vld [vmem:[#allocation67_spill] sm:$0xff] }
 0x4ac   :  { %v3209_v6 = vpop.f32.mrb[52].mxu0  ;;  %v3250_v7 = vpop.f32.mrb[52].mxu1 }
 0x4ad   :  { %v3257_v3 = vadd.f32 %v3209_v6, %v13169_v1  ;;  %v3259_v5 = vadd.f32 %v3250_v7, %v13170_v4  ;;  %v3211_v8 = vpop.f32.mrb[53].mxu0  ;;  %v3252_v41 = vpop.f32.mrb[53].mxu1  ;;  %v13185_v6 = vld [vmem:[#allocation68_spill] sm:$0xff] }
 0x4ae   :  { %v3258_v43 = vadd.f32 %v3211_v8, %v13171_v9  ;;  %v3260_v51 = vadd.f32 %v3252_v41, %v13172_v15  ;;  %v3213_v39 = vpop.f32.mrb[54].mxu0  ;;  %v3254_v0 = vpop.f32.mrb[54].mxu1  ;;  %v11303_v4 = vld [vmem:[%s12893_s2 + $0x4] ss:$16 sps:$4 sm:$0xff]   ;;  %v11346_v8 = vld [vmem:[%s12893_s2 + $0x28] ss:$16 sps:$4 sm:$0xff]  }
 0x4af   :  { %v3261_v52 = vmul.f32 0.5, %v3257_v3  ;;  %v3214_v42 = vpop.f32.mrb[55].mxu0  ;;  %v3255_v62 = vpop.f32.mrb[55].mxu1  ;;  %v11353_v41 = vld [vmem:[%s12893_s2 + $0x44] ss:$16 sps:$4 sm:$0xff]  }
 0x4b0   :  { %v3265_v11 = vmul.f32 0.5, %v3258_v43  ;;  %v3270_v61 = vmul.f32 0.5, %v3260_v51  ;;  %v11358_v9 = vld [vmem:[%s12893_s2 + $0x4c] ss:$16 sps:$4 sm:$0xff]   ;;  %v11367_v43 = vld [vmem:[%s12893_s2 + $0x40] ss:$16 sps:$4 sm:$0xff]  }
 0x4b1   :  { %9454 = vtanh.f32 %v3261_v52  ;;  %v11372_v15 = vld [vmem:[%s12893_s2 + $0x48] ss:$16 sps:$4 sm:$0xff]   ;;  %v11379_v51 = vld [vmem:[%s12893_s2 + $0x64] ss:$16 sps:$4 sm:$0xff]   ;;  %v11384_v39 = vld [vmem:[%s12893_s2 + $0x6c] ss:$16 sps:$4 sm:$0xff]  }
 0x4b2   :  { %9456 = vtanh.f32 %v3265_v11  ;;  %v11391_v0 = vld [vmem:[%s12893_s2 + $0x60] ss:$16 sps:$4 sm:$0xff]   ;;  %v11396_v52 = vld [vmem:[%s12893_s2 + $0x68] ss:$16 sps:$4 sm:$0xff]   ;;  %v11403_v42 = vld [vmem:[%s12893_s2 + $0x84] ss:$16 sps:$4 sm:$0xff]  }
 0x4b3   :  { %9458 = vtanh.f32 %v3259_v5  ;;  %v11308_v5 = vld [vmem:[%s12893_s2 + $0xc] ss:$16 sps:$4 sm:$0xff]   ;;  %v11415_v11 = vld [vmem:[%s12893_s2 + $0x80] ss:$16 sps:$4 sm:$0xff]  }
 0x4b4   :  { %9460 = vtanh.f32 %v3270_v61  ;;  %v11408_v62 = vld [vmem:[%s12893_s2 + $0x8c] ss:$16 sps:$4 sm:$0xff]   ;;  %v11420_v61 = vld [vmem:[%s12893_s2 + $0x88] ss:$16 sps:$4 sm:$0xff]  }
 0x4bb   :  { %v9455_v59 = vpop.eup %9454 }
 0x4bc   :  { %v9457_v56 = vpop.eup %9456  ;;  %v3263_v63 = vmul.f32 0.5, %v9455_v59  ;;  %v11427_v59 = vld [vmem:[%s12893_s2 + $0xa4] ss:$16 sps:$4 sm:$0xff]  }
 0x4bd   :  { %v3267_v32 = vmul.f32 0.5, %v9457_v56  ;;  %v9459_v34 = vpop.eup %9458  ;;  %v11432_v56 = vld [vmem:[%s12893_s2 + $0xac] ss:$16 sps:$4 sm:$0xff]  }
 0x4be   :  { %v3264_v33 = vadd.f32 0.5, %v3263_v63  ;;  %v9461_v38 = vpop.eup %9460  ;;  %v11439_v63 = vld [vmem:[%s12893_s2 + $0xa0] ss:$16 sps:$4 sm:$0xff]  }
 0x4bf   :  { %v3268_v35 = vadd.f32 0.5, %v3267_v32  ;;  %v3272_v2 = vmul.f32 0.5, %v9461_v38  ;;  %v11444_v32 = vld [vmem:[%s12893_s2 + $0xa8] ss:$16 sps:$4 sm:$0xff]   ;;  %v11480_v38 = vld [vmem:[%s12893_s2 + $0xec] ss:$16 sps:$4 sm:$0xff]  }
 0x4c0   :  { %v3275_v36 = vmul.f32 %v9459_v34, %v3264_v33  ;;  %v11451_v33 = vld [vmem:[%s12893_s2 + $0xc4] ss:$16 sps:$4 sm:$0xff]   ;;  %v11456_v34 = vld [vmem:[%s12893_s2 + $0xcc] ss:$16 sps:$4 sm:$0xff]  }
 0x4c1   :  { %v3274_v26 = vmul.f32 %v3268_v35, %v10980_v57  ;;  %v3273_v50 = vadd.f32 0.5, %v3272_v2  ;;  %v2934_v57 = vmul.f32 0.5, %v2924_v60  ;;  %v11463_v35 = vld [vmem:[%s12893_s2 + $0xc0] ss:$16 sps:$4 sm:$0xff]  }
 0x4c2   :  { %v11487_v2 = vld [vmem:[%s12893_s2 + $0xe0] ss:$16 sps:$4 sm:$0xff]  }
 0x4c3   :  { %v11259_v37 = vadd.f32 %v3275_v36, %v3274_v26  ;;  %v11468_v36 = vld [vmem:[%s12893_s2 + $0xc8] ss:$16 sps:$4 sm:$0xff]   ;;  %v11475_v26 = vld [vmem:[%s12893_s2 + $0xe4] ss:$16 sps:$4 sm:$0xff]   ;;  %v11515_v60 = vld [vmem:[%s12894_s4] ss:$16 sps:$4 sm:$0xff]  }
 0x4c5   :  { %9462 = vtanh.f32 %v11259_v37 }
 0x4c6   :  { %9464 = vtanh.f32 %v2934_v57  ;;  %v11529_v57 = vld [vmem:[%s12894_s4 + $0x24] ss:$16 sps:$4 sm:$0xff]  }
 0x4c7   :  { %9466 = vtanh.f32 %v11252_v49  ;;  %13187 = vst [vmem:[#allocation31_spill] sm:$0xff] %v11529_v57 }
 0x4cf   :  { %v9463_v54 = vpop.eup %9462 }
 0x4d0   :  { %v3278_v58 = vmul.f32 %v9463_v54, %v3273_v50  ;;  %v11492_v50 = vld [vmem:[%s12893_s2 + $0xe8] ss:$16 sps:$4 sm:$0xff]   ;;  %v11505_v54 = vld [vmem:[%s12894_s4 + $0x4] ss:$16 sps:$4 sm:$0xff]  }
 0x4d2   :  { %v11262_v40 = vpack.c.bf16 %v3278_v58, %v3278_v58  ;;  %v11510_v58 = vld [vmem:[%s12894_s4 + $0xc] ss:$16 sps:$4 sm:$0xff]  }
 0x4d4   :  { %3505 = vmatmul.mubr.bf16.vlgmr.msra.gmra.mrb[56].mxu0 %v11262_v40  ;;  %3546 = vmatmul.mubr.bf16.vlgmr.msra.gmra.mrb[56].mxu1 %v11262_v40 }
 0x4d5   :  { %3715 = vmatpush1.bf16.msra.mxu0 %v10986_v20  ;;  %3756 = vmatpush1.bf16.msra.mxu1 %v10991_v30  ;;  %v13173_v20 = vld [vmem:[#allocation4_spill] sm:$0xff]  ;;  %v13174_v30 = vld [vmem:[#allocation5_spill] sm:$0xff] }
 0x4d6   :  { %3716 = vmatprep.subr.bf16.mxu0 %v10998_v17  ;;  %3757 = vmatprep.subr.bf16.mxu1 %v11003_v27  ;;  %v13175_v17 = vld [vmem:[#allocation6_spill] sm:$0xff]  ;;  %v13176_v27 = vld [vmem:[#allocation7_spill] sm:$0xff] }
 0x4d7   :  { %3746 = vmatprep.mubr.bf16.mxu0 %v13081_v31  ;;  %3787 = vmatprep.mubr.bf16.mxu1 %v13081_v31 }
 0x4d9   :  { %3717 = vmatpush1.bf16.msra.mxu0 %v11014_v45  ;;  %3758 = vmatpush1.bf16.msra.mxu1 %v11019_v44  ;;  %v13177_v45 = vld [vmem:[#allocation60_spill] sm:$0xff]  ;;  %v9465_v44 = vpop.eup %9464 }
 0x4da   :  { %3718 = vmatprep.subr.bf16.mxu0 %v11026_v14  ;;  %3759 = vmatprep.subr.bf16.mxu1 %v11031_v13  ;;  %v13178_v14 = vld [vmem:[#allocation61_spill] sm:$0xff]  ;;  %v13179_v13 = vld [vmem:[#allocation62_spill] sm:$0xff]  ;;  %v9467_v7 = vpop.eup %9466 }
 0x4dd   :  { %3719 = vmatpush1.bf16.msra.mxu0 %v11040_v23  ;;  %3760 = vmatpush1.bf16.msra.mxu1 %v11045_v48  ;;  %v13180_v23 = vld [vmem:[#allocation63_spill] sm:$0xff]  ;;  %v13181_v48 = vld [vmem:[#allocation64_spill] sm:$0xff] }
 0x4de   :  { %3720 = vmatprep.subr.bf16.mxu0 %v11052_v24  ;;  %3761 = vmatprep.subr.bf16.mxu1 %v13173_v20  ;;  %v2936_v24 = vmul.f32 0.5, %v9465_v44  ;;  %v11534_v20 = vld [vmem:[%s12894_s4 + $0x2c] ss:$16 sps:$4 sm:$0xff]   ;;  %v11563_v44 = vld [vmem:[%s12894_s4 + $0x40] ss:$16 sps:$4 sm:$0xff]  }
 0x4df   :  { %13188 = vst [vmem:[#allocation32_spill] sm:$0xff] %v11534_v20  ;;  %13193 = vst [vmem:[#allocation37_spill] sm:$0xff] %v11563_v44 }
 0x4e0   :  { %v2937_v1 = vadd.f32 0.5, %v2936_v24  ;;  %v11592_v24 = vld [vmem:[%s12894_s4 + $0x68] ss:$16 sps:$4 sm:$0xff]  }
 0x4e1   :  { %3721 = vmatpush1.bf16.msra.mxu0 %v13174_v30  ;;  %3762 = vmatpush1.bf16.msra.mxu1 %v13175_v17  ;;  %v11539_v30 = vld [vmem:[%s12894_s4 + $0x20] ss:$16 sps:$4 sm:$0xff]   ;;  %v11544_v17 = vld [vmem:[%s12894_s4 + $0x28] ss:$16 sps:$4 sm:$0xff]   ;;  %13198 = vst [vmem:[#allocation42_spill] sm:$0xff] %v11592_v24 }
 0x4e2   :  { %3722 = vmatprep.subr.bf16.mxu0 %v13176_v27  ;;  %3763 = vmatprep.subr.bf16.mxu1 %v13177_v45  ;;  %v11296_v3 = vmul.f32 %v9467_v7, %v2937_v1  ;;  %13189 = vst [vmem:[#allocation33_spill] sm:$0xff] %v11539_v30  ;;  %13190 = vst [vmem:[#allocation34_spill] sm:$0xff] %v11544_v17  ;;  %v11553_v27 = vld [vmem:[%s12894_s4 + $0x44] ss:$16 sps:$4 sm:$0xff]   ;;  %v11558_v45 = vld [vmem:[%s12894_s4 + $0x4c] ss:$16 sps:$4 sm:$0xff]  }
 0x4e3   :  { %13191 = vst [vmem:[#allocation35_spill] sm:$0xff] %v11553_v27  ;;  %13192 = vst [vmem:[#allocation36_spill] sm:$0xff] %v11558_v45  ;;  %v11625_v7 = vld [vmem:[%s12894_s4 + $0xa4] ss:$16 sps:$4 sm:$0xff]   ;;  %v11630_v1 = vld [vmem:[%s12894_s4 + $0xac] ss:$16 sps:$4 sm:$0xff]  }
 0x4e4   :  { %13186 = vst [vmem:[#allocation28_spill] sm:$0xff] %v11296_v3  ;;  %13203 = vst [vmem:[#allocation47_spill] sm:$0xff] %v11625_v7 }
 0x4e5   :  { %3723 = vmatpush1.bf16.msra.mxu0 %v13178_v14  ;;  %3764 = vmatpush1.bf16.msra.mxu1 %v13179_v13  ;;  %v11568_v14 = vld [vmem:[%s12894_s4 + $0x48] ss:$16 sps:$4 sm:$0xff]   ;;  %v11577_v13 = vld [vmem:[%s12894_s4 + $0x64] ss:$16 sps:$4 sm:$0xff]   ;;  %13204 = vst [vmem:[#allocation48_spill] sm:$0xff] %v11630_v1 }
 0x4e6   :  { %3724 = vmatprep.subr.bf16.mxu0 %v13180_v23  ;;  %3765 = vmatprep.subr.bf16.mxu1 %v13181_v48  ;;  %13194 = vst [vmem:[#allocation38_spill] sm:$0xff] %v11568_v14  ;;  %13195 = vst [vmem:[#allocation39_spill] sm:$0xff] %v11577_v13  ;;  %v11582_v23 = vld [vmem:[%s12894_s4 + $0x6c] ss:$16 sps:$4 sm:$0xff]   ;;  %v11587_v48 = vld [vmem:[%s12894_s4 + $0x60] ss:$16 sps:$4 sm:$0xff]  }
 0x4e7   :  { %13196 = vst [vmem:[#allocation40_spill] sm:$0xff] %v11582_v23  ;;  %13197 = vst [vmem:[#allocation41_spill] sm:$0xff] %v11587_v48 }
 0x4e9   :  { %3725 = vmatpush1.bf16.msra.mxu0 %v13182_v47  ;;  %3766 = vmatpush1.bf16.msra.mxu1 %v13183_v10  ;;  %v11601_v47 = vld [vmem:[%s12894_s4 + $0x84] ss:$16 sps:$4 sm:$0xff]   ;;  %v11606_v10 = vld [vmem:[%s12894_s4 + $0x8c] ss:$16 sps:$4 sm:$0xff]  }
 0x4ea   :  { %3726 = vmatprep.subr.bf16.mxu0 %v13184_v22  ;;  %3767 = vmatprep.subr.bf16.mxu1 %v13185_v6  ;;  %13199 = vst [vmem:[#allocation43_spill] sm:$0xff] %v11601_v47  ;;  %13200 = vst [vmem:[#allocation44_spill] sm:$0xff] %v11606_v10  ;;  %v11611_v22 = vld [vmem:[%s12894_s4 + $0x80] ss:$16 sps:$4 sm:$0xff]   ;;  %v11616_v6 = vld [vmem:[%s12894_s4 + $0x88] ss:$16 sps:$4 sm:$0xff]  }
 0x4eb   :  { %13201 = vst [vmem:[#allocation45_spill] sm:$0xff] %v11611_v22  ;;  %13202 = vst [vmem:[#allocation46_spill] sm:$0xff] %v11616_v6 }
 0x4ed   :  { %3727 = vmatpush1.bf16.msra.mxu0 %v11137_v55  ;;  %3768 = vmatpush1.bf16.msra.mxu1 %v11142_v19  ;;  %v11315_v55 = vld [vmem:[%s12893_s2] ss:$16 sps:$4 sm:$0xff]   ;;  %v2945_v19 = vpack.c.bf16 %v11296_v3, %v11296_v3  ;;  %v11640_v3 = vld [vmem:[%s12894_s4 + $0xa8] ss:$16 sps:$4 sm:$0xff]  }
 0x4ee   :  { %3728 = vmatprep.subr.bf16.mxu0 %v11149_v46  ;;  %3769 = vmatprep.subr.bf16.mxu1 %v11154_v53  ;;  %v11320_v53 = vld [vmem:[%s12893_s2 + $0x8] ss:$16 sps:$4 sm:$0xff]   ;;  %v11341_v46 = vld [vmem:[%s12893_s2 + $0x20] ss:$16 sps:$4 sm:$0xff]   ;;  %13206 = vst [vmem:[#allocation50_spill] sm:$0xff] %v11640_v3 }
 0x4f1   :  { %3729 = vmatpush1.bf16.msra.mxu0 %v11161_v21  ;;  %3770 = vmatpush1.bf16.msra.mxu1 %v11166_v28  ;;  %v11329_v28 = vld [vmem:[%s12893_s2 + $0x24] ss:$16 sps:$4 sm:$0xff]   ;;  %v11334_v21 = vld [vmem:[%s12893_s2 + $0x2c] ss:$16 sps:$4 sm:$0xff]  }
 0x4f2   :  { %4050 = vmatprep.subr.bf16.mxu0 %v11303_v4  ;;  %4091 = vmatprep.subr.bf16.mxu1 %v11308_v5 }
 0x4f4   :  { %3747 = vmatmul.mubr.bf16.vlgmr.msra.gmra.mrb[60].mxu0 %v2945_v19  ;;  %3788 = vmatmul.mubr.bf16.vlgmr.msra.gmra.mrb[60].mxu1 %v2945_v19  ;;  %v11635_v19 = vld [vmem:[%s12894_s4 + $0xa0] ss:$16 sps:$4 sm:$0xff]  }
 0x4f5   :  { %4051 = vmatpush1.bf16.msra.mxu0 %v11315_v55  ;;  %4092 = vmatpush1.bf16.msra.mxu1 %v11320_v53  ;;  %13205 = vst [vmem:[#allocation49_spill] sm:$0xff] %v11635_v19 }
 0x4f6   :  { %4052 = vmatprep.subr.bf16.mxu0 %v11329_v28  ;;  %4093 = vmatprep.subr.bf16.mxu1 %v11334_v21 }
 0x4f7   :  { %4082 = vmatprep.mubr.bf16.mxu0 %v13081_v31  ;;  %4123 = vmatprep.mubr.bf16.mxu1 %v13081_v31 }
 0x4f9   :  { %4053 = vmatpush1.bf16.msra.mxu0 %v11341_v46  ;;  %4094 = vmatpush1.bf16.msra.mxu1 %v11346_v8 }
 0x4fa   :  { %4054 = vmatprep.subr.bf16.mxu0 %v11353_v41  ;;  %4095 = vmatprep.subr.bf16.mxu1 %v11358_v9 }
 0x4fd   :  { %4055 = vmatpush1.bf16.msra.mxu0 %v11367_v43  ;;  %4096 = vmatpush1.bf16.msra.mxu1 %v11372_v15 }
 0x4fe   :  { %4056 = vmatprep.subr.bf16.mxu0 %v11379_v51  ;;  %4097 = vmatprep.subr.bf16.mxu1 %v11384_v39 }
 0x501   :  { %4057 = vmatpush1.bf16.msra.mxu0 %v11391_v0  ;;  %4098 = vmatpush1.bf16.msra.mxu1 %v11396_v52 }
 0x502   :  { %4058 = vmatprep.subr.bf16.mxu0 %v11403_v42  ;;  %4099 = vmatprep.subr.bf16.mxu1 %v11408_v62 }
 0x505   :  { %4059 = vmatpush1.bf16.msra.mxu0 %v11415_v11  ;;  %4100 = vmatpush1.bf16.msra.mxu1 %v11420_v61 }
 0x506   :  { %4060 = vmatprep.subr.bf16.mxu0 %v11427_v59  ;;  %4101 = vmatprep.subr.bf16.mxu1 %v11432_v56 }
 0x509   :  { %4061 = vmatpush1.bf16.msra.mxu0 %v11439_v63  ;;  %4102 = vmatpush1.bf16.msra.mxu1 %v11444_v32 }
 0x50a   :  { %4062 = vmatprep.subr.bf16.mxu0 %v11451_v33  ;;  %4103 = vmatprep.subr.bf16.mxu1 %v11456_v34 }
 0x50d   :  { %4063 = vmatpush1.bf16.msra.mxu0 %v11463_v35  ;;  %4104 = vmatpush1.bf16.msra.mxu1 %v11468_v36 }
 0x50e   :  { %4064 = vmatprep.subr.bf16.mxu0 %v11475_v26  ;;  %4105 = vmatprep.subr.bf16.mxu1 %v11480_v38 }
 0x511   :  { %4065 = vmatpush1.bf16.msra.mxu0 %v11487_v2  ;;  %4106 = vmatpush1.bf16.msra.mxu1 %v11492_v50 }
 0x512   :  { %4347 = vmatprep.subr.bf16.mxu0 %v11505_v54  ;;  %4388 = vmatprep.subr.bf16.mxu1 %v11510_v58 }
 0x514   :  { %4083 = vmatmul.mubr.bf16.vlgmr.msra.gmra.mrb[64].mxu0 %v11262_v40  ;;  %4124 = vmatmul.mubr.bf16.vlgmr.msra.gmra.mrb[64].mxu1 %v11262_v40  ;;  %v11520_v40 = vld [vmem:[%s12894_s4 + $0x8] ss:$16 sps:$4 sm:$0xff]  }
 0x515   :  { %4379 = vmatprep.mubr.bf16.mxu0 %v13081_v31  ;;  %4420 = vmatprep.mubr.bf16.mxu1 %v13081_v31 }
 0x516   :  { %4348 = vmatpush1.bf16.msra.mxu0 %v11515_v60  ;;  %4389 = vmatpush1.bf16.msra.mxu1 %v11520_v40 }
 0x517   :  { %4349 = vmatprep.subr.bf16.mxu0 %v11529_v57  ;;  %4390 = vmatprep.subr.bf16.mxu1 %v11534_v20 }
 0x51a   :  { %4350 = vmatpush1.bf16.msra.mxu0 %v11539_v30  ;;  %4391 = vmatpush1.bf16.msra.mxu1 %v11544_v17 }
 0x51b   :  { %4351 = vmatprep.subr.bf16.mxu0 %v11553_v27  ;;  %4392 = vmatprep.subr.bf16.mxu1 %v11558_v45 }
 0x51e   :  { %4352 = vmatpush1.bf16.msra.mxu0 %v11563_v44  ;;  %4393 = vmatpush1.bf16.msra.mxu1 %v11568_v14 }
 0x51f   :  { %4353 = vmatprep.subr.bf16.mxu0 %v11577_v13  ;;  %4394 = vmatprep.subr.bf16.mxu1 %v11582_v23 }
 0x522   :  { %4354 = vmatpush1.bf16.msra.mxu0 %v11587_v48  ;;  %4395 = vmatpush1.bf16.msra.mxu1 %v11592_v24 }
 0x523   :  { %4355 = vmatprep.subr.bf16.mxu0 %v11601_v47  ;;  %4396 = vmatprep.subr.bf16.mxu1 %v11606_v10 }
 0x526   :  { %4356 = vmatpush1.bf16.msra.mxu0 %v11611_v22  ;;  %4397 = vmatpush1.bf16.msra.mxu1 %v11616_v6  ;;  %v11654_v6 = vld [vmem:[%s12894_s4 + $0xcc] ss:$16 sps:$4 sm:$0xff]  }
 0x527   :  { %4357 = vmatprep.subr.bf16.mxu0 %v11625_v7  ;;  %4398 = vmatprep.subr.bf16.mxu1 %v11630_v1  ;;  %13208 = vst [vmem:[#allocation52_spill] sm:$0xff] %v11654_v6  ;;  %v11659_v7 = vld [vmem:[%s12894_s4 + $0xc0] ss:$16 sps:$4 sm:$0xff]   ;;  %v11678_v1 = vld [vmem:[%s12894_s4 + $0xec] ss:$16 sps:$4 sm:$0xff]  }
 0x528   :  { %13209 = vst [vmem:[#allocation53_spill] sm:$0xff] %v11659_v7  ;;  %13212 = vst [vmem:[#allocation56_spill] sm:$0xff] %v11678_v1 }
 0x52a   :  { %4358 = vmatpush1.bf16.msra.mxu0 %v11635_v19  ;;  %4399 = vmatpush1.bf16.msra.mxu1 %v11640_v3  ;;  %v11664_v19 = vld [vmem:[%s12894_s4 + $0xc8] ss:$16 sps:$4 sm:$0xff]   ;;  %v11673_v3 = vld [vmem:[%s12894_s4 + $0xe4] ss:$16 sps:$4 sm:$0xff]  }
 0x52b   :  { %13210 = vst [vmem:[#allocation54_spill] sm:$0xff] %v11664_v19  ;;  %4359 = vmatprep.subr.bf16.mxu0 %v11649_v25  ;;  %4400 = vmatprep.subr.bf16.mxu1 %v11654_v6  ;;  %13211 = vst [vmem:[#allocation55_spill] sm:$0xff] %v11673_v3  ;;  %v11683_v25 = vld [vmem:[%s12894_s4 + $0xe0] ss:$16 sps:$4 sm:$0xff]   ;;  %v11702_v6 = vld [vmem:[%s12895_s5 + $0xc] ss:$16 sps:$4 sm:$0xff]  }
 0x52c   :  { %13213 = vst [vmem:[#allocation57_spill] sm:$0xff] %v11683_v25  ;;  %13216 = vst [vmem:[#allocation8_spill] sm:$0xff] %v11702_v6 }
 0x52e   :  { %4360 = vmatpush1.bf16.msra.mxu0 %v11659_v7  ;;  %4401 = vmatpush1.bf16.msra.mxu1 %v11664_v19  ;;  %v11688_v7 = vld [vmem:[%s12894_s4 + $0xe8] ss:$16 sps:$4 sm:$0xff]   ;;  %v11697_v19 = vld [vmem:[%s12895_s5 + $0x4] ss:$16 sps:$4 sm:$0xff]  }
 0x52f   :  { %13214 = vst [vmem:[#allocation58_spill] sm:$0xff] %v11688_v7  ;;  %4361 = vmatprep.subr.bf16.mxu0 %v11673_v3  ;;  %4402 = vmatprep.subr.bf16.mxu1 %v11678_v1  ;;  %13215 = vst [vmem:[#allocation59_spill] sm:$0xff] %v11697_v19 }
 0x532   :  { %4362 = vmatpush1.bf16.msra.mxu0 %v11683_v25  ;;  %4403 = vmatpush1.bf16.msra.mxu1 %v11688_v7 }
 0x533   :  { %4589 = vmatprep.subr.bf16.mxu0 %v11697_v19  ;;  %4630 = vmatprep.subr.bf16.mxu1 %v11702_v6 }
 0x5a7   :  { %v3506_v3 = vpop.f32.mrb[56].mxu0  ;;  %v3547_v1 = vpop.f32.mrb[56].mxu1 }
 0x5a8   :  { %v3508_v22 = vpop.f32.mrb[57].mxu0  ;;  %v3549_v25 = vpop.f32.mrb[57].mxu1 }
 0x5a9   :  { %v3510_v10 = vpop.f32.mrb[58].mxu0  ;;  %v3551_v7 = vpop.f32.mrb[58].mxu1 }
 0x5aa   :  { %v3511_v47 = vpop.f32.mrb[59].mxu0  ;;  %v3552_v24 = vpop.f32.mrb[59].mxu1 }
 0x5c7   :  { %v3748_v48 = vpop.f32.mrb[60].mxu0  ;;  %v3789_v23 = vpop.f32.mrb[60].mxu1 }
 0x5c8   :  { %v3749_v13 = vadd.f32 %v3748_v48, %v3506_v3  ;;  %v3790_v14 = vadd.f32 %v3789_v23, %v3547_v1  ;;  %v3750_v44 = vpop.f32.mrb[61].mxu0  ;;  %v3791_v45 = vpop.f32.mrb[61].mxu1 }
 0x5c9   :  { %v3751_v27 = vadd.f32 %v3750_v44, %v3508_v22  ;;  %v11706_v17 = vadd.f32 %v3791_v45, %v3549_v25  ;;  %v3752_v19 = vpop.f32.mrb[62].mxu0  ;;  %v3793_v30 = vpop.f32.mrb[62].mxu1 }
 0x5ca   :  { %v3796_v6 = vadd.f32 %v3749_v13, %v10493_v12  ;;  %v3753_v20 = vpop.f32.mrb[63].mxu0  ;;  %v3794_v57 = vpop.f32.mrb[63].mxu1  ;;  %v3798_v24 = vadd.f32 %v3790_v14, %v13168_v29  ;;  %v13218_v19 = vld [vmem:[#allocation13_spill] sm:$0xff] }
 0x5cb   :  { %v3797_v10 = vadd.f32 %v3751_v27, %v10498_v16 }
 0x5cc   :  { %v3800_v7 = vmul.f32 0.5, %v3796_v6  ;;  %v13217_v6 = vld [vmem:[#allocation12_spill] sm:$0xff] }
 0x5cd   :  { %v3804_v47 = vmul.f32 0.5, %v3797_v10 }
 0x5ce   :  { %9468 = vtanh.f32 %v3800_v7 }
 0x5cf   :  { %9470 = vtanh.f32 %v3804_v47  ;;  %v13219_v47 = vld [vmem:[#allocation14_spill] sm:$0xff] }
 0x5d0   :  { %9472 = vtanh.f32 %v3798_v24 }
 0x5d8   :  { %v9469_v3 = vpop.eup %9468 }
 0x5d9   :  { %v9471_v23 = vpop.eup %9470  ;;  %v3802_v44 = vmul.f32 0.5, %v9469_v3  ;;  %v13220_v3 = vld [vmem:[#allocation15_spill] sm:$0xff] }
 0x5da   :  { %v3806_v25 = vmul.f32 0.5, %v9471_v23  ;;  %v9473_v48 = vpop.eup %9472 }
 0x5db   :  { %v3803_v45 = vadd.f32 0.5, %v3802_v44 }
 0x5dc   :  { %v3807_v30 = vadd.f32 0.5, %v3806_v25 }
 0x5dd   :  { %v3814_v22 = vmul.f32 %v9473_v48, %v3803_v45 }
 0x5de   :  { %v3813_v20 = vmul.f32 %v3807_v30, %v11252_v49 }
 0x5e0   :  { %v11712_v57 = vadd.f32 %v3814_v22, %v3813_v20 }
 0x5e7   :  { %v4084_v27 = vpop.f32.mrb[64].mxu0  ;;  %v4125_v13 = vpop.f32.mrb[64].mxu1 }
 0x5e8   :  { %v4132_v1 = vadd.f32 %v4084_v27, %v13217_v6  ;;  %v4134_v14 = vadd.f32 %v4125_v13, %v13218_v19  ;;  %v4086_v10 = vpop.f32.mrb[65].mxu0  ;;  %v4127_v7 = vpop.f32.mrb[65].mxu1 }
 0x5e9   :  { %v4133_v24 = vadd.f32 %v4086_v10, %v13219_v47  ;;  %v4135_v23 = vadd.f32 %v4127_v7, %v13220_v3  ;;  %v4088_v44 = vpop.f32.mrb[66].mxu0  ;;  %v4129_v29 = vpop.f32.mrb[66].mxu1 }
 0x5ea   :  { %v4136_v25 = vmul.f32 0.5, %v4132_v1  ;;  %v4089_v45 = vpop.f32.mrb[67].mxu0  ;;  %v4130_v48 = vpop.f32.mrb[67].mxu1  ;;  %v11725_v44 = vld [vmem:[%s12895_s5] ss:$16 sps:$4 sm:$0xff]  }
 0x5eb   :  { %v4140_v49 = vmul.f32 0.5, %v4133_v24  ;;  %v4145_v30 = vmul.f32 0.5, %v4135_v23  ;;  %v11737_v45 = vld [vmem:[%s12895_s5 + $0x24] ss:$16 sps:$4 sm:$0xff]   ;;  %v11742_v48 = vld [vmem:[%s12895_s5 + $0x2c] ss:$16 sps:$4 sm:$0xff]  }
 0x5ec   :  { %9474 = vtanh.f32 %v4136_v25  ;;  %v11730_v25 = vld [vmem:[%s12895_s5 + $0x8] ss:$16 sps:$4 sm:$0xff]  }
 0x5ed   :  { %9476 = vtanh.f32 %v4140_v49  ;;  %v3799_v49 = vadd.f32 %v11706_v17, %v10521_v18  ;;  %v11765_v17 = vld [vmem:[%s12895_s5 + $0x44] ss:$16 sps:$4 sm:$0xff]  }
 0x5ee   :  { %9478 = vtanh.f32 %v4134_v14 }
 0x5ef   :  { %9480 = vtanh.f32 %v4145_v30  ;;  %v11753_v30 = vld [vmem:[%s12895_s5 + $0x20] ss:$16 sps:$4 sm:$0xff]  }
 0x5f6   :  { %v9475_v22 = vpop.eup %9474 }
 0x5f7   :  { %v9477_v20 = vpop.eup %9476  ;;  %v4138_v27 = vmul.f32 0.5, %v9475_v22  ;;  %v11758_v22 = vld [vmem:[%s12895_s5 + $0x28] ss:$16 sps:$4 sm:$0xff]  }
 0x5f8   :  { %v4142_v13 = vmul.f32 0.5, %v9477_v20  ;;  %v9479_v19 = vpop.eup %9478  ;;  %v11770_v20 = vld [vmem:[%s12895_s5 + $0x4c] ss:$16 sps:$4 sm:$0xff]  }
 0x5f9   :  { %v4139_v6 = vadd.f32 0.5, %v4138_v27  ;;  %v9481_v1 = vpop.eup %9480  ;;  %v3809_v27 = vmul.f32 0.5, %v3799_v49  ;;  %v11845_v49 = vld [vmem:[%s12895_s5 + $0xac] ss:$16 sps:$4 sm:$0xff]  }
 0x5fa   :  { %v4143_v10 = vadd.f32 0.5, %v4142_v13  ;;  %v4147_v24 = vmul.f32 0.5, %v9481_v1  ;;  %v11779_v13 = vld [vmem:[%s12895_s5 + $0x40] ss:$16 sps:$4 sm:$0xff]   ;;  %v11815_v1 = vld [vmem:[%s12895_s5 + $0x84] ss:$16 sps:$4 sm:$0xff]  }
 0x5fb   :  { %v4150_v47 = vmul.f32 %v9479_v19, %v4139_v6  ;;  %v11784_v6 = vld [vmem:[%s12895_s5 + $0x48] ss:$16 sps:$4 sm:$0xff]   ;;  %v11791_v19 = vld [vmem:[%s12895_s5 + $0x64] ss:$16 sps:$4 sm:$0xff]   ;;  %13224 = vst [vmem:[#allocation4_spill] sm:$0xff] %v11815_v1  ;;  %13229 = vst [vmem:[#allocation61_spill] sm:$0xff] %v11845_v49 }
 0x5fc   :  { %v4149_v7 = vmul.f32 %v4143_v10, %v11259_v37  ;;  %v4148_v3 = vadd.f32 0.5, %v4147_v24  ;;  %v11796_v10 = vld [vmem:[%s12895_s5 + $0x6c] ss:$16 sps:$4 sm:$0xff]  }
 0x5fd   :  { %13221 = vst [vmem:[#allocation9_spill] sm:$0xff] %v11796_v10  ;;  %v11820_v24 = vld [vmem:[%s12895_s5 + $0x8c] ss:$16 sps:$4 sm:$0xff]  }
 0x5fe   :  { %v11719_v29 = vadd.f32 %v4150_v47, %v4149_v7  ;;  %v11803_v47 = vld [vmem:[%s12895_s5 + $0x60] ss:$16 sps:$4 sm:$0xff]   ;;  %v11808_v7 = vld [vmem:[%s12895_s5 + $0x68] ss:$16 sps:$4 sm:$0xff]   ;;  %13225 = vst [vmem:[#allocation5_spill] sm:$0xff] %v11820_v24 }
 0x5ff   :  { %13222 = vst [vmem:[#allocation10_spill] sm:$0xff] %v11803_v47  ;;  %13223 = vst [vmem:[#allocation11_spill] sm:$0xff] %v11808_v7 }
 0x600   :  { %9482 = vtanh.f32 %v11719_v29 }
 0x601   :  { %9484 = vtanh.f32 %v3809_v27 }
 0x602   :  { %9486 = vtanh.f32 %v11712_v57 }
 0x60a   :  { %v9483_v14 = vpop.eup %9482 }
 0x60b   :  { %v4153_v23 = vmul.f32 %v9483_v14, %v4148_v3  ;;  %v11828_v3 = vld [vmem:[%s12895_s5 + $0x80] ss:$16 sps:$4 sm:$0xff]   ;;  %v11833_v14 = vld [vmem:[%s12895_s5 + $0x88] ss:$16 sps:$4 sm:$0xff]   ;;  %v9485_v27 = vpop.eup %9484 }
 0x60c   :  { %13226 = vst [vmem:[#allocation6_spill] sm:$0xff] %v11828_v3  ;;  %13227 = vst [vmem:[#allocation7_spill] sm:$0xff] %v11833_v14 }
 0x60d   :  { %v11732_v37 = vpack.c.bf16 %v4153_v23, %v4153_v23  ;;  %v11840_v23 = vld [vmem:[%s12895_s5 + $0xa4] ss:$16 sps:$4 sm:$0xff]  }
 0x60e   :  { %13228 = vst [vmem:[#allocation60_spill] sm:$0xff] %v11840_v23 }
 0x60f   :  { %4380 = vmatmul.mubr.bf16.vlgmr.msra.gmra.mrb[68].mxu0 %v11732_v37  ;;  %4421 = vmatmul.mubr.bf16.vlgmr.msra.gmra.mrb[68].mxu1 %v11732_v37 }
 0x610   :  { %4590 = vmatpush1.bf16.msra.mxu0 %v11725_v44  ;;  %4631 = vmatpush1.bf16.msra.mxu1 %v11730_v25 }
 0x611   :  { %4591 = vmatprep.subr.bf16.mxu0 %v11737_v45  ;;  %4632 = vmatprep.subr.bf16.mxu1 %v11742_v48 }
 0x612   :  { %4621 = vmatprep.mubr.bf16.mxu0 %v13081_v31  ;;  %4662 = vmatprep.mubr.bf16.mxu1 %v13081_v31 }
 0x614   :  { %4592 = vmatpush1.bf16.msra.mxu0 %v11753_v30  ;;  %4633 = vmatpush1.bf16.msra.mxu1 %v11758_v22 }
 0x615   :  { %4593 = vmatprep.subr.bf16.mxu0 %v11765_v17  ;;  %4634 = vmatprep.subr.bf16.mxu1 %v11770_v20 }
 0x618   :  { %4594 = vmatpush1.bf16.msra.mxu0 %v11779_v13  ;;  %4635 = vmatpush1.bf16.msra.mxu1 %v11784_v6 }
 0x619   :  { %4595 = vmatprep.subr.bf16.mxu0 %v11791_v19  ;;  %4636 = vmatprep.subr.bf16.mxu1 %v11796_v10 }
 0x61c   :  { %4596 = vmatpush1.bf16.msra.mxu0 %v11803_v47  ;;  %4637 = vmatpush1.bf16.msra.mxu1 %v11808_v7  ;;  %v3811_v7 = vmul.f32 0.5, %v9485_v27  ;;  %v11888_v27 = vld [vmem:[%s12895_s5 + $0xe4] ss:$16 sps:$4 sm:$0xff]  }
 0x61d   :  { %4597 = vmatprep.subr.bf16.mxu0 %v11815_v1  ;;  %4638 = vmatprep.subr.bf16.mxu1 %v11820_v24  ;;  %v11852_v1 = vld [vmem:[%s12895_s5 + $0xa0] ss:$16 sps:$4 sm:$0xff]   ;;  %v11857_v24 = vld [vmem:[%s12895_s5 + $0xa8] ss:$16 sps:$4 sm:$0xff]  }
 0x61e   :  { %13230 = vst [vmem:[#allocation62_spill] sm:$0xff] %v11852_v1  ;;  %13231 = vst [vmem:[#allocation63_spill] sm:$0xff] %v11857_v24  ;;  %v3812_v47 = vadd.f32 0.5, %v3811_v7 }
 0x620   :  { %4598 = vmatpush1.bf16.msra.mxu0 %v11828_v3  ;;  %4639 = vmatpush1.bf16.msra.mxu1 %v11833_v14  ;;  %v11864_v3 = vld [vmem:[%s12895_s5 + $0xc4] ss:$16 sps:$4 sm:$0xff]   ;;  %v11869_v14 = vld [vmem:[%s12895_s5 + $0xcc] ss:$16 sps:$4 sm:$0xff]  }
 0x621   :  { %4599 = vmatprep.subr.bf16.mxu0 %v11840_v23  ;;  %4640 = vmatprep.subr.bf16.mxu1 %v11845_v49  ;;  %13232 = vst [vmem:[#allocation64_spill] sm:$0xff] %v11864_v3  ;;  %13233 = vst [vmem:[#allocation65_spill] sm:$0xff] %v11869_v14  ;;  %v11876_v23 = vld [vmem:[%s12895_s5 + $0xc0] ss:$16 sps:$4 sm:$0xff]   ;;  %v11881_v49 = vld [vmem:[%s12895_s5 + $0xc8] ss:$16 sps:$4 sm:$0xff]  }
 0x624   :  { %4600 = vmatpush1.bf16.msra.mxu0 %v11852_v1  ;;  %4641 = vmatpush1.bf16.msra.mxu1 %v11857_v24  ;;  %v11893_v24 = vld [vmem:[%s12895_s5 + $0xec] ss:$16 sps:$4 sm:$0xff]   ;;  %v9487_v1 = vpop.eup %9486 }
 0x625   :  { %4601 = vmatprep.subr.bf16.mxu0 %v11864_v3  ;;  %4642 = vmatprep.subr.bf16.mxu1 %v11869_v14  ;;  %v11900_v14 = vld [vmem:[%s12895_s5 + $0xe0] ss:$16 sps:$4 sm:$0xff]   ;;  %v11905_v3 = vld [vmem:[%s12895_s5 + $0xe8] ss:$16 sps:$4 sm:$0xff]   ;;  %v11907_v10 = vmul.f32 %v9487_v1, %v3812_v47 }
 0x627   :  { %13234 = vst [vmem:[#allocation66_spill] sm:$0xff] %v11907_v10  ;;  %v3820_v7 = vpack.c.bf16 %v11907_v10, %v11907_v10  ;;  %v12388_v10 = vld [vmem:[%s12894_s4 + $0xc4] ss:$16 sps:$4 sm:$0xff]  }
 0x628   :  { %4602 = vmatpush1.bf16.msra.mxu0 %v11876_v23  ;;  %4643 = vmatpush1.bf16.msra.mxu1 %v11881_v49 }
 0x629   :  { %4603 = vmatprep.subr.bf16.mxu0 %v11888_v27  ;;  %4644 = vmatprep.subr.bf16.mxu1 %v11893_v24 }
 0x62c   :  { %4604 = vmatpush1.bf16.msra.mxu0 %v11900_v14  ;;  %4645 = vmatpush1.bf16.msra.mxu1 %v11905_v3 }
 0x62d   :  { %4925 = vmatprep.subr.bf16.mxu0 %v11303_v4  ;;  %4966 = vmatprep.subr.bf16.mxu1 %v11308_v5  ;;  %v13235_v4 = vld [vmem:[#allocation31_spill] sm:$0xff]  ;;  %v13236_v5 = vld [vmem:[#allocation32_spill] sm:$0xff] }
 0x62f   :  { %4622 = vmatmul.mubr.bf16.vlgmr.msra.gmra.mrb[72].mxu0 %v3820_v7  ;;  %4663 = vmatmul.mubr.bf16.vlgmr.msra.gmra.mrb[72].mxu1 %v3820_v7 }
 0x630   :  { %4926 = vmatpush1.bf16.msra.mxu0 %v11315_v55  ;;  %4967 = vmatpush1.bf16.msra.mxu1 %v11320_v53  ;;  %v13237_v55 = vld [vmem:[#allocation33_spill] sm:$0xff]  ;;  %v13238_v53 = vld [vmem:[#allocation34_spill] sm:$0xff] }
 0x631   :  { %4927 = vmatprep.subr.bf16.mxu0 %v11329_v28  ;;  %4968 = vmatprep.subr.bf16.mxu1 %v11334_v21  ;;  %v13239_v28 = vld [vmem:[#allocation35_spill] sm:$0xff]  ;;  %v13240_v21 = vld [vmem:[#allocation36_spill] sm:$0xff] }
 0x632   :  { %4957 = vmatprep.mubr.bf16.mxu0 %v13081_v31  ;;  %4998 = vmatprep.mubr.bf16.mxu1 %v13081_v31 }
 0x634   :  { %4928 = vmatpush1.bf16.msra.mxu0 %v11341_v46  ;;  %4969 = vmatpush1.bf16.msra.mxu1 %v11346_v8  ;;  %v13241_v46 = vld [vmem:[#allocation37_spill] sm:$0xff]  ;;  %v13242_v8 = vld [vmem:[#allocation38_spill] sm:$0xff] }
 0x635   :  { %4929 = vmatprep.subr.bf16.mxu0 %v11353_v41  ;;  %4970 = vmatprep.subr.bf16.mxu1 %v11358_v9  ;;  %v13243_v41 = vld [vmem:[#allocation39_spill] sm:$0xff]  ;;  %v13244_v9 = vld [vmem:[#allocation40_spill] sm:$0xff] }
 0x638   :  { %4930 = vmatpush1.bf16.msra.mxu0 %v11367_v43  ;;  %4971 = vmatpush1.bf16.msra.mxu1 %v11372_v15  ;;  %v13245_v43 = vld [vmem:[#allocation41_spill] sm:$0xff]  ;;  %v13246_v15 = vld [vmem:[#allocation42_spill] sm:$0xff] }
 0x639   :  { %4931 = vmatprep.subr.bf16.mxu0 %v11379_v51  ;;  %4972 = vmatprep.subr.bf16.mxu1 %v11384_v39  ;;  %v13247_v51 = vld [vmem:[#allocation43_spill] sm:$0xff]  ;;  %v13248_v39 = vld [vmem:[#allocation44_spill] sm:$0xff] }
 0x63c   :  { %4932 = vmatpush1.bf16.msra.mxu0 %v11391_v0  ;;  %4973 = vmatpush1.bf16.msra.mxu1 %v11396_v52  ;;  %v13249_v0 = vld [vmem:[#allocation45_spill] sm:$0xff]  ;;  %v13250_v52 = vld [vmem:[#allocation46_spill] sm:$0xff] }
 0x63d   :  { %4933 = vmatprep.subr.bf16.mxu0 %v11403_v42  ;;  %4974 = vmatprep.subr.bf16.mxu1 %v11408_v62  ;;  %v13251_v42 = vld [vmem:[#allocation47_spill] sm:$0xff]  ;;  %v13252_v62 = vld [vmem:[#allocation48_spill] sm:$0xff]  ;;  %13304 = vst [vmem:[#allocation46_spill] sm:$0xff] %v12388_v10 }
 0x640   :  { %4934 = vmatpush1.bf16.msra.mxu0 %v11415_v11  ;;  %4975 = vmatpush1.bf16.msra.mxu1 %v11420_v61  ;;  %v13253_v11 = vld [vmem:[#allocation49_spill] sm:$0xff]  ;;  %v13254_v61 = vld [vmem:[#allocation50_spill] sm:$0xff] }
 0x641   :  { %4935 = vmatprep.subr.bf16.mxu0 %v11427_v59  ;;  %4976 = vmatprep.subr.bf16.mxu1 %v11432_v56  ;;  %v13255_v59 = vld [vmem:[#allocation51_spill] sm:$0xff]  ;;  %v13256_v56 = vld [vmem:[#allocation52_spill] sm:$0xff] }
 0x644   :  { %4936 = vmatpush1.bf16.msra.mxu0 %v11439_v63  ;;  %4977 = vmatpush1.bf16.msra.mxu1 %v11444_v32  ;;  %v13257_v63 = vld [vmem:[#allocation53_spill] sm:$0xff]  ;;  %v13258_v32 = vld [vmem:[#allocation54_spill] sm:$0xff] }
 0x645   :  { %4937 = vmatprep.subr.bf16.mxu0 %v11451_v33  ;;  %4978 = vmatprep.subr.bf16.mxu1 %v11456_v34  ;;  %v13259_v33 = vld [vmem:[#allocation55_spill] sm:$0xff]  ;;  %v13260_v34 = vld [vmem:[#allocation56_spill] sm:$0xff] }
 0x648   :  { %4938 = vmatpush1.bf16.msra.mxu0 %v11463_v35  ;;  %4979 = vmatpush1.bf16.msra.mxu1 %v11468_v36  ;;  %v13261_v35 = vld [vmem:[#allocation57_spill] sm:$0xff]  ;;  %v13262_v36 = vld [vmem:[#allocation58_spill] sm:$0xff] }
 0x649   :  { %4939 = vmatprep.subr.bf16.mxu0 %v11475_v26  ;;  %4980 = vmatprep.subr.bf16.mxu1 %v11480_v38  ;;  %v13263_v26 = vld [vmem:[#allocation59_spill] sm:$0xff]  ;;  %v13264_v38 = vld [vmem:[#allocation8_spill] sm:$0xff] }
 0x64c   :  { %4940 = vmatpush1.bf16.msra.mxu0 %v11487_v2  ;;  %4981 = vmatpush1.bf16.msra.mxu1 %v11492_v50 }
 0x64d   :  { %5222 = vmatprep.subr.bf16.mxu0 %v11505_v54  ;;  %5263 = vmatprep.subr.bf16.mxu1 %v11510_v58 }
 0x64f   :  { %4958 = vmatmul.mubr.bf16.vlgmr.msra.gmra.mrb[76].mxu0 %v11732_v37  ;;  %4999 = vmatmul.mubr.bf16.vlgmr.msra.gmra.mrb[76].mxu1 %v11732_v37 }
 0x650   :  { %5223 = vmatpush1.bf16.msra.mxu0 %v11515_v60  ;;  %5264 = vmatpush1.bf16.msra.mxu1 %v11520_v40 }
 0x651   :  { %5224 = vmatprep.subr.bf16.mxu0 %v13235_v4  ;;  %5265 = vmatprep.subr.bf16.mxu1 %v13236_v5 }
 0x652   :  { %5254 = vmatprep.mubr.bf16.mxu0 %v13081_v31  ;;  %5295 = vmatprep.mubr.bf16.mxu1 %v13081_v31 }
 0x654   :  { %5225 = vmatpush1.bf16.msra.mxu0 %v13237_v55  ;;  %5266 = vmatpush1.bf16.msra.mxu1 %v13238_v53 }
 0x655   :  { %5226 = vmatprep.subr.bf16.mxu0 %v13239_v28  ;;  %5267 = vmatprep.subr.bf16.mxu1 %v13240_v21 }
 0x658   :  { %5227 = vmatpush1.bf16.msra.mxu0 %v13241_v46  ;;  %5268 = vmatpush1.bf16.msra.mxu1 %v13242_v8 }
 0x659   :  { %5228 = vmatprep.subr.bf16.mxu0 %v13243_v41  ;;  %5269 = vmatprep.subr.bf16.mxu1 %v13244_v9 }
 0x65c   :  { %5229 = vmatpush1.bf16.msra.mxu0 %v13245_v43  ;;  %5270 = vmatpush1.bf16.msra.mxu1 %v13246_v15 }
 0x65d   :  { %5230 = vmatprep.subr.bf16.mxu0 %v13247_v51  ;;  %5271 = vmatprep.subr.bf16.mxu1 %v13248_v39 }
 0x660   :  { %5231 = vmatpush1.bf16.msra.mxu0 %v13249_v0  ;;  %5272 = vmatpush1.bf16.msra.mxu1 %v13250_v52  ;;  %v13265_v0 = vld [vmem:[#allocation29_spill] sm:$0xff] }
 0x661   :  { %5232 = vmatprep.subr.bf16.mxu0 %v13251_v42  ;;  %5273 = vmatprep.subr.bf16.mxu1 %v13252_v62 }
 0x664   :  { %5233 = vmatpush1.bf16.msra.mxu0 %v13253_v11  ;;  %5274 = vmatpush1.bf16.msra.mxu1 %v13254_v61 }
 0x665   :  { %5234 = vmatprep.subr.bf16.mxu0 %v13255_v59  ;;  %5275 = vmatprep.subr.bf16.mxu1 %v13256_v56 }
 0x668   :  { %5235 = vmatpush1.bf16.msra.mxu0 %v13257_v63  ;;  %5276 = vmatpush1.bf16.msra.mxu1 %v13258_v32 }
 0x669   :  { %5236 = vmatprep.subr.bf16.mxu0 %v13259_v33  ;;  %5277 = vmatprep.subr.bf16.mxu1 %v13260_v34 }
 0x66c   :  { %5237 = vmatpush1.bf16.msra.mxu0 %v13261_v35  ;;  %5278 = vmatpush1.bf16.msra.mxu1 %v13262_v36 }
 0x66d   :  { %5464 = vmatprep.subr.bf16.mxu0 %v13263_v26  ;;  %5505 = vmatprep.subr.bf16.mxu1 %v13264_v38  ;;  %v13266_v26 = vld [vmem:[#allocation16_spill] sm:$0xff] }
 0x6e2   :  { %v4381_v2 = vpop.f32.mrb[68].mxu0  ;;  %v4422_v50 = vpop.f32.mrb[68].mxu1 }
 0x6e3   :  { %v4383_v54 = vpop.f32.mrb[69].mxu0  ;;  %v4424_v58 = vpop.f32.mrb[69].mxu1 }
 0x6e4   :  { %v4385_v60 = vpop.f32.mrb[70].mxu0  ;;  %v4426_v40 = vpop.f32.mrb[70].mxu1 }
 0x6e5   :  { %v4386_v37 = vpop.f32.mrb[71].mxu0  ;;  %v4427_v47 = vpop.f32.mrb[71].mxu1  ;;  %v13268_v60 = vld [vmem:[#allocation18_spill] sm:$0xff] }
 0x6e6   :  { %v13269_v37 = vld [vmem:[#allocation19_spill] sm:$0xff] }
 0x702   :  { %v4623_v1 = vpop.f32.mrb[72].mxu0  ;;  %v4664_v7 = vpop.f32.mrb[72].mxu1 }
 0x703   :  { %v4624_v4 = vadd.f32 %v4623_v1, %v4381_v2  ;;  %v4665_v5 = vadd.f32 %v4664_v7, %v4422_v50  ;;  %v4625_v55 = vpop.f32.mrb[73].mxu0  ;;  %v4666_v53 = vpop.f32.mrb[73].mxu1  ;;  %v13267_v2 = vld [vmem:[#allocation17_spill] sm:$0xff] }
 0x704   :  { %v4626_v28 = vadd.f32 %v4625_v55, %v4383_v54  ;;  %v4667_v21 = vadd.f32 %v4666_v53, %v4424_v58  ;;  %v4627_v46 = vpop.f32.mrb[74].mxu0  ;;  %v4668_v8 = vpop.f32.mrb[74].mxu1 }
 0x705   :  { %v4671_v41 = vadd.f32 %v4624_v4, %v10493_v12  ;;  %v4628_v9 = vpop.f32.mrb[75].mxu0  ;;  %v4669_v43 = vpop.f32.mrb[75].mxu1  ;;  %v4673_v52 = vadd.f32 %v4665_v5, %v13265_v0 }
 0x706   :  { %v4672_v15 = vadd.f32 %v4626_v28, %v10498_v16 }
 0x707   :  { %v4675_v51 = vmul.f32 0.5, %v4671_v41 }
 0x708   :  { %v4679_v39 = vmul.f32 0.5, %v4672_v15 }
 0x709   :  { %9488 = vtanh.f32 %v4675_v51 }
 0x70a   :  { %9490 = vtanh.f32 %v4679_v39 }
 0x70b   :  { %9492 = vtanh.f32 %v4673_v52 }
 0x713   :  { %v9489_v42 = vpop.eup %9488 }
 0x714   :  { %v9491_v62 = vpop.eup %9490  ;;  %v4677_v11 = vmul.f32 0.5, %v9489_v42 }
 0x715   :  { %v4681_v61 = vmul.f32 0.5, %v9491_v62  ;;  %v9493_v56 = vpop.eup %9492 }
 0x716   :  { %v4678_v59 = vadd.f32 0.5, %v4677_v11 }
 0x717   :  { %v4682_v63 = vadd.f32 0.5, %v4681_v61 }
 0x718   :  { %v4689_v32 = vmul.f32 %v9493_v56, %v4678_v59 }
 0x719   :  { %v4688_v33 = vmul.f32 %v4682_v63, %v11712_v57  ;;  %v4674_v63 = vadd.f32 %v4667_v21, %v10521_v18  ;;  %v13279_v21 = vld [vmem:[#allocation62_spill] sm:$0xff] }
 0x71b   :  { %v11991_v34 = vadd.f32 %v4689_v32, %v4688_v33  ;;  %v13280_v32 = vld [vmem:[#allocation63_spill] sm:$0xff]  ;;  %v13281_v33 = vld [vmem:[#allocation64_spill] sm:$0xff] }
 0x722   :  { %v4959_v35 = vpop.f32.mrb[76].mxu0  ;;  %v5000_v36 = vpop.f32.mrb[76].mxu1 }
 0x723   :  { %v5007_v38 = vadd.f32 %v4959_v35, %v13266_v26  ;;  %v5009_v50 = vadd.f32 %v5000_v36, %v13267_v2  ;;  %v4961_v54 = vpop.f32.mrb[77].mxu0  ;;  %v5002_v58 = vpop.f32.mrb[77].mxu1  ;;  %v13282_v35 = vld [vmem:[#allocation65_spill] sm:$0xff]  ;;  %v12042_v2 = vld [vmem:[%s12893_s2 + $0x4] ss:$16 sps:$4 sm:$0xff]  }
 0x724   :  { %v5008_v40 = vadd.f32 %v4961_v54, %v13268_v60  ;;  %v5010_v47 = vadd.f32 %v5002_v58, %v13269_v37  ;;  %v4963_v1 = vpop.f32.mrb[78].mxu0  ;;  %v5004_v7 = vpop.f32.mrb[78].mxu1  ;;  %v12085_v54 = vld [vmem:[%s12893_s2 + $0x28] ss:$16 sps:$4 sm:$0xff]   ;;  %v12092_v58 = vld [vmem:[%s12893_s2 + $0x44] ss:$16 sps:$4 sm:$0xff]  }
 0x725   :  { %v5011_v4 = vmul.f32 0.5, %v5007_v38  ;;  %v4964_v5 = vpop.f32.mrb[79].mxu0  ;;  %v5005_v55 = vpop.f32.mrb[79].mxu1  ;;  %v12097_v60 = vld [vmem:[%s12893_s2 + $0x4c] ss:$16 sps:$4 sm:$0xff]  }
 0x726   :  { %v5015_v57 = vmul.f32 0.5, %v5008_v40  ;;  %v5020_v53 = vmul.f32 0.5, %v5010_v47  ;;  %v12106_v40 = vld [vmem:[%s12893_s2 + $0x40] ss:$16 sps:$4 sm:$0xff]   ;;  %v12111_v37 = vld [vmem:[%s12893_s2 + $0x48] ss:$16 sps:$4 sm:$0xff]  }
 0x727   :  { %9494 = vtanh.f32 %v5011_v4  ;;  %v12118_v47 = vld [vmem:[%s12893_s2 + $0x64] ss:$16 sps:$4 sm:$0xff]   ;;  %v12123_v1 = vld [vmem:[%s12893_s2 + $0x6c] ss:$16 sps:$4 sm:$0xff]   ;;  %v12130_v7 = vld [vmem:[%s12893_s2 + $0x60] ss:$16 sps:$4 sm:$0xff]  }
 0x728   :  { %9496 = vtanh.f32 %v5015_v57  ;;  %v12135_v4 = vld [vmem:[%s12893_s2 + $0x68] ss:$16 sps:$4 sm:$0xff]   ;;  %v12142_v5 = vld [vmem:[%s12893_s2 + $0x84] ss:$16 sps:$4 sm:$0xff]   ;;  %v12147_v55 = vld [vmem:[%s12893_s2 + $0x8c] ss:$16 sps:$4 sm:$0xff]  }
 0x729   :  { %9498 = vtanh.f32 %v5009_v50  ;;  %v12047_v50 = vld [vmem:[%s12893_s2 + $0xc] ss:$16 sps:$4 sm:$0xff]   ;;  %v12154_v57 = vld [vmem:[%s12893_s2 + $0x80] ss:$16 sps:$4 sm:$0xff]  }
 0x72a   :  { %9500 = vtanh.f32 %v5020_v53  ;;  %v12159_v53 = vld [vmem:[%s12893_s2 + $0x88] ss:$16 sps:$4 sm:$0xff]  }
 0x731   :  { %v9495_v28 = vpop.eup %9494 }
 0x732   :  { %v9497_v46 = vpop.eup %9496  ;;  %v5013_v8 = vmul.f32 0.5, %v9495_v28  ;;  %v12166_v28 = vld [vmem:[%s12893_s2 + $0xa4] ss:$16 sps:$4 sm:$0xff]  }
 0x733   :  { %v5017_v41 = vmul.f32 0.5, %v9497_v46  ;;  %v9499_v43 = vpop.eup %9498  ;;  %v12171_v46 = vld [vmem:[%s12893_s2 + $0xac] ss:$16 sps:$4 sm:$0xff]  }
 0x734   :  { %v5014_v9 = vadd.f32 0.5, %v5013_v8  ;;  %v9501_v42 = vpop.eup %9500  ;;  %v12178_v8 = vld [vmem:[%s12893_s2 + $0xa0] ss:$16 sps:$4 sm:$0xff]  }
 0x735   :  { %v5018_v15 = vadd.f32 0.5, %v5017_v41  ;;  %v5022_v62 = vmul.f32 0.5, %v9501_v42  ;;  %v12183_v41 = vld [vmem:[%s12893_s2 + $0xa8] ss:$16 sps:$4 sm:$0xff]   ;;  %v12219_v42 = vld [vmem:[%s12893_s2 + $0xec] ss:$16 sps:$4 sm:$0xff]  }
 0x736   :  { %v5025_v51 = vmul.f32 %v9499_v43, %v5014_v9  ;;  %v12190_v9 = vld [vmem:[%s12893_s2 + $0xc4] ss:$16 sps:$4 sm:$0xff]   ;;  %v12195_v43 = vld [vmem:[%s12893_s2 + $0xcc] ss:$16 sps:$4 sm:$0xff]  }
 0x737   :  { %v5024_v39 = vmul.f32 %v5018_v15, %v11719_v29  ;;  %v5023_v11 = vadd.f32 0.5, %v5022_v62  ;;  %v4684_v29 = vmul.f32 0.5, %v4674_v63  ;;  %v12202_v15 = vld [vmem:[%s12893_s2 + $0xc0] ss:$16 sps:$4 sm:$0xff]  }
 0x738   :  { %v12226_v62 = vld [vmem:[%s12893_s2 + $0xe0] ss:$16 sps:$4 sm:$0xff]  }
 0x739   :  { %v11998_v52 = vadd.f32 %v5025_v51, %v5024_v39  ;;  %v12207_v51 = vld [vmem:[%s12893_s2 + $0xc8] ss:$16 sps:$4 sm:$0xff]   ;;  %v12214_v39 = vld [vmem:[%s12893_s2 + $0xe4] ss:$16 sps:$4 sm:$0xff]   ;;  %v12254_v63 = vld [vmem:[%s12894_s4] ss:$16 sps:$4 sm:$0xff]  }
 0x73b   :  { %9502 = vtanh.f32 %v11998_v52 }
 0x73c   :  { %9504 = vtanh.f32 %v4684_v29  ;;  %v12268_v29 = vld [vmem:[%s12894_s4 + $0x24] ss:$16 sps:$4 sm:$0xff]  }
 0x73d   :  { %9506 = vtanh.f32 %v11991_v34  ;;  %13284 = vst [vmem:[#allocation68_spill] sm:$0xff] %v12268_v29 }
 0x745   :  { %v9503_v61 = vpop.eup %9502 }
 0x746   :  { %v5028_v59 = vmul.f32 %v9503_v61, %v5023_v11  ;;  %v12231_v11 = vld [vmem:[%s12893_s2 + $0xe8] ss:$16 sps:$4 sm:$0xff]   ;;  %v12244_v61 = vld [vmem:[%s12894_s4 + $0x4] ss:$16 sps:$4 sm:$0xff]  }
 0x748   :  { %v12001_v56 = vpack.c.bf16 %v5028_v59, %v5028_v59  ;;  %v12249_v59 = vld [vmem:[%s12894_s4 + $0xc] ss:$16 sps:$4 sm:$0xff]  }
 0x74a   :  { %5255 = vmatmul.mubr.bf16.vlgmr.msra.gmra.mrb[80].mxu0 %v12001_v56  ;;  %5296 = vmatmul.mubr.bf16.vlgmr.msra.gmra.mrb[80].mxu1 %v12001_v56 }
 0x74b   :  { %5465 = vmatpush1.bf16.msra.mxu0 %v11725_v44  ;;  %5506 = vmatpush1.bf16.msra.mxu1 %v11730_v25  ;;  %v13270_v44 = vld [vmem:[#allocation9_spill] sm:$0xff]  ;;  %v13271_v25 = vld [vmem:[#allocation10_spill] sm:$0xff] }
 0x74c   :  { %5466 = vmatprep.subr.bf16.mxu0 %v11737_v45  ;;  %5507 = vmatprep.subr.bf16.mxu1 %v11742_v48  ;;  %v13272_v45 = vld [vmem:[#allocation11_spill] sm:$0xff]  ;;  %v13273_v48 = vld [vmem:[#allocation4_spill] sm:$0xff] }
 0x74d   :  { %5496 = vmatprep.mubr.bf16.mxu0 %v13081_v31  ;;  %5537 = vmatprep.mubr.bf16.mxu1 %v13081_v31 }
 0x74f   :  { %5467 = vmatpush1.bf16.msra.mxu0 %v11753_v30  ;;  %5508 = vmatpush1.bf16.msra.mxu1 %v11758_v22  ;;  %v13274_v30 = vld [vmem:[#allocation5_spill] sm:$0xff]  ;;  %v9505_v22 = vpop.eup %9504 }
 0x750   :  { %5468 = vmatprep.subr.bf16.mxu0 %v11765_v17  ;;  %5509 = vmatprep.subr.bf16.mxu1 %v11770_v20  ;;  %v13275_v17 = vld [vmem:[#allocation6_spill] sm:$0xff]  ;;  %v13276_v20 = vld [vmem:[#allocation7_spill] sm:$0xff]  ;;  %v9507_v36 = vpop.eup %9506 }
 0x753   :  { %5469 = vmatpush1.bf16.msra.mxu0 %v11779_v13  ;;  %5510 = vmatpush1.bf16.msra.mxu1 %v11784_v6  ;;  %v13277_v13 = vld [vmem:[#allocation60_spill] sm:$0xff]  ;;  %v13278_v6 = vld [vmem:[#allocation61_spill] sm:$0xff] }
 0x754   :  { %5470 = vmatprep.subr.bf16.mxu0 %v11791_v19  ;;  %5511 = vmatprep.subr.bf16.mxu1 %v13270_v44  ;;  %v4686_v19 = vmul.f32 0.5, %v9505_v22  ;;  %v12273_v44 = vld [vmem:[%s12894_s4 + $0x2c] ss:$16 sps:$4 sm:$0xff]   ;;  %v12302_v22 = vld [vmem:[%s12894_s4 + $0x40] ss:$16 sps:$4 sm:$0xff]  }
 0x755   :  { %13285 = vst [vmem:[#allocation12_spill] sm:$0xff] %v12273_v44  ;;  %13290 = vst [vmem:[#allocation32_spill] sm:$0xff] %v12302_v22 }
 0x756   :  { %v4687_v26 = vadd.f32 0.5, %v4686_v19  ;;  %v12331_v19 = vld [vmem:[%s12894_s4 + $0x68] ss:$16 sps:$4 sm:$0xff]  }
 0x757   :  { %5471 = vmatpush1.bf16.msra.mxu0 %v13271_v25  ;;  %5512 = vmatpush1.bf16.msra.mxu1 %v13272_v45  ;;  %v12278_v25 = vld [vmem:[%s12894_s4 + $0x20] ss:$16 sps:$4 sm:$0xff]   ;;  %v12283_v45 = vld [vmem:[%s12894_s4 + $0x28] ss:$16 sps:$4 sm:$0xff]   ;;  %13295 = vst [vmem:[#allocation37_spill] sm:$0xff] %v12331_v19 }
 0x758   :  { %5472 = vmatprep.subr.bf16.mxu0 %v13273_v48  ;;  %5513 = vmatprep.subr.bf16.mxu1 %v13274_v30  ;;  %v12035_v38 = vmul.f32 %v9507_v36, %v4687_v26  ;;  %13286 = vst [vmem:[#allocation13_spill] sm:$0xff] %v12278_v25  ;;  %13287 = vst [vmem:[#allocation14_spill] sm:$0xff] %v12283_v45  ;;  %v12292_v48 = vld [vmem:[%s12894_s4 + $0x44] ss:$16 sps:$4 sm:$0xff]   ;;  %v12297_v30 = vld [vmem:[%s12894_s4 + $0x4c] ss:$16 sps:$4 sm:$0xff]  }
 0x759   :  { %13288 = vst [vmem:[#allocation15_spill] sm:$0xff] %v12292_v48  ;;  %13289 = vst [vmem:[#allocation31_spill] sm:$0xff] %v12297_v30  ;;  %v12364_v36 = vld [vmem:[%s12894_s4 + $0xa4] ss:$16 sps:$4 sm:$0xff]   ;;  %v12369_v26 = vld [vmem:[%s12894_s4 + $0xac] ss:$16 sps:$4 sm:$0xff]  }
 0x75a   :  { %13283 = vst [vmem:[#allocation67_spill] sm:$0xff] %v12035_v38  ;;  %13300 = vst [vmem:[#allocation42_spill] sm:$0xff] %v12364_v36 }
 0x75b   :  { %5473 = vmatpush1.bf16.msra.mxu0 %v13275_v17  ;;  %5514 = vmatpush1.bf16.msra.mxu1 %v13276_v20  ;;  %v12307_v17 = vld [vmem:[%s12894_s4 + $0x48] ss:$16 sps:$4 sm:$0xff]   ;;  %v12316_v20 = vld [vmem:[%s12894_s4 + $0x64] ss:$16 sps:$4 sm:$0xff]   ;;  %13301 = vst [vmem:[#allocation43_spill] sm:$0xff] %v12369_v26 }
 0x75c   :  { %5474 = vmatprep.subr.bf16.mxu0 %v13277_v13  ;;  %5515 = vmatprep.subr.bf16.mxu1 %v13278_v6  ;;  %13291 = vst [vmem:[#allocation33_spill] sm:$0xff] %v12307_v17  ;;  %13292 = vst [vmem:[#allocation34_spill] sm:$0xff] %v12316_v20  ;;  %v12321_v13 = vld [vmem:[%s12894_s4 + $0x6c] ss:$16 sps:$4 sm:$0xff]   ;;  %v12326_v6 = vld [vmem:[%s12894_s4 + $0x60] ss:$16 sps:$4 sm:$0xff]  }
 0x75d   :  { %13293 = vst [vmem:[#allocation35_spill] sm:$0xff] %v12321_v13  ;;  %13294 = vst [vmem:[#allocation36_spill] sm:$0xff] %v12326_v6 }
 0x75f   :  { %5475 = vmatpush1.bf16.msra.mxu0 %v13279_v21  ;;  %5516 = vmatpush1.bf16.msra.mxu1 %v13280_v32  ;;  %v12340_v21 = vld [vmem:[%s12894_s4 + $0x84] ss:$16 sps:$4 sm:$0xff]   ;;  %v12345_v32 = vld [vmem:[%s12894_s4 + $0x8c] ss:$16 sps:$4 sm:$0xff]  }
 0x760   :  { %5476 = vmatprep.subr.bf16.mxu0 %v13281_v33  ;;  %5517 = vmatprep.subr.bf16.mxu1 %v13282_v35  ;;  %13296 = vst [vmem:[#allocation38_spill] sm:$0xff] %v12340_v21  ;;  %13297 = vst [vmem:[#allocation39_spill] sm:$0xff] %v12345_v32  ;;  %v12350_v33 = vld [vmem:[%s12894_s4 + $0x80] ss:$16 sps:$4 sm:$0xff]   ;;  %v12355_v35 = vld [vmem:[%s12894_s4 + $0x88] ss:$16 sps:$4 sm:$0xff]  }
 0x761   :  { %13298 = vst [vmem:[#allocation40_spill] sm:$0xff] %v12350_v33  ;;  %13299 = vst [vmem:[#allocation41_spill] sm:$0xff] %v12355_v35 }
 0x763   :  { %5477 = vmatpush1.bf16.msra.mxu0 %v11876_v23  ;;  %5518 = vmatpush1.bf16.msra.mxu1 %v11881_v49  ;;  %v12054_v23 = vld [vmem:[%s12893_s2] ss:$16 sps:$4 sm:$0xff]   ;;  %v4695_v49 = vpack.c.bf16 %v12035_v38, %v12035_v38  ;;  %v12379_v38 = vld [vmem:[%s12894_s4 + $0xa8] ss:$16 sps:$4 sm:$0xff]  }
 0x764   :  { %5478 = vmatprep.subr.bf16.mxu0 %v11888_v27  ;;  %5519 = vmatprep.subr.bf16.mxu1 %v11893_v24  ;;  %v12059_v24 = vld [vmem:[%s12893_s2 + $0x8] ss:$16 sps:$4 sm:$0xff]   ;;  %v12080_v27 = vld [vmem:[%s12893_s2 + $0x20] ss:$16 sps:$4 sm:$0xff]   ;;  %13303 = vst [vmem:[#allocation45_spill] sm:$0xff] %v12379_v38 }
 0x767   :  { %5479 = vmatpush1.bf16.msra.mxu0 %v11900_v14  ;;  %5520 = vmatpush1.bf16.msra.mxu1 %v11905_v3  ;;  %v12068_v3 = vld [vmem:[%s12893_s2 + $0x24] ss:$16 sps:$4 sm:$0xff]   ;;  %v12073_v14 = vld [vmem:[%s12893_s2 + $0x2c] ss:$16 sps:$4 sm:$0xff]  }
 0x768   :  { %5800 = vmatprep.subr.bf16.mxu0 %v12042_v2  ;;  %5841 = vmatprep.subr.bf16.mxu1 %v12047_v50 }
 0x76a   :  { %5497 = vmatmul.mubr.bf16.vlgmr.msra.gmra.mrb[84].mxu0 %v4695_v49  ;;  %5538 = vmatmul.mubr.bf16.vlgmr.msra.gmra.mrb[84].mxu1 %v4695_v49  ;;  %v12374_v49 = vld [vmem:[%s12894_s4 + $0xa0] ss:$16 sps:$4 sm:$0xff]  }
 0x76b   :  { %5801 = vmatpush1.bf16.msra.mxu0 %v12054_v23  ;;  %5842 = vmatpush1.bf16.msra.mxu1 %v12059_v24  ;;  %13302 = vst [vmem:[#allocation44_spill] sm:$0xff] %v12374_v49 }
 0x76c   :  { %5802 = vmatprep.subr.bf16.mxu0 %v12068_v3  ;;  %5843 = vmatprep.subr.bf16.mxu1 %v12073_v14 }
 0x76d   :  { %5832 = vmatprep.mubr.bf16.mxu0 %v13081_v31  ;;  %5873 = vmatprep.mubr.bf16.mxu1 %v13081_v31 }
 0x76f   :  { %5803 = vmatpush1.bf16.msra.mxu0 %v12080_v27  ;;  %5844 = vmatpush1.bf16.msra.mxu1 %v12085_v54 }
 0x770   :  { %5804 = vmatprep.subr.bf16.mxu0 %v12092_v58  ;;  %5845 = vmatprep.subr.bf16.mxu1 %v12097_v60 }
 0x773   :  { %5805 = vmatpush1.bf16.msra.mxu0 %v12106_v40  ;;  %5846 = vmatpush1.bf16.msra.mxu1 %v12111_v37 }
 0x774   :  { %5806 = vmatprep.subr.bf16.mxu0 %v12118_v47  ;;  %5847 = vmatprep.subr.bf16.mxu1 %v12123_v1 }
 0x777   :  { %5807 = vmatpush1.bf16.msra.mxu0 %v12130_v7  ;;  %5848 = vmatpush1.bf16.msra.mxu1 %v12135_v4 }
 0x778   :  { %5808 = vmatprep.subr.bf16.mxu0 %v12142_v5  ;;  %5849 = vmatprep.subr.bf16.mxu1 %v12147_v55 }
 0x77b   :  { %5809 = vmatpush1.bf16.msra.mxu0 %v12154_v57  ;;  %5850 = vmatpush1.bf16.msra.mxu1 %v12159_v53 }
 0x77c   :  { %5810 = vmatprep.subr.bf16.mxu0 %v12166_v28  ;;  %5851 = vmatprep.subr.bf16.mxu1 %v12171_v46 }
 0x77f   :  { %5811 = vmatpush1.bf16.msra.mxu0 %v12178_v8  ;;  %5852 = vmatpush1.bf16.msra.mxu1 %v12183_v41 }
 0x780   :  { %5812 = vmatprep.subr.bf16.mxu0 %v12190_v9  ;;  %5853 = vmatprep.subr.bf16.mxu1 %v12195_v43 }
 0x783   :  { %5813 = vmatpush1.bf16.msra.mxu0 %v12202_v15  ;;  %5854 = vmatpush1.bf16.msra.mxu1 %v12207_v51 }
 0x784   :  { %5814 = vmatprep.subr.bf16.mxu0 %v12214_v39  ;;  %5855 = vmatprep.subr.bf16.mxu1 %v12219_v42 }
 0x787   :  { %5815 = vmatpush1.bf16.msra.mxu0 %v12226_v62  ;;  %5856 = vmatpush1.bf16.msra.mxu1 %v12231_v11 }
 0x788   :  { %6097 = vmatprep.subr.bf16.mxu0 %v12244_v61  ;;  %6138 = vmatprep.subr.bf16.mxu1 %v12249_v59 }
 0x78a   :  { %5833 = vmatmul.mubr.bf16.vlgmr.msra.gmra.mrb[88].mxu0 %v12001_v56  ;;  %5874 = vmatmul.mubr.bf16.vlgmr.msra.gmra.mrb[88].mxu1 %v12001_v56  ;;  %v12259_v56 = vld [vmem:[%s12894_s4 + $0x8] ss:$16 sps:$4 sm:$0xff]  }
 0x78b   :  { %6129 = vmatprep.mubr.bf16.mxu0 %v13081_v31  ;;  %6170 = vmatprep.mubr.bf16.mxu1 %v13081_v31 }
 0x78c   :  { %6098 = vmatpush1.bf16.msra.mxu0 %v12254_v63  ;;  %6139 = vmatpush1.bf16.msra.mxu1 %v12259_v56 }
 0x78d   :  { %6099 = vmatprep.subr.bf16.mxu0 %v12268_v29  ;;  %6140 = vmatprep.subr.bf16.mxu1 %v12273_v44 }
 0x790   :  { %6100 = vmatpush1.bf16.msra.mxu0 %v12278_v25  ;;  %6141 = vmatpush1.bf16.msra.mxu1 %v12283_v45 }
 0x791   :  { %6101 = vmatprep.subr.bf16.mxu0 %v12292_v48  ;;  %6142 = vmatprep.subr.bf16.mxu1 %v12297_v30 }
 0x794   :  { %6102 = vmatpush1.bf16.msra.mxu0 %v12302_v22  ;;  %6143 = vmatpush1.bf16.msra.mxu1 %v12307_v17 }
 0x795   :  { %6103 = vmatprep.subr.bf16.mxu0 %v12316_v20  ;;  %6144 = vmatprep.subr.bf16.mxu1 %v12321_v13 }
 0x798   :  { %6104 = vmatpush1.bf16.msra.mxu0 %v12326_v6  ;;  %6145 = vmatpush1.bf16.msra.mxu1 %v12331_v19 }
 0x799   :  { %6105 = vmatprep.subr.bf16.mxu0 %v12340_v21  ;;  %6146 = vmatprep.subr.bf16.mxu1 %v12345_v32 }
 0x79c   :  { %6106 = vmatpush1.bf16.msra.mxu0 %v12350_v33  ;;  %6147 = vmatpush1.bf16.msra.mxu1 %v12355_v35  ;;  %v12393_v35 = vld [vmem:[%s12894_s4 + $0xcc] ss:$16 sps:$4 sm:$0xff]  }
 0x79d   :  { %6107 = vmatprep.subr.bf16.mxu0 %v12364_v36  ;;  %6148 = vmatprep.subr.bf16.mxu1 %v12369_v26  ;;  %13305 = vst [vmem:[#allocation47_spill] sm:$0xff] %v12393_v35  ;;  %v12398_v36 = vld [vmem:[%s12894_s4 + $0xc0] ss:$16 sps:$4 sm:$0xff]   ;;  %v12417_v26 = vld [vmem:[%s12894_s4 + $0xec] ss:$16 sps:$4 sm:$0xff]  }
 0x79e   :  { %13306 = vst [vmem:[#allocation48_spill] sm:$0xff] %v12398_v36  ;;  %13309 = vst [vmem:[#allocation51_spill] sm:$0xff] %v12417_v26 }
 0x7a0   :  { %6108 = vmatpush1.bf16.msra.mxu0 %v12374_v49  ;;  %6149 = vmatpush1.bf16.msra.mxu1 %v12379_v38  ;;  %v12403_v49 = vld [vmem:[%s12894_s4 + $0xc8] ss:$16 sps:$4 sm:$0xff]   ;;  %v12412_v38 = vld [vmem:[%s12894_s4 + $0xe4] ss:$16 sps:$4 sm:$0xff]  }
 0x7a1   :  { %13307 = vst [vmem:[#allocation49_spill] sm:$0xff] %v12403_v49  ;;  %6109 = vmatprep.subr.bf16.mxu0 %v12388_v10  ;;  %6150 = vmatprep.subr.bf16.mxu1 %v12393_v35  ;;  %13308 = vst [vmem:[#allocation50_spill] sm:$0xff] %v12412_v38  ;;  %v12422_v10 = vld [vmem:[%s12894_s4 + $0xe0] ss:$16 sps:$4 sm:$0xff]   ;;  %v12441_v35 = vld [vmem:[%s12895_s5 + $0xc] ss:$16 sps:$4 sm:$0xff]  }
 0x7a2   :  { %13310 = vst [vmem:[#allocation52_spill] sm:$0xff] %v12422_v10  ;;  %13313 = vst [vmem:[#allocation55_spill] sm:$0xff] %v12441_v35 }
 0x7a4   :  { %6110 = vmatpush1.bf16.msra.mxu0 %v12398_v36  ;;  %6151 = vmatpush1.bf16.msra.mxu1 %v12403_v49  ;;  %v12427_v36 = vld [vmem:[%s12894_s4 + $0xe8] ss:$16 sps:$4 sm:$0xff]   ;;  %v12436_v49 = vld [vmem:[%s12895_s5 + $0x4] ss:$16 sps:$4 sm:$0xff]  }
 0x7a5   :  { %13311 = vst [vmem:[#allocation53_spill] sm:$0xff] %v12427_v36  ;;  %6111 = vmatprep.subr.bf16.mxu0 %v12412_v38  ;;  %6152 = vmatprep.subr.bf16.mxu1 %v12417_v26  ;;  %13312 = vst [vmem:[#allocation54_spill] sm:$0xff] %v12436_v49 }
 0x7a8   :  { %6112 = vmatpush1.bf16.msra.mxu0 %v12422_v10  ;;  %6153 = vmatpush1.bf16.msra.mxu1 %v12427_v36 }
 0x7a9   :  { %6339 = vmatprep.subr.bf16.mxu0 %v12436_v49  ;;  %6380 = vmatprep.subr.bf16.mxu1 %v12441_v35 }
 0x81d   :  { %v5256_v38 = vpop.f32.mrb[80].mxu0  ;;  %v5297_v26 = vpop.f32.mrb[80].mxu1 }
 0x81e   :  { %v5258_v33 = vpop.f32.mrb[81].mxu0  ;;  %v5299_v10 = vpop.f32.mrb[81].mxu1 }
 0x81f   :  { %v5260_v32 = vpop.f32.mrb[82].mxu0  ;;  %v5301_v36 = vpop.f32.mrb[82].mxu1 }
 0x820   :  { %v5261_v21 = vpop.f32.mrb[83].mxu0  ;;  %v5302_v19 = vpop.f32.mrb[83].mxu1 }
 0x83d   :  { %v5498_v6 = vpop.f32.mrb[84].mxu0  ;;  %v5539_v13 = vpop.f32.mrb[84].mxu1 }
 0x83e   :  { %v5499_v20 = vadd.f32 %v5498_v6, %v5256_v38  ;;  %v5540_v17 = vadd.f32 %v5539_v13, %v5297_v26  ;;  %v5500_v22 = vpop.f32.mrb[85].mxu0  ;;  %v5541_v30 = vpop.f32.mrb[85].mxu1 }
 0x83f   :  { %v5501_v48 = vadd.f32 %v5500_v22, %v5258_v33  ;;  %v12445_v45 = vadd.f32 %v5541_v30, %v5299_v10  ;;  %v5502_v49 = vpop.f32.mrb[86].mxu0  ;;  %v5543_v25 = vpop.f32.mrb[86].mxu1 }
 0x840   :  { %v5546_v35 = vadd.f32 %v5499_v20, %v10493_v12  ;;  %v5503_v44 = vpop.f32.mrb[87].mxu0  ;;  %v5544_v29 = vpop.f32.mrb[87].mxu1  ;;  %v5548_v19 = vadd.f32 %v5540_v17, %v13265_v0  ;;  %v13315_v49 = vld [vmem:[#allocation21_spill] sm:$0xff] }
 0x841   :  { %v5547_v32 = vadd.f32 %v5501_v48, %v10498_v16 }
 0x842   :  { %v5550_v36 = vmul.f32 0.5, %v5546_v35  ;;  %v13314_v35 = vld [vmem:[#allocation20_spill] sm:$0xff] }
 0x843   :  { %v5554_v21 = vmul.f32 0.5, %v5547_v32 }
 0x844   :  { %9508 = vtanh.f32 %v5550_v36 }
 0x845   :  { %9510 = vtanh.f32 %v5554_v21  ;;  %v13316_v21 = vld [vmem:[#allocation22_spill] sm:$0xff] }
 0x846   :  { %9512 = vtanh.f32 %v5548_v19 }
 0x84e   :  { %v9509_v38 = vpop.eup %9508 }
 0x84f   :  { %v9511_v13 = vpop.eup %9510  ;;  %v5552_v22 = vmul.f32 0.5, %v9509_v38  ;;  %v13317_v38 = vld [vmem:[#allocation23_spill] sm:$0xff] }
 0x850   :  { %v5556_v10 = vmul.f32 0.5, %v9511_v13  ;;  %v9513_v6 = vpop.eup %9512 }
 0x851   :  { %v5553_v30 = vadd.f32 0.5, %v5552_v22 }
 0x852   :  { %v5557_v25 = vadd.f32 0.5, %v5556_v10 }
 0x853   :  { %v5564_v33 = vmul.f32 %v9513_v6, %v5553_v30 }
 0x854   :  { %v5563_v44 = vmul.f32 %v5557_v25, %v11991_v34 }
 0x856   :  { %v12451_v29 = vadd.f32 %v5564_v33, %v5563_v44 }
 0x85d   :  { %v5834_v48 = vpop.f32.mrb[88].mxu0  ;;  %v5875_v20 = vpop.f32.mrb[88].mxu1 }
 0x85e   :  { %v5882_v26 = vadd.f32 %v5834_v48, %v13314_v35  ;;  %v5884_v17 = vadd.f32 %v5875_v20, %v13315_v49  ;;  %v5836_v32 = vpop.f32.mrb[89].mxu0  ;;  %v5877_v36 = vpop.f32.mrb[89].mxu1 }
 0x85f   :  { %v5883_v19 = vadd.f32 %v5836_v32, %v13316_v21  ;;  %v5885_v13 = vadd.f32 %v5877_v36, %v13317_v38  ;;  %v5838_v22 = vpop.f32.mrb[90].mxu0  ;;  %v5879_v0 = vpop.f32.mrb[90].mxu1 }
 0x860   :  { %v5886_v10 = vmul.f32 0.5, %v5882_v26  ;;  %v5839_v30 = vpop.f32.mrb[91].mxu0  ;;  %v5880_v6 = vpop.f32.mrb[91].mxu1  ;;  %v12464_v22 = vld [vmem:[%s12895_s5] ss:$16 sps:$4 sm:$0xff]  }
 0x861   :  { %v5890_v34 = vmul.f32 0.5, %v5883_v19  ;;  %v5895_v25 = vmul.f32 0.5, %v5885_v13  ;;  %v12476_v30 = vld [vmem:[%s12895_s5 + $0x24] ss:$16 sps:$4 sm:$0xff]   ;;  %v12481_v6 = vld [vmem:[%s12895_s5 + $0x2c] ss:$16 sps:$4 sm:$0xff]  }
 0x862   :  { %9514 = vtanh.f32 %v5886_v10  ;;  %v12469_v10 = vld [vmem:[%s12895_s5 + $0x8] ss:$16 sps:$4 sm:$0xff]  }
 0x863   :  { %9516 = vtanh.f32 %v5890_v34  ;;  %v5549_v34 = vadd.f32 %v12445_v45, %v10521_v18  ;;  %v12504_v45 = vld [vmem:[%s12895_s5 + $0x44] ss:$16 sps:$4 sm:$0xff]  }
 0x864   :  { %9518 = vtanh.f32 %v5884_v17 }
 0x865   :  { %9520 = vtanh.f32 %v5895_v25  ;;  %v12492_v25 = vld [vmem:[%s12895_s5 + $0x20] ss:$16 sps:$4 sm:$0xff]  }
 0x86c   :  { %v9515_v33 = vpop.eup %9514 }
 0x86d   :  { %v9517_v44 = vpop.eup %9516  ;;  %v5888_v48 = vmul.f32 0.5, %v9515_v33  ;;  %v12497_v33 = vld [vmem:[%s12895_s5 + $0x28] ss:$16 sps:$4 sm:$0xff]  }
 0x86e   :  { %v5892_v20 = vmul.f32 0.5, %v9517_v44  ;;  %v9519_v49 = vpop.eup %9518  ;;  %v12509_v44 = vld [vmem:[%s12895_s5 + $0x4c] ss:$16 sps:$4 sm:$0xff]  }
 0x86f   :  { %v5889_v35 = vadd.f32 0.5, %v5888_v48  ;;  %v9521_v26 = vpop.eup %9520  ;;  %v5559_v48 = vmul.f32 0.5, %v5549_v34  ;;  %v12584_v34 = vld [vmem:[%s12895_s5 + $0xac] ss:$16 sps:$4 sm:$0xff]  }
 0x870   :  { %v5893_v32 = vadd.f32 0.5, %v5892_v20  ;;  %v5897_v19 = vmul.f32 0.5, %v9521_v26  ;;  %v12518_v20 = vld [vmem:[%s12895_s5 + $0x40] ss:$16 sps:$4 sm:$0xff]   ;;  %v12554_v26 = vld [vmem:[%s12895_s5 + $0x84] ss:$16 sps:$4 sm:$0xff]  }
 0x871   :  { %v5900_v21 = vmul.f32 %v9519_v49, %v5889_v35  ;;  %v12523_v35 = vld [vmem:[%s12895_s5 + $0x48] ss:$16 sps:$4 sm:$0xff]   ;;  %v12530_v49 = vld [vmem:[%s12895_s5 + $0x64] ss:$16 sps:$4 sm:$0xff]   ;;  %13321 = vst [vmem:[#allocation59_spill] sm:$0xff] %v12554_v26  ;;  %13326 = vst [vmem:[#allocation19_spill] sm:$0xff] %v12584_v34 }
 0x872   :  { %v5899_v36 = vmul.f32 %v5893_v32, %v11998_v52  ;;  %v5898_v38 = vadd.f32 0.5, %v5897_v19  ;;  %v12535_v32 = vld [vmem:[%s12895_s5 + $0x6c] ss:$16 sps:$4 sm:$0xff]  }
 0x873   :  { %13318 = vst [vmem:[#allocation56_spill] sm:$0xff] %v12535_v32  ;;  %v12559_v19 = vld [vmem:[%s12895_s5 + $0x8c] ss:$16 sps:$4 sm:$0xff]  }
 0x874   :  { %v12458_v0 = vadd.f32 %v5900_v21, %v5899_v36  ;;  %v12542_v21 = vld [vmem:[%s12895_s5 + $0x60] ss:$16 sps:$4 sm:$0xff]   ;;  %v12547_v36 = vld [vmem:[%s12895_s5 + $0x68] ss:$16 sps:$4 sm:$0xff]   ;;  %13322 = vst [vmem:[#allocation8_spill] sm:$0xff] %v12559_v19 }
 0x875   :  { %13319 = vst [vmem:[#allocation57_spill] sm:$0xff] %v12542_v21  ;;  %13320 = vst [vmem:[#allocation58_spill] sm:$0xff] %v12547_v36 }
 0x876   :  { %9522 = vtanh.f32 %v12458_v0 }
 0x877   :  { %9524 = vtanh.f32 %v5559_v48 }
 0x878   :  { %9526 = vtanh.f32 %v12451_v29 }
 0x880   :  { %v9523_v17 = vpop.eup %9522 }
 0x881   :  { %v5903_v13 = vmul.f32 %v9523_v17, %v5898_v38  ;;  %v12567_v38 = vld [vmem:[%s12895_s5 + $0x80] ss:$16 sps:$4 sm:$0xff]   ;;  %v12572_v17 = vld [vmem:[%s12895_s5 + $0x88] ss:$16 sps:$4 sm:$0xff]   ;;  %v9525_v48 = vpop.eup %9524 }
 0x882   :  { %13323 = vst [vmem:[#allocation16_spill] sm:$0xff] %v12567_v38  ;;  %13324 = vst [vmem:[#allocation17_spill] sm:$0xff] %v12572_v17 }
 0x883   :  { %v12471_v52 = vpack.c.bf16 %v5903_v13, %v5903_v13  ;;  %v12579_v13 = vld [vmem:[%s12895_s5 + $0xa4] ss:$16 sps:$4 sm:$0xff]  }
 0x884   :  { %13325 = vst [vmem:[#allocation18_spill] sm:$0xff] %v12579_v13 }
 0x885   :  { %6130 = vmatmul.mubr.bf16.vlgmr.msra.gmra.mrb[92].mxu0 %v12471_v52  ;;  %6171 = vmatmul.mubr.bf16.vlgmr.msra.gmra.mrb[92].mxu1 %v12471_v52 }
 0x886   :  { %6340 = vmatpush1.bf16.msra.mxu0 %v12464_v22  ;;  %6381 = vmatpush1.bf16.msra.mxu1 %v12469_v10 }
 0x887   :  { %6341 = vmatprep.subr.bf16.mxu0 %v12476_v30  ;;  %6382 = vmatprep.subr.bf16.mxu1 %v12481_v6 }
 0x888   :  { %6371 = vmatprep.mubr.bf16.mxu0 %v13081_v31  ;;  %6412 = vmatprep.mubr.bf16.mxu1 %v13081_v31 }
 0x88a   :  { %6342 = vmatpush1.bf16.msra.mxu0 %v12492_v25  ;;  %6383 = vmatpush1.bf16.msra.mxu1 %v12497_v33 }
 0x88b   :  { %6343 = vmatprep.subr.bf16.mxu0 %v12504_v45  ;;  %6384 = vmatprep.subr.bf16.mxu1 %v12509_v44 }
 0x88e   :  { %6344 = vmatpush1.bf16.msra.mxu0 %v12518_v20  ;;  %6385 = vmatpush1.bf16.msra.mxu1 %v12523_v35 }
 0x88f   :  { %6345 = vmatprep.subr.bf16.mxu0 %v12530_v49  ;;  %6386 = vmatprep.subr.bf16.mxu1 %v12535_v32 }
 0x892   :  { %6346 = vmatpush1.bf16.msra.mxu0 %v12542_v21  ;;  %6387 = vmatpush1.bf16.msra.mxu1 %v12547_v36  ;;  %v5561_v36 = vmul.f32 0.5, %v9525_v48  ;;  %v12627_v48 = vld [vmem:[%s12895_s5 + $0xe4] ss:$16 sps:$4 sm:$0xff]  }
 0x893   :  { %6347 = vmatprep.subr.bf16.mxu0 %v12554_v26  ;;  %6388 = vmatprep.subr.bf16.mxu1 %v12559_v19  ;;  %v12591_v26 = vld [vmem:[%s12895_s5 + $0xa0] ss:$16 sps:$4 sm:$0xff]   ;;  %v12596_v19 = vld [vmem:[%s12895_s5 + $0xa8] ss:$16 sps:$4 sm:$0xff]  }
 0x894   :  { %13327 = vst [vmem:[#allocation9_spill] sm:$0xff] %v12591_v26  ;;  %13328 = vst [vmem:[#allocation10_spill] sm:$0xff] %v12596_v19  ;;  %v5562_v21 = vadd.f32 0.5, %v5561_v36 }
 0x896   :  { %6348 = vmatpush1.bf16.msra.mxu0 %v12567_v38  ;;  %6389 = vmatpush1.bf16.msra.mxu1 %v12572_v17  ;;  %v12603_v38 = vld [vmem:[%s12895_s5 + $0xc4] ss:$16 sps:$4 sm:$0xff]   ;;  %v12608_v17 = vld [vmem:[%s12895_s5 + $0xcc] ss:$16 sps:$4 sm:$0xff]  }
 0x897   :  { %6349 = vmatprep.subr.bf16.mxu0 %v12579_v13  ;;  %6390 = vmatprep.subr.bf16.mxu1 %v12584_v34  ;;  %13329 = vst [vmem:[#allocation11_spill] sm:$0xff] %v12603_v38  ;;  %13330 = vst [vmem:[#allocation4_spill] sm:$0xff] %v12608_v17  ;;  %v12615_v13 = vld [vmem:[%s12895_s5 + $0xc0] ss:$16 sps:$4 sm:$0xff]   ;;  %v12620_v34 = vld [vmem:[%s12895_s5 + $0xc8] ss:$16 sps:$4 sm:$0xff]  }
 0x89a   :  { %6350 = vmatpush1.bf16.msra.mxu0 %v12591_v26  ;;  %6391 = vmatpush1.bf16.msra.mxu1 %v12596_v19  ;;  %v12632_v19 = vld [vmem:[%s12895_s5 + $0xec] ss:$16 sps:$4 sm:$0xff]   ;;  %v9527_v26 = vpop.eup %9526 }
 0x89b   :  { %6351 = vmatprep.subr.bf16.mxu0 %v12603_v38  ;;  %6392 = vmatprep.subr.bf16.mxu1 %v12608_v17  ;;  %v12639_v17 = vld [vmem:[%s12895_s5 + $0xe0] ss:$16 sps:$4 sm:$0xff]   ;;  %v12644_v38 = vld [vmem:[%s12895_s5 + $0xe8] ss:$16 sps:$4 sm:$0xff]   ;;  %v12646_v32 = vmul.f32 %v9527_v26, %v5562_v21 }
 0x89d   :  { %v5570_v36 = vpack.c.bf16 %v12646_v32, %v12646_v32 }
 0x89e   :  { %6352 = vmatpush1.bf16.msra.mxu0 %v12615_v13  ;;  %6393 = vmatpush1.bf16.msra.mxu1 %v12620_v34 }
 0x89f   :  { %6353 = vmatprep.subr.bf16.mxu0 %v12627_v48  ;;  %6394 = vmatprep.subr.bf16.mxu1 %v12632_v19 }
 0x8a2   :  { %6354 = vmatpush1.bf16.msra.mxu0 %v12639_v17  ;;  %6395 = vmatpush1.bf16.msra.mxu1 %v12644_v38 }
 0x8a3   :  { %6675 = vmatprep.subr.bf16.mxu0 %v12042_v2  ;;  %6716 = vmatprep.subr.bf16.mxu1 %v12047_v50  ;;  %v13331_v2 = vld [vmem:[#allocation68_spill] sm:$0xff] }
 0x8a4   :  { %v13332_v50 = vld [vmem:[#allocation12_spill] sm:$0xff] }
 0x8a5   :  { %6372 = vmatmul.mubr.bf16.vlgmr.msra.gmra.mrb[96].mxu0 %v5570_v36  ;;  %6413 = vmatmul.mubr.bf16.vlgmr.msra.gmra.mrb[96].mxu1 %v5570_v36 }
 0x8a6   :  { %6676 = vmatpush1.bf16.msra.mxu0 %v12054_v23  ;;  %6717 = vmatpush1.bf16.msra.mxu1 %v12059_v24  ;;  %v13333_v23 = vld [vmem:[#allocation13_spill] sm:$0xff]  ;;  %v13334_v24 = vld [vmem:[#allocation14_spill] sm:$0xff] }
 0x8a7   :  { %6677 = vmatprep.subr.bf16.mxu0 %v12068_v3  ;;  %6718 = vmatprep.subr.bf16.mxu1 %v12073_v14  ;;  %v13335_v3 = vld [vmem:[#allocation15_spill] sm:$0xff] }
 0x8a8   :  { %6707 = vmatprep.mubr.bf16.mxu0 %v13081_v31  ;;  %6748 = vmatprep.mubr.bf16.mxu1 %v13081_v31  ;;  %v13336_v14 = vld [vmem:[#allocation31_spill] sm:$0xff] }
 0x8aa   :  { %6678 = vmatpush1.bf16.msra.mxu0 %v12080_v27  ;;  %6719 = vmatpush1.bf16.msra.mxu1 %v12085_v54  ;;  %v13337_v27 = vld [vmem:[#allocation32_spill] sm:$0xff]  ;;  %v13338_v54 = vld [vmem:[#allocation33_spill] sm:$0xff] }
 0x8ab   :  { %6679 = vmatprep.subr.bf16.mxu0 %v12092_v58  ;;  %6720 = vmatprep.subr.bf16.mxu1 %v12097_v60  ;;  %v13339_v58 = vld [vmem:[#allocation34_spill] sm:$0xff]  ;;  %v13340_v60 = vld [vmem:[#allocation35_spill] sm:$0xff] }
 0x8ae   :  { %6680 = vmatpush1.bf16.msra.mxu0 %v12106_v40  ;;  %6721 = vmatpush1.bf16.msra.mxu1 %v12111_v37  ;;  %v13341_v40 = vld [vmem:[#allocation36_spill] sm:$0xff]  ;;  %v13342_v37 = vld [vmem:[#allocation37_spill] sm:$0xff] }
 0x8af   :  { %6681 = vmatprep.subr.bf16.mxu0 %v12118_v47  ;;  %6722 = vmatprep.subr.bf16.mxu1 %v12123_v1  ;;  %v13343_v47 = vld [vmem:[#allocation38_spill] sm:$0xff]  ;;  %v13344_v1 = vld [vmem:[#allocation39_spill] sm:$0xff] }
 0x8b2   :  { %6682 = vmatpush1.bf16.msra.mxu0 %v12130_v7  ;;  %6723 = vmatpush1.bf16.msra.mxu1 %v12135_v4  ;;  %v13345_v7 = vld [vmem:[#allocation40_spill] sm:$0xff]  ;;  %v13346_v4 = vld [vmem:[#allocation41_spill] sm:$0xff] }
 0x8b3   :  { %6683 = vmatprep.subr.bf16.mxu0 %v12142_v5  ;;  %6724 = vmatprep.subr.bf16.mxu1 %v12147_v55  ;;  %v13347_v5 = vld [vmem:[#allocation42_spill] sm:$0xff]  ;;  %v13348_v55 = vld [vmem:[#allocation43_spill] sm:$0xff] }
 0x8b6   :  { %6684 = vmatpush1.bf16.msra.mxu0 %v12154_v57  ;;  %6725 = vmatpush1.bf16.msra.mxu1 %v12159_v53  ;;  %v13349_v57 = vld [vmem:[#allocation44_spill] sm:$0xff]  ;;  %v13350_v53 = vld [vmem:[#allocation45_spill] sm:$0xff] }
 0x8b7   :  { %6685 = vmatprep.subr.bf16.mxu0 %v12166_v28  ;;  %6726 = vmatprep.subr.bf16.mxu1 %v12171_v46  ;;  %v13351_v28 = vld [vmem:[#allocation46_spill] sm:$0xff]  ;;  %v13352_v46 = vld [vmem:[#allocation47_spill] sm:$0xff] }
 0x8ba   :  { %6686 = vmatpush1.bf16.msra.mxu0 %v12178_v8  ;;  %6727 = vmatpush1.bf16.msra.mxu1 %v12183_v41  ;;  %v13353_v8 = vld [vmem:[#allocation48_spill] sm:$0xff]  ;;  %v13354_v41 = vld [vmem:[#allocation49_spill] sm:$0xff] }
 0x8bb   :  { %6687 = vmatprep.subr.bf16.mxu0 %v12190_v9  ;;  %6728 = vmatprep.subr.bf16.mxu1 %v12195_v43  ;;  %v13355_v9 = vld [vmem:[#allocation50_spill] sm:$0xff]  ;;  %v13356_v43 = vld [vmem:[#allocation51_spill] sm:$0xff] }
 0x8be   :  { %6688 = vmatpush1.bf16.msra.mxu0 %v12202_v15  ;;  %6729 = vmatpush1.bf16.msra.mxu1 %v12207_v51  ;;  %v13357_v15 = vld [vmem:[#allocation52_spill] sm:$0xff]  ;;  %v13358_v51 = vld [vmem:[#allocation53_spill] sm:$0xff] }
 0x8bf   :  { %6689 = vmatprep.subr.bf16.mxu0 %v12214_v39  ;;  %6730 = vmatprep.subr.bf16.mxu1 %v12219_v42  ;;  %v13359_v39 = vld [vmem:[#allocation54_spill] sm:$0xff]  ;;  %v13360_v42 = vld [vmem:[#allocation55_spill] sm:$0xff] }
 0x8c2   :  { %6690 = vmatpush1.bf16.msra.mxu0 %v12226_v62  ;;  %6731 = vmatpush1.bf16.msra.mxu1 %v12231_v11 }
 0x8c3   :  { %6972 = vmatprep.subr.bf16.mxu0 %v12244_v61  ;;  %7013 = vmatprep.subr.bf16.mxu1 %v12249_v59 }
 0x8c5   :  { %6708 = vmatmul.mubr.bf16.vlgmr.msra.gmra.mrb[100].mxu0 %v12471_v52  ;;  %6749 = vmatmul.mubr.bf16.vlgmr.msra.gmra.mrb[100].mxu1 %v12471_v52 }
 0x8c6   :  { %6973 = vmatpush1.bf16.msra.mxu0 %v12254_v63  ;;  %7014 = vmatpush1.bf16.msra.mxu1 %v12259_v56 }
 0x8c7   :  { %6974 = vmatprep.subr.bf16.mxu0 %v13331_v2  ;;  %7015 = vmatprep.subr.bf16.mxu1 %v13332_v50 }
 0x8c8   :  { %7004 = vmatprep.mubr.bf16.mxu0 %v13081_v31  ;;  %7045 = vmatprep.mubr.bf16.mxu1 %v13081_v31 }
 0x8ca   :  { %6975 = vmatpush1.bf16.msra.mxu0 %v13333_v23  ;;  %7016 = vmatpush1.bf16.msra.mxu1 %v13334_v24 }
 0x8cb   :  { %6976 = vmatprep.subr.bf16.mxu0 %v13335_v3  ;;  %7017 = vmatprep.subr.bf16.mxu1 %v13336_v14 }
 0x8ce   :  { %6977 = vmatpush1.bf16.msra.mxu0 %v13337_v27  ;;  %7018 = vmatpush1.bf16.msra.mxu1 %v13338_v54 }
 0x8cf   :  { %6978 = vmatprep.subr.bf16.mxu0 %v13339_v58  ;;  %7019 = vmatprep.subr.bf16.mxu1 %v13340_v60 }
 0x8d2   :  { %6979 = vmatpush1.bf16.msra.mxu0 %v13341_v40  ;;  %7020 = vmatpush1.bf16.msra.mxu1 %v13342_v37 }
 0x8d3   :  { %6980 = vmatprep.subr.bf16.mxu0 %v13343_v47  ;;  %7021 = vmatprep.subr.bf16.mxu1 %v13344_v1 }
 0x8d6   :  { %6981 = vmatpush1.bf16.msra.mxu0 %v13345_v7  ;;  %7022 = vmatpush1.bf16.msra.mxu1 %v13346_v4  ;;  %v13361_v7 = vld [vmem:[#allocation29_spill] sm:$0xff] }
 0x8d7   :  { %6982 = vmatprep.subr.bf16.mxu0 %v13347_v5  ;;  %7023 = vmatprep.subr.bf16.mxu1 %v13348_v55 }
 0x8da   :  { %6983 = vmatpush1.bf16.msra.mxu0 %v13349_v57  ;;  %7024 = vmatpush1.bf16.msra.mxu1 %v13350_v53 }
 0x8db   :  { %6984 = vmatprep.subr.bf16.mxu0 %v13351_v28  ;;  %7025 = vmatprep.subr.bf16.mxu1 %v13352_v46 }
 0x8de   :  { %6985 = vmatpush1.bf16.msra.mxu0 %v13353_v8  ;;  %7026 = vmatpush1.bf16.msra.mxu1 %v13354_v41 }
 0x8df   :  { %6986 = vmatprep.subr.bf16.mxu0 %v13355_v9  ;;  %7027 = vmatprep.subr.bf16.mxu1 %v13356_v43 }
 0x8e2   :  { %6987 = vmatpush1.bf16.msra.mxu0 %v13357_v15  ;;  %7028 = vmatpush1.bf16.msra.mxu1 %v13358_v51 }
 0x8e3   :  { %7214 = vmatprep.subr.bf16.mxu0 %v13359_v39  ;;  %7255 = vmatprep.subr.bf16.mxu1 %v13360_v42  ;;  %v13362_v39 = vld [vmem:[#allocation24_spill] sm:$0xff] }
 0x958   :  { %v6131_v62 = vpop.f32.mrb[92].mxu0  ;;  %v6172_v11 = vpop.f32.mrb[92].mxu1 }
 0x959   :  { %v6133_v61 = vpop.f32.mrb[93].mxu0  ;;  %v6174_v59 = vpop.f32.mrb[93].mxu1 }
 0x95a   :  { %v6135_v63 = vpop.f32.mrb[94].mxu0  ;;  %v6176_v56 = vpop.f32.mrb[94].mxu1 }
 0x95b   :  { %v6136_v52 = vpop.f32.mrb[95].mxu0  ;;  %v6177_v21 = vpop.f32.mrb[95].mxu1  ;;  %v13364_v63 = vld [vmem:[#allocation26_spill] sm:$0xff] }
 0x95c   :  { %v13365_v52 = vld [vmem:[#allocation27_spill] sm:$0xff] }
 0x978   :  { %v6373_v26 = vpop.f32.mrb[96].mxu0  ;;  %v6414_v36 = vpop.f32.mrb[96].mxu1 }
 0x979   :  { %v6374_v2 = vadd.f32 %v6373_v26, %v6131_v62  ;;  %v6415_v50 = vadd.f32 %v6414_v36, %v6172_v11  ;;  %v6375_v23 = vpop.f32.mrb[97].mxu0  ;;  %v6416_v24 = vpop.f32.mrb[97].mxu1  ;;  %v13363_v62 = vld [vmem:[#allocation25_spill] sm:$0xff] }
 0x97a   :  { %v6376_v3 = vadd.f32 %v6375_v23, %v6133_v61  ;;  %v6417_v14 = vadd.f32 %v6416_v24, %v6174_v59  ;;  %v6377_v27 = vpop.f32.mrb[98].mxu0  ;;  %v6418_v54 = vpop.f32.mrb[98].mxu1 }
 0x97b   :  { %v6421_v58 = vadd.f32 %v6374_v2, %v10493_v12  ;;  %v6378_v60 = vpop.f32.mrb[99].mxu0  ;;  %v6419_v40 = vpop.f32.mrb[99].mxu1  ;;  %v6423_v4 = vadd.f32 %v6415_v50, %v13361_v7 }
 0x97c   :  { %v6422_v37 = vadd.f32 %v6376_v3, %v10498_v16 }
 0x97d   :  { %v6425_v47 = vmul.f32 0.5, %v6421_v58 }
 0x97e   :  { %v6429_v1 = vmul.f32 0.5, %v6422_v37 }
 0x97f   :  { %9528 = vtanh.f32 %v6425_v47 }
 0x980   :  { %9530 = vtanh.f32 %v6429_v1 }
 0x981   :  { %9532 = vtanh.f32 %v6423_v4 }
 0x989   :  { %v9529_v5 = vpop.eup %9528 }
 0x98a   :  { %v9531_v55 = vpop.eup %9530  ;;  %v6427_v57 = vmul.f32 0.5, %v9529_v5 }
 0x98b   :  { %v6431_v53 = vmul.f32 0.5, %v9531_v55  ;;  %v9533_v46 = vpop.eup %9532 }
 0x98c   :  { %v6428_v28 = vadd.f32 0.5, %v6427_v57 }
 0x98d   :  { %v6432_v8 = vadd.f32 0.5, %v6431_v53 }
 0x98e   :  { %v6439_v41 = vmul.f32 %v9533_v46, %v6428_v28 }
 0x98f   :  { %v6438_v9 = vmul.f32 %v6432_v8, %v12451_v29  ;;  %v6424_v8 = vadd.f32 %v6417_v14, %v10521_v18  ;;  %v13376_v14 = vld [vmem:[#allocation10_spill] sm:$0xff] }
 0x991   :  { %v12730_v43 = vadd.f32 %v6439_v41, %v6438_v9  ;;  %v13377_v41 = vld [vmem:[#allocation11_spill] sm:$0xff]  ;;  %v13378_v9 = vld [vmem:[#allocation4_spill] sm:$0xff] }
 0x998   :  { %v6709_v15 = vpop.f32.mrb[100].mxu0  ;;  %v6750_v51 = vpop.f32.mrb[100].mxu1 }
 0x999   :  { %v6757_v42 = vadd.f32 %v6709_v15, %v13362_v39  ;;  %v6759_v11 = vadd.f32 %v6750_v51, %v13363_v62  ;;  %v6711_v61 = vpop.f32.mrb[101].mxu0  ;;  %v6752_v59 = vpop.f32.mrb[101].mxu1 }
 0x99a   :  { %v6758_v56 = vadd.f32 %v6711_v61, %v13364_v63  ;;  %v6760_v21 = vadd.f32 %v6752_v59, %v13365_v52  ;;  %v6713_v26 = vpop.f32.mrb[102].mxu0  ;;  %v6754_v36 = vpop.f32.mrb[102].mxu1  ;;  %v9377_v61 = vld [vmem:[%s12898_s7 + $0x28] sm:$0xff]   ;;  %v9378_v59 = vld [vmem:[%s12898_s7 + $0x30] sm:$0xff]   ;;  %v9379_v63 = vld [vmem:[%s12898_s7 + $0x38] sm:$0xff]  }
 0x99b   :  { %v6761_v2 = vmul.f32 0.5, %v6757_v42  ;;  %v6714_v50 = vpop.f32.mrb[103].mxu0  ;;  %v6755_v23 = vpop.f32.mrb[103].mxu1  ;;  %v9372_v42 = vld [vmem:[%s12898_s7] sm:$0xff]   ;;  %v13382_v52 = vld [vmem:[#allocation66_spill] sm:$0xff]  ;;  %v13383_v26 = vld [vmem:[#allocation67_spill] sm:$0xff] }
 0x99c   :  { %v6765_v29 = vmul.f32 0.5, %v6758_v56  ;;  %v6770_v24 = vmul.f32 0.5, %v6760_v21  ;;  %v13381_v56 = vld [vmem:[#allocation28_spill] sm:$0xff]  ;;  %v7330_v36 = vpack.c.bf16 %v12646_v32, %v13383_v26  ;;  %v9381_v50 = vld [vmem:[%s12899_s9 + $0x8] sm:$0xff]   ;;  %v9382_v23 = vld [vmem:[%s12899_s9 + $0x10] sm:$0xff]  }
 0x99d   :  { %9534 = vtanh.f32 %v6761_v2  ;;  %v7329_v21 = vpack.c.bf16 %v13382_v52, %v13381_v56  ;;  %v9380_v2 = vld [vmem:[%s12899_s9] sm:$0xff]  }
 0x99e   :  { %9536 = vtanh.f32 %v6765_v29  ;;  %v9383_v29 = vld [vmem:[%s12899_s9 + $0x18] sm:$0xff]  }
 0x99f   :  { %9538 = vtanh.f32 %v6759_v11 }
 0x9a0   :  { %9540 = vtanh.f32 %v6770_v24  ;;  %v9384_v24 = vld [vmem:[%s12899_s9 + $0x20] sm:$0xff]  }
 0x9a7   :  { %v9535_v3 = vpop.eup %9534 }
 0x9a8   :  { %v9537_v27 = vpop.eup %9536  ;;  %v6763_v54 = vmul.f32 0.5, %v9535_v3  ;;  %v9385_v3 = vld [vmem:[%s12899_s9 + $0x28] sm:$0xff]  }
 0x9a9   :  { %v6767_v58 = vmul.f32 0.5, %v9537_v27  ;;  %v9539_v40 = vpop.eup %9538  ;;  %v9386_v27 = vld [vmem:[%s12899_s9 + $0x30] sm:$0xff]  }
 0x9aa   :  { %v6764_v60 = vadd.f32 0.5, %v6763_v54  ;;  %v9541_v5 = vpop.eup %9540  ;;  %v9387_v54 = vld [vmem:[%s12899_s9 + $0x38] sm:$0xff]  }
 0x9ab   :  { %v6768_v37 = vadd.f32 0.5, %v6767_v58  ;;  %v6772_v55 = vmul.f32 0.5, %v9541_v5 }
 0x9ac   :  { %v6775_v47 = vmul.f32 %v9539_v40, %v6764_v60 }
 0x9ad   :  { %v6774_v1 = vmul.f32 %v6768_v37, %v12458_v0  ;;  %v6773_v57 = vadd.f32 0.5, %v6772_v55  ;;  %v6434_v0 = vmul.f32 0.5, %v6424_v8 }
 0x9af   :  { %v6776_v4 = vadd.f32 %v6775_v47, %v6774_v1 }
 0x9b1   :  { %9542 = vtanh.f32 %v6776_v4 }
 0x9b2   :  { %9544 = vtanh.f32 %v6434_v0 }
 0x9b3   :  { %9546 = vtanh.f32 %v12730_v43 }
 0x9bb   :  { %v9543_v53 = vpop.eup %9542 }
 0x9bc   :  { %v6778_v28 = vmul.f32 %v9543_v53, %v6773_v57 }
 0x9be   :  { %v6779_v46 = vpack.c.bf16 %v6778_v28, %v6778_v28 }
 0x9c0   :  { %7005 = vmatmul.mubr.bf16.vlgmr.msra.gmra.mrb[104].mxu0 %v6779_v46  ;;  %7046 = vmatmul.mubr.bf16.vlgmr.msra.gmra.mrb[104].mxu1 %v6779_v46 }
 0x9c1   :  { %7215 = vmatpush1.bf16.msra.mxu0 %v12464_v22  ;;  %7256 = vmatpush1.bf16.msra.mxu1 %v12469_v10  ;;  %v13366_v22 = vld [vmem:[#allocation56_spill] sm:$0xff]  ;;  %v13368_v10 = vld [vmem:[#allocation58_spill] sm:$0xff] }
 0x9c2   :  { %7216 = vmatprep.subr.bf16.mxu0 %v12476_v30  ;;  %7257 = vmatprep.subr.bf16.mxu1 %v12481_v6  ;;  %v13369_v30 = vld [vmem:[#allocation59_spill] sm:$0xff]  ;;  %v13370_v6 = vld [vmem:[#allocation8_spill] sm:$0xff] }
 0x9c3   :  { %7246 = vmatprep.mubr.bf16.mxu0 %v13081_v31  ;;  %7287 = vmatprep.mubr.bf16.mxu1 %v13081_v31  ;;  %v13367_v31 = vld [vmem:[#allocation57_spill] sm:$0xff] }
 0x9c5   :  { %7217 = vmatpush1.bf16.msra.mxu0 %v12492_v25  ;;  %7258 = vmatpush1.bf16.msra.mxu1 %v12497_v33  ;;  %v9545_v25 = vpop.eup %9544  ;;  %v13371_v33 = vld [vmem:[#allocation16_spill] sm:$0xff] }
 0x9c6   :  { %7218 = vmatprep.subr.bf16.mxu0 %v12504_v45  ;;  %7259 = vmatprep.subr.bf16.mxu1 %v12509_v44  ;;  %v13372_v45 = vld [vmem:[#allocation17_spill] sm:$0xff]  ;;  %v13373_v44 = vld [vmem:[#allocation18_spill] sm:$0xff]  ;;  %v9547_v15 = vpop.eup %9546 }
 0x9c9   :  { %7219 = vmatpush1.bf16.msra.mxu0 %v12518_v20  ;;  %7260 = vmatpush1.bf16.msra.mxu1 %v12523_v35  ;;  %v13374_v20 = vld [vmem:[#allocation19_spill] sm:$0xff]  ;;  %v6436_v35 = vmul.f32 0.5, %v9545_v25 }
 0x9ca   :  { %7220 = vmatprep.subr.bf16.mxu0 %v12530_v49  ;;  %7261 = vmatprep.subr.bf16.mxu1 %v13366_v22  ;;  %v13375_v49 = vld [vmem:[#allocation9_spill] sm:$0xff] }
 0x9cb   :  { %v6437_v51 = vadd.f32 0.5, %v6436_v35 }
 0x9cd   :  { %7221 = vmatpush1.bf16.msra.mxu0 %v13367_v31  ;;  %7262 = vmatpush1.bf16.msra.mxu1 %v13368_v10  ;;  %v12767_v39 = vmul.f32 %v9547_v15, %v6437_v51 }
 0x9ce   :  { %7222 = vmatprep.subr.bf16.mxu0 %v13369_v30  ;;  %7263 = vmatprep.subr.bf16.mxu1 %v13370_v6 }
 0x9cf   :  { %v6445_v62 = vpack.c.bf16 %v12767_v39, %v12767_v39 }
 0x9d1   :  { %7223 = vmatpush1.bf16.msra.mxu0 %v13371_v33  ;;  %7264 = vmatpush1.bf16.msra.mxu1 %v13372_v45 }
 0x9d2   :  { %7224 = vmatprep.subr.bf16.mxu0 %v13373_v44  ;;  %7265 = vmatprep.subr.bf16.mxu1 %v13374_v20 }
 0x9d5   :  { %7225 = vmatpush1.bf16.msra.mxu0 %v13375_v49  ;;  %7266 = vmatpush1.bf16.msra.mxu1 %v13376_v14 }
 0x9d6   :  { %7226 = vmatprep.subr.bf16.mxu0 %v13377_v41  ;;  %7267 = vmatprep.subr.bf16.mxu1 %v13378_v9 }
 0x9d9   :  { %7227 = vmatpush1.bf16.msra.mxu0 %v12615_v13  ;;  %7268 = vmatpush1.bf16.msra.mxu1 %v12620_v34  ;;  %v9373_v13 = vld [vmem:[%s12898_s7 + $0x8] sm:$0xff]   ;;  %v13379_v34 = vld [vmem:[#allocation30_spill] sm:$0xff] }
 0x9da   :  { %7228 = vmatprep.subr.bf16.mxu0 %v12627_v48  ;;  %7269 = vmatprep.subr.bf16.mxu1 %v12632_v19  ;;  %v13380_v48 = vld [vmem:[#allocation69_spill] sm:$0xff]  ;;  %v9374_v19 = vld [vmem:[%s12898_s7 + $0x10] sm:$0xff]  }
 0x9db   :  { %v7328_v11 = vpack.c.bf16 %v13380_v48, %v13379_v34 }
 0x9dd   :  { %7229 = vmatpush1.bf16.msra.mxu0 %v12639_v17  ;;  %7270 = vmatpush1.bf16.msra.mxu1 %v12644_v38  ;;  %v9375_v38 = vld [vmem:[%s12898_s7 + $0x18] sm:$0xff]   ;;  %v9376_v17 = vld [vmem:[%s12898_s7 + $0x20] sm:$0xff]  }
 0x9de   :  { %8713 = vmatprep.subr.bf16.mxu0 %v9372_v42  ;;  %8737 = vmatprep.subr.bf16.mxu1 %v9380_v2 }
 0x9e0   :  { %7247 = vmatmul.mubr.bf16.vlgmr.msra.gmra.mrb[108].mxu0 %v6445_v62  ;;  %7288 = vmatmul.mubr.bf16.vlgmr.msra.gmra.mrb[108].mxu1 %v6445_v62 }
 0x9e1   :  { %8714 = vmatpush3.bf16.msra.mxu0 %v9372_v42  ;;  %8729 = vmatprep.mubr.bf16.mxu0 %v7328_v11 }
 0x9e2   :  { %8715 = vmatprep.subr.bf16.mxu0 %v9373_v13  ;;  %8738 = vmatpush3.bf16.msra.mxu1 %v9380_v2 }
 0x9e3   :  { %8739 = vmatprep.subr.bf16.mxu1 %v9381_v50 }
 0x9e5   :  { %8716 = vmatpush3.bf16.msra.mxu0 %v9373_v13 }
 0x9e6   :  { %8717 = vmatprep.subr.bf16.mxu0 %v9374_v19  ;;  %8740 = vmatpush3.bf16.msra.mxu1 %v9381_v50 }
 0x9e7   :  { %8741 = vmatprep.subr.bf16.mxu1 %v9382_v23 }
 0x9e9   :  { %8718 = vmatpush3.bf16.msra.mxu0 %v9374_v19 }
 0x9ea   :  { %8719 = vmatprep.subr.bf16.mxu0 %v9375_v38  ;;  %8742 = vmatpush3.bf16.msra.mxu1 %v9382_v23 }
 0x9eb   :  { %8743 = vmatprep.subr.bf16.mxu1 %v9383_v29 }
 0x9ed   :  { %8720 = vmatpush3.bf16.msra.mxu0 %v9375_v38 }
 0x9ee   :  { %8721 = vmatprep.subr.bf16.mxu0 %v9376_v17  ;;  %8744 = vmatpush3.bf16.msra.mxu1 %v9383_v29 }
 0x9ef   :  { %8745 = vmatprep.subr.bf16.mxu1 %v9384_v24 }
 0x9f1   :  { %8722 = vmatpush3.bf16.msra.mxu0 %v9376_v17 }
 0x9f2   :  { %8723 = vmatprep.subr.bf16.mxu0 %v9377_v61  ;;  %8746 = vmatpush3.bf16.msra.mxu1 %v9384_v24 }
 0x9f3   :  { %8747 = vmatprep.subr.bf16.mxu1 %v9385_v3 }
 0x9f5   :  { %8724 = vmatpush3.bf16.msra.mxu0 %v9377_v61 }
 0x9f6   :  { %8725 = vmatprep.subr.bf16.mxu0 %v9378_v59  ;;  %8748 = vmatpush3.bf16.msra.mxu1 %v9385_v3 }
 0x9f7   :  { %8749 = vmatprep.subr.bf16.mxu1 %v9386_v27 }
 0x9f9   :  { %8726 = vmatpush3.bf16.msra.mxu0 %v9378_v59 }
 0x9fa   :  { %8727 = vmatprep.subr.bf16.mxu0 %v9379_v63  ;;  %8750 = vmatpush3.bf16.msra.mxu1 %v9386_v27 }
 0x9fb   :  { %8751 = vmatprep.subr.bf16.mxu1 %v9387_v54 }
 0x9fd   :  { %8728 = vmatpush3.bf16.msra.mxu0 %v9379_v63 }
 0x9fe   :  { %8752 = vmatpush3.bf16.msra.mxu1 %v9387_v54 }
 0xa00   :  { %8730 = vmatmul.mubr.bf16.vlgmr.msra.gmra.mrb[112].mxu0 %v7329_v21 }
 0xa01   :  { %8733 = vmatprep.mubr.bf16.mxu0 %v7330_v36 }
 0xa93   :  { %v7006_v58 = vpop.f32.mrb[104].mxu0  ;;  %v7047_v60 = vpop.f32.mrb[104].mxu1 }
 0xa94   :  { %v7008_v40 = vpop.f32.mrb[105].mxu0  ;;  %v7049_v37 = vpop.f32.mrb[105].mxu1 }
 0xa95   :  { %v7010_v47 = vpop.f32.mrb[106].mxu0  ;;  %v7051_v1 = vpop.f32.mrb[106].mxu1 }
 0xa96   :  { %v7011_v4 = vpop.f32.mrb[107].mxu0  ;;  %v7052_v5 = vpop.f32.mrb[107].mxu1 }
 0xab3   :  { %v7248_v55 = vpop.f32.mrb[108].mxu0  ;;  %v7289_v57 = vpop.f32.mrb[108].mxu1 }
 0xab4   :  { %v7249_v53 = vadd.f32 %v7248_v55, %v7006_v58  ;;  %v7290_v28 = vadd.f32 %v7289_v57, %v7047_v60  ;;  %v7250_v46 = vpop.f32.mrb[109].mxu0  ;;  %v7291_v8 = vpop.f32.mrb[109].mxu1 }
 0xab5   :  { %v7251_v0 = vadd.f32 %v7250_v46, %v7008_v40  ;;  %v7292_v22 = vadd.f32 %v7291_v8, %v7049_v37  ;;  %v7252_v31 = vpop.f32.mrb[110].mxu0  ;;  %v7293_v10 = vpop.f32.mrb[110].mxu1 }
 0xab6   :  { %v7296_v30 = vadd.f32 %v7249_v53, %v10493_v12  ;;  %v7253_v6 = vpop.f32.mrb[111].mxu0  ;;  %v7294_v25 = vpop.f32.mrb[111].mxu1  ;;  %v7298_v20 = vadd.f32 %v7290_v28, %v13361_v7  ;;  %v8646_v7 = vld [vmem:[%s12900_s8] ss:$0 sm:$0xff] }
 0xab7   :  { %v7297_v33 = vadd.f32 %v7251_v0, %v10498_v16  ;;  %v7299_v35 = vadd.f32 %v7292_v22, %v10521_v18  ;;  %v9388_v6 = vld [vmem:[%s12901_s11] sm:$0xff]   ;;  %v9637_v25 = vmov 0.0  }
 0xab8   :  { %v7300_v45 = vmul.f32 0.5, %v7296_v30  ;;  %8761 = vmatprep.subr.bf16.mxu0 %v9637_v25  ;;  %8781 = vmatprep.subr.bf16.mxu1 %v9637_v25 }
 0xab9   :  { %v7304_v44 = vmul.f32 0.5, %v7297_v33  ;;  %v7309_v49 = vmul.f32 0.5, %v7299_v35  ;;  %8762 = vmatpush3.bf16.msra.mxu0 %v9388_v6  ;;  %v9389_v33 = vld [vmem:[%s12901_s11 + $0x8] sm:$0xff]  }
 0xaba   :  { %9548 = vtanh.f32 %v7300_v45  ;;  %8763 = vmatprep.subr.bf16.mxu0 %v9637_v25  ;;  %v9390_v45 = vld [vmem:[%s12901_s11 + $0x10] sm:$0xff]   ;;  %v9393_v35 = vld [vmem:[%s12901_s11 + $0x28] sm:$0xff]  }
 0xabb   :  { %9550 = vtanh.f32 %v7304_v44  ;;  %v9391_v44 = vld [vmem:[%s12901_s11 + $0x18] sm:$0xff]  }
 0xabc   :  { %9552 = vtanh.f32 %v7298_v20  ;;  %v9392_v20 = vld [vmem:[%s12901_s11 + $0x20] sm:$0xff]  }
 0xabd   :  { %9554 = vtanh.f32 %v7309_v49  ;;  %8764 = vmatpush3.bf16.msra.mxu0 %v9389_v33  ;;  %v9394_v49 = vld [vmem:[%s12901_s11 + $0x30] sm:$0xff]  }
 0xabe   :  { %8765 = vmatprep.subr.bf16.mxu0 %v9637_v25 }
 0xac1   :  { %8766 = vmatpush3.bf16.msra.mxu0 %v9390_v45 }
 0xac2   :  { %8767 = vmatprep.subr.bf16.mxu0 %v9637_v25 }
 0xac4   :  { %v9549_v14 = vpop.eup %9548 }
 0xac5   :  { %v9551_v41 = vpop.eup %9550  ;;  %v7302_v9 = vmul.f32 0.5, %v9549_v14  ;;  %8768 = vmatpush3.bf16.msra.mxu0 %v9391_v44  ;;  %v9395_v14 = vld [vmem:[%s12901_s11 + $0x38] sm:$0xff]  }
 0xac6   :  { %v7306_v15 = vmul.f32 0.5, %v9551_v41  ;;  %v9553_v51 = vpop.eup %9552  ;;  %8769 = vmatprep.subr.bf16.mxu0 %v9637_v25  ;;  %v9396_v41 = vld [vmem:[%s12902_s13] sm:$0xff]  }
 0xac7   :  { %v7303_v12 = vadd.f32 0.5, %v7302_v9  ;;  %v9555_v11 = vpop.eup %9554  ;;  %v9397_v9 = vld [vmem:[%s12902_s13 + $0x8] ss:$0 sps:$4 sm:$0x33]  }
 0xac8   :  { %v7307_v42 = vadd.f32 0.5, %v7306_v15  ;;  %v7311_v18 = vmul.f32 0.5, %v9555_v11  ;;  %v7816_v15 = vsel %vm7814_vm3, %v9397_v9, 0 }
 0xac9   :  { %v7314_v62 = vmul.f32 %v9553_v51, %v7303_v12  ;;  %8770 = vmatpush3.bf16.msra.mxu0 %v9392_v20  ;;  %v8655_v12 = vld [vmem:[%s12903_s10] ss:$0 sm:$0xff] }
 0xaca   :  { %v7313_v16 = vmul.f32 %v7307_v42, %v12730_v43  ;;  %v7312_v36 = vadd.f32 0.5, %v7311_v18  ;;  %8771 = vmatprep.subr.bf16.mxu0 %v9637_v25 }
 0xacc   :  { %v7315_v13 = vadd.f32 %v7314_v62, %v7313_v16 }
 0xacd   :  { %8772 = vmatpush3.bf16.msra.mxu0 %v9393_v35 }
 0xace   :  { %9556 = vtanh.f32 %v7315_v13  ;;  %8773 = vmatprep.subr.bf16.mxu0 %v9637_v25 }
 0xad1   :  { %8774 = vmatpush3.bf16.msra.mxu0 %v9394_v49 }
 0xad2   :  { %8775 = vmatprep.subr.bf16.mxu0 %v9637_v25 }
 0xad3   :  { %v8731_v19 = vpop.f32.mrb[112].mxu0 }
 0xad4   :  { %v7446_v38 = vadd.f32 %v8731_v19, %v8646_v7  ;;  %v7437_v17 = vpop.f32.mrb[113].mxu0 }
 0xad5   :  { %v7438_v61 = vadd.f32 %v8646_v7, %v7437_v17  ;;  %v8732_v59 = vpop.f32.mrb[114].mxu0  ;;  %8776 = vmatpush3.bf16.msra.mxu0 %v9395_v14 }
 0xad6   :  { %9558 = vtanh.f32 %v7446_v38  ;;  %v7449_v63 = vadd.f32 %v8732_v59, %v8646_v7  ;;  %v7440_v21 = vpop.f32.mrb[115].mxu0 }
 0xad7   :  { %9560 = vtanh.f32 %v7438_v61  ;;  %v7441_v2 = vadd.f32 %v8646_v7, %v7440_v21 }
 0xad8   :  { %v9557_v43 = vpop.eup %9556  ;;  %9562 = vtanh.f32 %v7449_v63 }
 0xad9   :  { %9564 = vtanh.f32 %v7441_v2  ;;  %v12837_v50 = vmul.f32 %v9557_v43, %v7312_v36 }
 0xadb   :  { %v7331_v23 = vpack.c.bf16 %v12837_v50, %v12767_v39 }
 0xadd   :  { %8734 = vmatmul.mubr.bf16.gmra.mrb[116].mxu0 %v7331_v23 }
 0xade   :  { %8777 = vmatprep.mubr.msk.bf16.mxu0 %vm9638_vm2, %v9637_v25 }
 0xae0   :  { %v9559_v29 = vpop.eup %9558 }
 0xae1   :  { %v9561_v24 = vpop.eup %9560 }
 0xae2   :  { %v9563_v3 = vpop.eup %9562 }
 0xae3   :  { %v9565_v27 = vpop.eup %9564  ;;  %v7477_v54 = vpack.c.bf16 %v9563_v3, %v9559_v29 }
 0xae4   :  { %v7476_v58 = vpack.c.bf16 %v9565_v27, %v9561_v24 }
 0xae6   :  { %8753 = vmatprep.mubr.bf16.mxu1 %v7476_v58 }
 0xae7   :  { %8754 = vmatmul.mubr.bf16.vlgmr.msra.gmra.mrb[112].mxu1 %v7477_v54 }
 0xae8   :  { %8782 = vmatpush3.bf16.msra.mxu1 %v9396_v41 }
 0xae9   :  { %8783 = vmatprep.subr.bf16.mxu1 %v9637_v25 }
 0xaec   :  { %8784 = vmatpush3.bf16.msra.mxu1 %v7816_v15 }
 0xbb0   :  { %v8735_v60 = vpop.f32.mrb[116].mxu0 }
 0xbb1   :  { %v7462_v40 = vadd.f32 %v8735_v60, %v8646_v7  ;;  %v7453_v37 = vpop.f32.mrb[117].mxu0 }
 0xbb2   :  { %v7454_v47 = vadd.f32 %v8646_v7, %v7453_v37  ;;  %v8736_v1 = vpop.f32.mrb[118].mxu0 }
 0xbb3   :  { %9566 = vtanh.f32 %v7462_v40  ;;  %v7465_v4 = vadd.f32 %v8736_v1, %v8646_v7  ;;  %v7456_v5 = vpop.f32.mrb[119].mxu0 }
 0xbb4   :  { %9568 = vtanh.f32 %v7454_v47  ;;  %v7457_v55 = vadd.f32 %v8646_v7, %v7456_v5 }
 0xbb5   :  { %9570 = vtanh.f32 %v7465_v4 }
 0xbb6   :  { %9572 = vtanh.f32 %v7457_v55 }
 0xbba   :  { %v8755_v57 = vpop.f32.mrb[112].mxu1 }
 0xbbb   :  { %v7585_v53 = vpop.f32.mrb[113].mxu1  ;;  %v7594_v42 = vadd.f32 %v8755_v57, %v8655_v12 }
 0xbbc   :  { %v8756_v28 = vpop.f32.mrb[114].mxu1  ;;  %v7586_v13 = vadd.f32 %v8655_v12, %v7585_v53 }
 0xbbd   :  { %v9567_v46 = vpop.eup %9566  ;;  %v7588_v8 = vpop.f32.mrb[115].mxu1  ;;  %v7597_v18 = vadd.f32 %v8756_v28, %v8655_v12 }
 0xbbe   :  { %v9569_v0 = vpop.eup %9568  ;;  %v7589_v61 = vadd.f32 %v8655_v12, %v7588_v8 }
 0xbbf   :  { %v9571_v22 = vpop.eup %9570 }
 0xbc0   :  { %v9573_v31 = vpop.eup %9572  ;;  %v7479_v10 = vpack.c.bf16 %v9571_v22, %v9567_v46 }
 0xbc1   :  { %v7478_v30 = vpack.c.bf16 %v9573_v31, %v9569_v0 }
 0xbc3   :  { %8757 = vmatprep.mubr.bf16.mxu1 %v7478_v30 }
 0xbc4   :  { %8758 = vmatmul.mubr.bf16.gmra.mrb[116].mxu1 %v7479_v10 }
 0xbc5   :  { %8785 = vmatprep.mubr.msk.bf16.mxu1 %vm9638_vm2, %v9637_v25 }
 0xc97   :  { %v8759_v51 = vpop.f32.mrb[116].mxu1 }
 0xc98   :  { %v7610_v62 = vadd.f32 %v8759_v51, %v8655_v12  ;;  %v7601_v16 = vpop.f32.mrb[117].mxu1 }
 0xc99   :  { %v7602_v11 = vadd.f32 %v8655_v12, %v7601_v16  ;;  %v8760_v7 = vpop.f32.mrb[118].mxu1 }
 0xc9a   :  { %v7618_v19 = vmax.f32 %v7594_v42, %v7610_v62  ;;  %v7613_v38 = vadd.f32 %v8760_v7, %v8655_v12  ;;  %v7604_v17 = vpop.f32.mrb[119].mxu1 }
 0xc9b   :  { %v7616_v59 = vmax.f32 %v7586_v13, %v7602_v11  ;;  %v7605_v63 = vadd.f32 %v8655_v12, %v7604_v17 }
 0xc9c   :  { %v7619_v21 = vmax.f32 %v7597_v18, %v7613_v38 }
 0xc9d   :  { %v7617_v36 = vmax.f32 %v7589_v61, %v7605_v63 }
 0xc9e   :  { %v7621_v2 = vmax.f32 %v7618_v19, %v7619_v21 }
 0xc9f   :  { %v7620_v43 = vmax.f32 %v7616_v59, %v7617_v36 }
 0xca1   :  { %v7622_v23 = vmax.f32 %v7620_v43, %v7621_v2 }
 0xca3   :  { %v7623_v29 = vsub.f32 %v7586_v13, %v7622_v23  ;;  %v7624_v24 = vsub.f32 %v7589_v61, %v7622_v23  ;;  %v7625_v3 = vsub.f32 %v7594_v42, %v7622_v23  ;;  %v7626_v27 = vsub.f32 %v7597_v18, %v7622_v23 }
 0xca4   :  { %v7627_v54 = vsub.f32 %v7602_v11, %v7622_v23  ;;  %v7628_v58 = vsub.f32 %v7605_v63, %v7622_v23  ;;  %v7629_v60 = vsub.f32 %v7610_v62, %v7622_v23  ;;  %v7630_v40 = vsub.f32 %v7613_v38, %v7622_v23 }
 0xca5   :  { %v7631_v37 = vmul.f32 1.442695, %v7623_v29  ;;  %v7633_v47 = vmul.f32 1.442695, %v7624_v24  ;;  %v7635_v1 = vmul.f32 1.442695, %v7625_v3 }
 0xca6   :  { %v7637_v4 = vmul.f32 1.442695, %v7626_v27  ;;  %v7639_v5 = vmul.f32 1.442695, %v7627_v54  ;;  %v7641_v55 = vmul.f32 1.442695, %v7628_v58 }
 0xca7   :  { %9574 = vpow2.f32 %v7631_v37  ;;  %v7643_v57 = vmul.f32 1.442695, %v7629_v60  ;;  %v7645_v53 = vmul.f32 1.442695, %v7630_v40 }
 0xca8   :  { %9576 = vpow2.f32 %v7633_v47 }
 0xca9   :  { %9578 = vpow2.f32 %v7635_v1 }
 0xcaa   :  { %9580 = vpow2.f32 %v7637_v4 }
 0xcab   :  { %9582 = vpow2.f32 %v7639_v5 }
 0xcac   :  { %9584 = vpow2.f32 %v7641_v55 }
 0xcad   :  { %9586 = vpow2.f32 %v7643_v57 }
 0xcae   :  { %9588 = vpow2.f32 %v7645_v53 }
 0xcb1   :  { %v9575_v28 = vpop.eup %9574 }
 0xcb2   :  { %v9577_v46 = vpop.eup %9576 }
 0xcb3   :  { %v7647_v8 = vadd.f32 %v9577_v46, %v9575_v28  ;;  %v9579_v0 = vpop.eup %9578 }
 0xcb4   :  { %v9581_v31 = vpop.eup %9580 }
 0xcb5   :  { %v7648_v22 = vadd.f32 %v9579_v0, %v7647_v8  ;;  %v9583_v30 = vpop.eup %9582 }
 0xcb6   :  { %v9585_v25 = vpop.eup %9584 }
 0xcb7   :  { %v7649_v10 = vadd.f32 %v9581_v31, %v7648_v22  ;;  %v9587_v45 = vpop.eup %9586 }
 0xcb8   :  { %v9589_v20 = vpop.eup %9588 }
 0xcb9   :  { %v7650_v6 = vadd.f32 %v9583_v30, %v7649_v10 }
 0xcbb   :  { %v7651_v33 = vadd.f32 %v9585_v25, %v7650_v6 }
 0xcbd   :  { %v7652_v44 = vadd.f32 %v9587_v45, %v7651_v33 }
 0xcbf   :  { %v7653_v35 = vadd.f32 %v9589_v20, %v7652_v44 }
 0xcc1   :  { %9590 = vrcp.f32 %v7653_v35 }
 0xccb   :  { %v9591_v49 = vpop.eup %9590 }
 0xccc   :  { %v7660_v14 = vmul.f32 %v9591_v49, %v9585_v25  ;;  %v7655_v41 = vmul.f32 %v9591_v49, %v9575_v28  ;;  %v7656_v9 = vmul.f32 %v9591_v49, %v9577_v46  ;;  %v7657_v15 = vmul.f32 %v9591_v49, %v9579_v0 }
 0xccd   :  { %v7658_v12 = vmul.f32 %v9591_v49, %v9581_v31  ;;  %v7659_v51 = vmul.f32 %v9591_v49, %v9583_v30  ;;  %v7661_v42 = vmul.f32 %v9591_v49, %v9587_v45  ;;  %v7662_v62 = vmul.f32 %v9591_v49, %v9589_v20 }
 0xcce   :  { %v7663_v16 = vmul.f32 %v7655_v41, %v13379_v34  ;;  %v7664_v13 = vmul.f32 %v7656_v9, %v13380_v48  ;;  %v7665_v11 = vmul.f32 %v7657_v15, %v13381_v56  ;;  %v7668_v61 = vmul.f32 %v7660_v14, %v12646_v32  ;;  %v8664_v56 = vld [vmem:[%s12904_s12] ss:$0 sm:$0xff] }
 0xccf   :  { %v7666_v18 = vmul.f32 %v7658_v12, %v13382_v52  ;;  %v7667_v38 = vmul.f32 %v7659_v51, %v13383_v26  ;;  %v7669_v63 = vmul.f32 %v7661_v42, %v12767_v39  ;;  %v7670_v36 = vmul.f32 %v7662_v62, %v12837_v50  ;;  %v8673_v39 = vld [vmem:[%s12905_s14] ss:$0 sm:$0xff] }
 0xcd0   :  { %v7671_v7 = vadd.f32 %v7664_v13, %v7663_v16 }
 0xcd2   :  { %v7672_v19 = vadd.f32 %v7671_v7, %v7665_v11 }
 0xcd4   :  { %v7673_v17 = vadd.f32 %v7672_v19, %v7666_v18 }
 0xcd6   :  { %v7674_v59 = vadd.f32 %v7673_v17, %v7667_v38 }
 0xcd8   :  { %v7675_v21 = vadd.f32 %v7674_v59, %v7668_v61 }
 0xcda   :  { %v7676_v34 = vadd.f32 %v7675_v21, %v7669_v63 }
 0xcdc   :  { %v7677_v2 = vadd.f32 %v7676_v34, %v7670_v36 }
 0xcde   :  { %v7678_v48 = vpack.c.bf16 %v7677_v2, %v7677_v2 }
 0xce0   :  { %8778 = vmatmul.mubr.bf16.vlgmr.msra.gmra.mrb[120].mxu0 %v7678_v48 }
 0xdb3   :  { %v7784_v52 = vpop.f32.mrb[120].mxu0 }
 0xdb4   :  { %v7785_v43 = vadd.f32 %v8664_v56, %v7784_v52  ;;  %v8779_v26 = vpop.f32.mrb[121].mxu0 }
 0xdb5   :  { %v7787_v23 = vpop.f32.mrb[122].mxu0 }
 0xdb6   :  { %v7790_v32 = vpack.c.bf16 %v7785_v43, %v7785_v43  ;;  %v8780_v29 = vpop.f32.mrb[123].mxu0 }
 0xdb8   :  { %8786 = vmatmul.mubr.msk.bf16.vlgmr.msra.gmra.mrb[120].mxu1 %vm7810_vm4, %v7790_v32 }
 0xe8b   :  { %v7852_v50 = vpop.f32.mrb[120].mxu1 }
 0xe8c   :  { %v7853_v24 = vadd.f32 %v8673_v39, %v7852_v50  ;;  %v8787_v3 = vpop.f32.mrb[121].mxu1 }
 0xe8d   :  { %v7855_v27 = vpop.f32.mrb[122].mxu1 }
 0xe8e   :  { %7859 = vst.msk [vmem:[%s12906_s15] sm:$0xff] %vm7858_vm5, %v7853_v24  ;;  %v8788_v54 = vpop.f32.mrb[123].mxu1 }

</bundles_post_ra>
